<compile_context>
chip_gen: v5e
topology: v5e:2x2
jax: 0.10.0
libtpu: 0.0.40
codegen_flags: <defaults>
</compile_context>

<pallas_src>
import math

import jax
import jax.numpy as jnp
from jax.experimental import pallas as pl
from jax.experimental.pallas import tpu as pltpu


# ----------------------------- small helpers -----------------------------

def _pick_block(n, cap):
    """Largest divisor of n that is <= cap."""
    cap = max(1, min(n, cap))
    for d in range(cap, 0, -1):
        if n % d == 0:
            return d
    return 1


def _conv_taps(w_list, first_axis='v'):
    """Build the (9, Cin, sum(Cout)) tap-weight stack for a 3x3/stride1/pad1 conv.

    `first_axis` names which image axis the kernel's OUTER spatial offset walks:
      'v' -> input image is laid out (V, T, Cin); tap index = kv*3 + kt
      't' -> input image is laid out (T, V, Cin); tap index = kt*3 + kv
    Each w in w_list is an OIHW (Cout, Cin, 3, 3) conv weight; their outputs are
    concatenated along the Cout axis (fused multi-head conv).
    """
    taps = []
    for a in range(3):
        for b in range(3):
            kv, kt = (a, b) if first_axis == 'v' else (b, a)
            taps.append(jnp.concatenate([w[:, :, kv, kt].T for w in w_list], axis=1))
    return jnp.stack(taps, axis=0)                    # (9, Cin, sum Cout)


# --------------------- fused QKV 3x3 conv (im2col in-kernel) ---------------------

def _make_qkv_kernel(V, T, C, C8, C2):
    Dv = 2 * C8 + C2

    def kernel(xp_ref, w_ref, ov_ref, ot_ref):
        # xp_ref: (1, V+2, T+2, C) bf16 (spatially padded input)
        # w_ref : (9, C, 2*Dv) bf16   (taps x Cin x [v.q|v.k|v.v|t.q|t.k|t.v])
        # ov_ref: (1, T, V, Dv) bf16  (vAttn branch, pre-transposed for attention)
        # ot_ref: (1, V, T, Dv) bf16  (tAttn branch)
        xp = xp_ref[0]
        acc = jnp.zeros((V * T, 2 * Dv), jnp.float32)
        for a in range(3):              # 9 shifted tap-matmuls == fused im2col
            for b in range(3):
                lhs = xp[a:a + V, b:b + T, :].reshape(V * T, C)
                acc = acc + jnp.dot(lhs, w_ref[a * 3 + b],
                                    preferred_element_type=jnp.float32)
        # tanh on the q/k columns of each branch (value columns pass through).
        col = jax.lax.broadcasted_iota(jnp.int32, (1, 2 * Dv), 1)
        out = jnp.where((col % Dv) < 2 * C8, jnp.tanh(acc), acc)
        bv = out[:, :Dv].reshape(V, T, Dv)            # vAttn branch
        bt = out[:, Dv:].reshape(V, T, Dv)            # tAttn branch
        ov_ref[0] = jnp.transpose(bv, (1, 0, 2)).astype(jnp.bfloat16)   # (T, V, Dv)
        ot_ref[0] = bt.astype(jnp.bfloat16)                             # (V, T, Dv)

    return kernel


def pallas_qkv_conv(xp, wtaps, V, T, C, C8, C2):
    """xp: (B, V+2, T+2, C) bf16; wtaps: (9, C, 2*Dv) bf16 -> (qkv_v, qkv_t) bf16."""
    B = xp.shape[0]
    Dv = 2 * C8 + C2
    # TODO(synk): for large V*T tile the spatial plane with a halo instead of one
    # image per grid step (current block must fit VMEM; fine for typical ABODE shapes).
    return pl.pallas_call(
        _make_qkv_kernel(V, T, C, C8, C2),
        out_shape=(jax.ShapeDtypeStruct((B, T, V, Dv), jnp.bfloat16),
                   jax.ShapeDtypeStruct((B, V, T, Dv), jnp.bfloat16)),
        grid=(B,),
        in_specs=[pl.BlockSpec((1, V + 2, T + 2, C), lambda i: (i, 0, 0, 0)),
                  pl.BlockSpec((9, C, 2 * Dv), lambda i: (0, 0, 0))],
        out_specs=(pl.BlockSpec((1, T, V, Dv), lambda i: (i, 0, 0, 0)),
                   pl.BlockSpec((1, V, T, Dv), lambda i: (i, 0, 0, 0))),
        compiler_params=pltpu.CompilerParams(dimension_semantics=("parallel",)),
    )(xp, wtaps)


# --------------------- generic 3x3 conv (im2col in-kernel) ---------------------

def _make_conv3x3_kernel(s1, s2, cin, cout, transpose_out):
    def kernel(ap_ref, w_ref, o_ref):
        # ap_ref: (1, s1+2, s2+2, cin) bf16; w_ref: (9, cin, cout) bf16
        # o_ref : (1, s1*s2, cout) f32 (rows reordered to (s2, s1) if transpose_out)
        ap = ap_ref[0]
        acc = jnp.zeros((s1 * s2, cout), jnp.float32)
        for a in range(3):
            for b in range(3):
                lhs = ap[a:a + s1, b:b + s2, :].reshape(s1 * s2, cin)
                acc = acc + jnp.dot(lhs, w_ref[a * 3 + b],
                                    preferred_element_type=jnp.float32)
        if transpose_out:   # VMEM-local relayout; avoids an XLA HBM transpose
            acc = acc.reshape(s1, s2, cout).transpose(1, 0, 2).reshape(s1 * s2, cout)
        o_ref[0] = acc

    return kernel


def pallas_conv3x3(ap, wtaps, transpose_out=False):
    """ap: (N, S1+2, S2+2, Cin) bf16 (padded); wtaps: (9, Cin, Cout) bf16 -> (N, S1*S2, Cout) f32."""
    N, s1p, s2p, cin = ap.shape
    s1, s2 = s1p - 2, s2p - 2
    cout = wtaps.shape[2]
    return pl.pallas_call(
        _make_conv3x3_kernel(s1, s2, cin, cout, transpose_out),
        out_shape=jax.ShapeDtypeStruct((N, s1 * s2, cout), jnp.float32),
        grid=(N,),
        in_specs=[pl.BlockSpec((1, s1p, s2p, cin), lambda i: (i, 0, 0, 0)),
                  pl.BlockSpec((9, cin, cout), lambda i: (0, 0, 0))],
        out_specs=pl.BlockSpec((1, s1 * s2, cout), lambda i: (i, 0, 0)),
        compiler_params=pltpu.CompilerParams(dimension_semantics=("parallel",)),
    )(ap, wtaps)


# ----------------------------- batched attention -----------------------------

def _make_attn_kernel(c8):
    def kernel(qkv_ref, o_ref):
        # qkv: (Nb, L, Dv) bf16, columns [tanh(q) | tanh(k) | v]; one wide DMA.
        qkv = qkv_ref[...].astype(jnp.float32)
        q = qkv[..., :c8]
        k = qkv[..., c8:2 * c8]
        v = qkv[..., 2 * c8:]
        # TODO(synk): for c8 < ~32 a VPU broadcast-multiply + XLU reduce beats the
        # padded-K MXU matmul; kept as einsum for clarity/robustness.
        s = jnp.einsum('nic,njc->nij', q, k, preferred_element_type=jnp.float32)
        s = s - jnp.max(s, axis=-1, keepdims=True)          # safe softmax
        p = jnp.exp(s)
        p = p * pl.reciprocal(jnp.sum(p, axis=-1, keepdims=True), approx=True)
        o_ref[...] = jnp.einsum('nij,njc->nic', p, v,
                                preferred_element_type=jnp.float32).astype(jnp.bfloat16)

    return kernel


def _attn_batch_block(n, L, Dv, C2):
    """Pick Nb against a VMEM budget, keeping >= 2 grid steps when possible."""
    per_slice = (2 * (L * Dv * 2) + 2 * (L * C2 * 2)          # double-buffered bf16 io
                 + (L * L + 2 * L * Dv + L * C2) * 4)         # f32 intermediates
    cap = max(1, (8 * 1024 * 1024) // max(per_slice, 1))
    if n >= 2:
        cap = min(cap, n // 2)     # >= 2 grid steps so both v7x TensorCores get work
    return _pick_block(n, cap)


def pallas_attention(qkv, C8):
    """softmax(q @ k^T) @ v for pre-tanh'd packed qkv.  qkv: (N, L, 2*C8 + C2) bf16."""
    n, L, Dv = qkv.shape
    C2 = Dv - 2 * C8
    nb = _attn_batch_block(n, L, Dv, C2)
    return pl.pallas_call(
        _make_attn_kernel(C8),
        out_shape=jax.ShapeDtypeStruct((n, L, C2), jnp.bfloat16),
        grid=(n // nb,),
        in_specs=[pl.BlockSpec((nb, L, Dv), lambda i: (i, 0, 0))],
        out_specs=pl.BlockSpec((nb, L, C2), lambda i: (i, 0, 0)),
        compiler_params=pltpu.CompilerParams(dimension_semantics=("parallel",)),
    )(qkv)


# -------------------------- fused SE + combine kernel --------------------------

def _combine_se_kernel(x_ref, x1_ref, x2_ref, w1t_ref, w2t_ref, o_ref):
    # x/x1/x2: (1, V*T, C) f32;  w1t: (C, C//16);  w2t: (C//16, C).
    x = x_ref[0]
    pooled = jnp.mean(x, axis=0, keepdims=True)                       # (1, C)
    h = jnp.maximum(jnp.dot(pooled, w1t_ref[...],
                            preferred_element_type=jnp.float32), 0.0)  # ReLU
    z = jnp.dot(h, w2t_ref[...], preferred_element_type=jnp.float32)
    se = 1.0 / (1.0 + jnp.exp(-z))                                    # Sigmoid (1, C)
    o_ref[0] = (x + x1_ref[0] + x2_ref[0]) * se


def pallas_combine_se(x_flat, x1, x2, w1t, w2t):
    """(x + x1 + x2) * SE(x) with the SE layer fully fused (x read once here)."""
    b, vt, c = x_flat.shape
    c16 = w1t.shape[1]
    # TODO(synk): for very large V*T*C tile the vt axis with a pooled-mean accumulator.
    return pl.pallas_call(
        _combine_se_kernel,
        out_shape=jax.ShapeDtypeStruct((b, vt, c), jnp.float32),
        grid=(b,),
        in_specs=[pl.BlockSpec((1, vt, c), lambda i: (i, 0, 0)),
                  pl.BlockSpec((1, vt, c), lambda i: (i, 0, 0)),
                  pl.BlockSpec((1, vt, c), lambda i: (i, 0, 0)),
                  pl.BlockSpec((c, c16), lambda i: (0, 0)),
                  pl.BlockSpec((c16, c), lambda i: (0, 0))],
        out_specs=pl.BlockSpec((1, vt, c), lambda i: (i, 0, 0)),
        compiler_params=pltpu.CompilerParams(dimension_semantics=("parallel",)),
    )(x_flat, x1, x2, w1t, w2t)


# ----------------------------- model forward -----------------------------

def parallel_attention_forward(x, params):
    """ParallelAttention.forward: (x + sigma_v*vAttn(x) + sigma_t*tAttn(x)) * SE(x)."""
    B, C, V, T = x.shape
    C8, C2 = C // 8, C // 2
    Dv = 2 * C8 + C2                                  # per-branch q|k|v channels

    # NCHW -> NHWC once; everything below stays channel-last row-major.
    x_h = jnp.transpose(x, (0, 2, 3, 1))              # (B, V, T, C)
    x_flat = x_h.reshape(B, V * T, C)
    pv, pt = params['v'], params['t']

    # ---- fused QKV conv: six 3x3 convs as one kernel, im2col fused in-kernel ----
    xp = jnp.pad(x_h.astype(jnp.bfloat16), ((0, 0), (1, 1), (1, 1), (0, 0)))
    wqkv = _conv_taps([pv['q'], pv['k'], pv['v'], pt['q'], pt['k'], pt['v']],
                      first_axis='v').astype(jnp.bfloat16)            # (9, C, 2*Dv)
    qkv_v, qkv_t = pallas_qkv_conv(xp, wqkv, V, T, C, C8, C2)
    # qkv_v: (B, T, V, Dv) bf16 (already transposed) ; qkv_t: (B, V, T, Dv) bf16

    # ---- attention (tanh already applied to q/k inside the conv kernel) ----
    av_v = pallas_attention(qkv_v.reshape(B * T, V, Dv), C8)          # (B*T, V, C2) bf16
    av_t = pallas_attention(qkv_t.reshape(B * V, T, Dv), C8)          # (B*V, T, C2) bf16

    # ---- per-branch 3x3 output conv, sigma folded into the (linear) weights ----
    avp_v = jnp.pad(av_v.reshape(B, T, V, C2), ((0, 0), (1, 1), (1, 1), (0, 0)))
    avp_t = jnp.pad(av_t.reshape(B, V, T, C2), ((0, 0), (1, 1), (1, 1), (0, 0)))
    wo_v = (_conv_taps([pv['o']], first_axis='t') * pv['sigma'][0]).astype(jnp.bfloat16)
    wo_t = (_conv_taps([pt['o']], first_axis='v') * pt['sigma'][0]).astype(jnp.bfloat16)
    x1 = pallas_conv3x3(avp_v, wo_v, transpose_out=True)              # (B, V*T, C) f32
    x2 = pallas_conv3x3(avp_t, wo_t, transpose_out=False)             # (B, V*T, C) f32

    # ---- fused SE + combine ----
    out = pallas_combine_se(x_flat, x1, x2,
                            params['se']['w1'].T.astype(jnp.float32),
                            params['se']['w2'].T.astype(jnp.float32))
    return out.reshape(B, V, T, C).transpose(0, 3, 1, 2)              # back to NCHW


# ----------------------------- pure-JAX reference -----------------------------

def _ref_conv3x3(x, w):
    return jax.lax.conv_general_dilated(
        x, w, window_strides=(1, 1), padding=((1, 1), (1, 1)),
        dimension_numbers=('NCHW', 'OIHW', 'NCHW'))


def reference_forward(x, params):
    B, C, V, T = x.shape

    def vattn(x, p):
        q = _ref_conv3x3(x, p['q']); k = _ref_conv3x3(x, p['k']); vv = _ref_conv3x3(x, p['v'])
        C8, C2 = q.shape[1], vv.shape[1]
        qb = jnp.tanh(q.transpose(0, 3, 2, 1).reshape(B * T, V, C8))
        kb = jnp.tanh(k.transpose(0, 3, 1, 2).reshape(B * T, C8, V))
        vb = vv.transpose(0, 3, 2, 1).reshape(B * T, V, C2)
        attn = jax.nn.softmax(jnp.einsum('nij,njk->nik', qb, kb), axis=-1)
        ab = jnp.einsum('nij,njk->nik', attn, vb)
        av = ab.reshape(B, T, V, C2).transpose(0, 3, 2, 1)
        return p['sigma'][0] * _ref_conv3x3(av, p['o'])

    def tattn(x, p):
        q = _ref_conv3x3(x, p['q']); k = _ref_conv3x3(x, p['k']); vv = _ref_conv3x3(x, p['v'])
        C8, C2 = q.shape[1], vv.shape[1]
        qb = jnp.tanh(q.transpose(0, 2, 3, 1).reshape(B * V, T, C8))
        kb = jnp.tanh(k.transpose(0, 2, 1, 3).reshape(B * V, C8, T))
        vb = vv.transpose(0, 2, 3, 1).reshape(B * V, T, C2)
        attn = jax.nn.softmax(jnp.einsum('nij,njk->nik', qb, kb), axis=-1)
        ab = jnp.einsum('nij,njk->nik', attn, vb)
        at = ab.reshape(B, V, T, C2).transpose(0, 3, 1, 2)
        return p['sigma'][0] * _ref_conv3x3(at, p['o'])

    def se(x, p):
        pooled = jnp.mean(x, axis=(2, 3))
        h = jax.nn.relu(pooled @ p['w1'].T)
        y = jax.nn.sigmoid(h @ p['w2'].T)
        return jnp.broadcast_to(y[:, :, None, None], x.shape)

    x1 = vattn(x, params['v'])
    x2 = tattn(x, params['t'])
    x3 = se(x, params['se'])
    return (x + x1 + x2) * x3


# ----------------------------- params & main -----------------------------

def init_params(key, C):
    C8, C2, C16 = C // 8, C // 2, C // 16
    ks = jax.random.split(key, 10)

    def conv_w(k, co, ci):
        return jax.random.normal(k, (co, ci, 3, 3), jnp.float32) / math.sqrt(ci * 9)

    def lin_w(k, co, ci):
        return jax.random.normal(k, (co, ci), jnp.float32) / math.sqrt(ci)

    # Note: PyTorch initializes sigma to zero (which would zero out x1/x2);
    # nonzero deterministic values are used here so the attention paths are exercised.
    return {
        'v': {'q': conv_w(ks[0], C8, C), 'k': conv_w(ks[1], C8, C),
              'v': conv_w(ks[2], C2, C), 'o': conv_w(ks[3], C, C2),
              'sigma': jnp.array([0.1], jnp.float32)},
        't': {'q': conv_w(ks[4], C8, C), 'k': conv_w(ks[5], C8, C),
              'v': conv_w(ks[6], C2, C), 'o': conv_w(ks[7], C, C2),
              'sigma': jnp.array([0.2], jnp.float32)},
        'se': {'w1': lin_w(ks[8], C16, C),   # Linear(C, C//16, bias=False).weight
               'w2': lin_w(ks[9], C, C16)},  # Linear(C//16, C, bias=False).weight
    }


if __name__ == "__main__":
    key = jax.random.PRNGKey(0)
    kx, kp = jax.random.split(key)

    B, C, V, T = 2, 32, 8, 8          # in_dim=32 so C//16, C//8, C//2 are all >= 1
    x = jax.random.normal(kx, (B, C, V, T), jnp.float32)
    params = init_params(kp, C)

    fwd = jax.jit(parallel_attention_forward)
    out = jax.block_until_ready(fwd(x, params))

    ref = reference_forward(x, params)
    assert out.shape == x.shape
    assert bool(jnp.all(jnp.isfinite(out)))
    # bf16 MXU operands + approx softmax reciprocal -> ~1e-2-scale deviation vs f32 ref.
    max_err = float(jnp.max(jnp.abs(out - ref)))
    assert bool(jnp.allclose(out, ref, rtol=3e-2, atol=3e-2)), f"max_err={max_err}"

    print("KERNEL_OK")
</pallas_src>

<mosaic_0001>
module attributes {stable_mosaic.version = 11 : i64} {
  func.func @kernel(%arg0: i32, %arg1: memref<8x8x24xbf16, #tpu.memory_space<vmem>>, %arg2: memref<8x8x16xbf16, #tpu.memory_space<vmem>>) attributes {dimension_semantics = [#tpu.dimension_semantics<parallel>], iteration_bounds = array<i64: 2>, scalar_prefetch = 0 : i64, scratch_operands = 0 : i64, tpu.core_type = #tpu.core_type<tc>, window_params = [{transform_indices = @transform_0, window_bounds = array<i64: 8, 8, 24>}, {transform_indices = @transform_1, window_bounds = array<i64: 8, 8, 16>}]} {
    %c0 = arith.constant 0 : index
    %c0_0 = arith.constant 0 : index
    %c0_1 = arith.constant 0 : index
    %0 = vector.load %arg1[%c0, %c0_0, %c0_1] : memref<8x8x24xbf16, #tpu.memory_space<vmem>>, vector<8x8x24xbf16>
    %1 = arith.extf %0 : vector<8x8x24xbf16> to vector<8x8x24xf32>
    %2 = vector.extract_strided_slice %1 {offsets = [0, 0, 0], sizes = [8, 8, 4], strides = [1, 1, 1]} : vector<8x8x24xf32> to vector<8x8x4xf32>
    %3 = vector.extract_strided_slice %1 {offsets = [0, 0, 4], sizes = [8, 8, 4], strides = [1, 1, 1]} : vector<8x8x24xf32> to vector<8x8x4xf32>
    %4 = vector.extract_strided_slice %1 {offsets = [0, 0, 8], sizes = [8, 8, 16], strides = [1, 1, 1]} : vector<8x8x24xf32> to vector<8x8x16xf32>
    "tpu.trace_start"() <{level = 10 : i32, message = "nic,njc->nij"}> : () -> ()
    %cst = arith.constant dense<0.000000e+00> : vector<8x8x8xf32>
    %5 = tpu.matmul %2, %3, %cst {dimension_numbers = #tpu.dot_dimension_numbers<[2], [2], [1], [1], [0, 0, 0, 1, 1, 1], [0], [0]>} : vector<8x8x4xf32>, vector<8x8x4xf32>, vector<8x8x8xf32> -> vector<8x8x8xf32>
    "tpu.trace_stop"() : () -> ()
    %cst_2 = arith.constant dense<0xFF800000> : vector<8x8xf32>
    %6 = vector.multi_reduction <maximumf>, %5, %cst_2 [2] : vector<8x8x8xf32> to vector<8x8xf32>
    %7 = vector.shape_cast %6 : vector<8x8xf32> to vector<8x8x1xf32>
    %8 = vector.broadcast %7 : vector<8x8x1xf32> to vector<8x8x8xf32>
    %9 = arith.subf %5, %8 : vector<8x8x8xf32>
    %10 = math.exp %9 : vector<8x8x8xf32>
    %cst_3 = arith.constant dense<0.000000e+00> : vector<8x8xf32>
    %11 = vector.multi_reduction <add>, %10, %cst_3 [2] : vector<8x8x8xf32> to vector<8x8xf32>
    %12 = vector.shape_cast %11 : vector<8x8xf32> to vector<8x8x1xf32>
    %13 = tpu.reciprocal %12 {approx = true} : vector<8x8x1xf32> -> vector<8x8x1xf32>
    %14 = vector.broadcast %13 : vector<8x8x1xf32> to vector<8x8x8xf32>
    %15 = arith.mulf %10, %14 : vector<8x8x8xf32>
    "tpu.trace_start"() <{level = 10 : i32, message = "nij,njc->nic"}> : () -> ()
    %cst_4 = arith.constant dense<0.000000e+00> : vector<8x8x16xf32>
    %16 = tpu.matmul %15, %4, %cst_4 {dimension_numbers = #tpu.dot_dimension_numbers<[2], [1], [1], [2], [0, 0, 0, 1, 1, 2], [0], [0]>} : vector<8x8x8xf32>, vector<8x8x16xf32>, vector<8x8x16xf32> -> vector<8x8x16xf32>
    "tpu.trace_stop"() : () -> ()
    %17 = arith.truncf %16 : vector<8x8x16xf32> to vector<8x8x16xbf16>
    %c0_5 = arith.constant 0 : index
    %c0_6 = arith.constant 0 : index
    %c0_7 = arith.constant 0 : index
    %18 = vector.load %arg2[%c0_5, %c0_6, %c0_7] : memref<8x8x16xbf16, #tpu.memory_space<vmem>>, vector<8x8x16xbf16>
    tpu.vector_store %arg2[%c0_5, %c0_6, %c0_7], %17 {strides = array<i32>} : memref<8x8x16xbf16, #tpu.memory_space<vmem>>, vector<8x8x16xbf16>,
    return
  }
  func.func @transform_0(%arg0: i32) -> (i32, i32, i32) {
    %c0_i32 = arith.constant 0 : i32
    %c0_i32_0 = arith.constant 0 : i32
    %c0_i32_1 = arith.constant 0 : i32
    return %arg0, %c0_i32, %c0_i32_0 : i32, i32, i32
  }
  func.func @transform_1(%arg0: i32) -> (i32, i32, i32) {
    %c0_i32 = arith.constant 0 : i32
    %c0_i32_0 = arith.constant 0 : i32
    %c0_i32_1 = arith.constant 0 : i32
    return %arg0, %c0_i32, %c0_i32_0 : i32, i32, i32
  }
}

module attributes {stable_mosaic.version = 11 : i64} {
  func.func @kernel(%arg0: i32, %arg1: memref<1x10x10x32xbf16, #tpu.memory_space<vmem>>, %arg2: memref<9x32x48xbf16, #tpu.memory_space<vmem>>, %arg3: memref<1x8x8x24xbf16, #tpu.memory_space<vmem>>, %arg4: memref<1x8x8x24xbf16, #tpu.memory_space<vmem>>) attributes {dimension_semantics = [#tpu.dimension_semantics<parallel>], iteration_bounds = array<i64: 2>, scalar_prefetch = 0 : i64, scratch_operands = 0 : i64, tpu.core_type = #tpu.core_type<tc>, window_params = [{transform_indices = @transform_0, window_bounds = array<i64: 1, 10, 10, 32>}, {pipeline_mode = #tpu.pipeline_mode<synchronous>, transform_indices = @transform_1, window_bounds = array<i64: 9, 32, 48>}, {transform_indices = @transform_2, window_bounds = array<i64: 1, 8, 8, 24>}, {transform_indices = @transform_3, window_bounds = array<i64: 1, 8, 8, 24>}]} {
    %c0 = arith.constant 0 : index
    %c0_0 = arith.constant 0 : index
    %c0_1 = arith.constant 0 : index
    %c0_2 = arith.constant 0 : index
    %0 = vector.load %arg1[%c0, %c0_0, %c0_1, %c0_2] : memref<1x10x10x32xbf16, #tpu.memory_space<vmem>>, vector<1x10x10x32xbf16>
    %1 = vector.shape_cast %0 : vector<1x10x10x32xbf16> to vector<10x10x32xbf16>
    %cst = arith.constant 0.000000e+00 : f32
    %2 = vector.broadcast %cst : f32 to vector<64x48xf32>
    %3 = vector.extract_strided_slice %1 {offsets = [0, 0, 0], sizes = [8, 8, 32], strides = [1, 1, 1]} : vector<10x10x32xbf16> to vector<8x8x32xbf16>
    %4 = vector.shape_cast %3 : vector<8x8x32xbf16> to vector<64x32xbf16>
    %c0_3 = arith.constant 0 : index
    %c0_4 = arith.constant 0 : index
    %c0_5 = arith.constant 0 : index
    %5 = vector.load %arg2[%c0_3, %c0_4, %c0_5] : memref<9x32x48xbf16, #tpu.memory_space<vmem>>, vector<1x32x48xbf16>
    %6 = vector.shape_cast %5 : vector<1x32x48xbf16> to vector<32x48xbf16>
    %cst_6 = arith.constant dense<0.000000e+00> : vector<64x48xf32>
    %7 = tpu.matmul %4, %6, %cst_6 {dimension_numbers = #tpu.dot_dimension_numbers<[1], [0], [0], [1], [0, 0, 1, 1], [], []>} : vector<64x32xbf16>, vector<32x48xbf16>, vector<64x48xf32> -> vector<64x48xf32>
    %8 = arith.addf %2, %7 : vector<64x48xf32>
    %9 = vector.extract_strided_slice %1 {offsets = [0, 1, 0], sizes = [8, 8, 32], strides = [1, 1, 1]} : vector<10x10x32xbf16> to vector<8x8x32xbf16>
    %10 = vector.shape_cast %9 : vector<8x8x32xbf16> to vector<64x32xbf16>
    %c1 = arith.constant 1 : index
    %c0_7 = arith.constant 0 : index
    %c0_8 = arith.constant 0 : index
    %11 = vector.load %arg2[%c1, %c0_7, %c0_8] : memref<9x32x48xbf16, #tpu.memory_space<vmem>>, vector<1x32x48xbf16>
    %12 = vector.shape_cast %11 : vector<1x32x48xbf16> to vector<32x48xbf16>
    %cst_9 = arith.constant dense<0.000000e+00> : vector<64x48xf32>
    %13 = tpu.matmul %10, %12, %cst_9 {dimension_numbers = #tpu.dot_dimension_numbers<[1], [0], [0], [1], [0, 0, 1, 1], [], []>} : vector<64x32xbf16>, vector<32x48xbf16>, vector<64x48xf32> -> vector<64x48xf32>
    %14 = arith.addf %8, %13 : vector<64x48xf32>
    %15 = vector.extract_strided_slice %1 {offsets = [0, 2, 0], sizes = [8, 8, 32], strides = [1, 1, 1]} : vector<10x10x32xbf16> to vector<8x8x32xbf16>
    %16 = vector.shape_cast %15 : vector<8x8x32xbf16> to vector<64x32xbf16>
    %c2 = arith.constant 2 : index
    %c0_10 = arith.constant 0 : index
    %c0_11 = arith.constant 0 : index
    %17 = vector.load %arg2[%c2, %c0_10, %c0_11] : memref<9x32x48xbf16, #tpu.memory_space<vmem>>, vector<1x32x48xbf16>
    %18 = vector.shape_cast %17 : vector<1x32x48xbf16> to vector<32x48xbf16>
    %cst_12 = arith.constant dense<0.000000e+00> : vector<64x48xf32>
    %19 = tpu.matmul %16, %18, %cst_12 {dimension_numbers = #tpu.dot_dimension_numbers<[1], [0], [0], [1], [0, 0, 1, 1], [], []>} : vector<64x32xbf16>, vector<32x48xbf16>, vector<64x48xf32> -> vector<64x48xf32>
    %20 = arith.addf %14, %19 : vector<64x48xf32>
    %21 = vector.extract_strided_slice %1 {offsets = [1, 0, 0], sizes = [8, 8, 32], strides = [1, 1, 1]} : vector<10x10x32xbf16> to vector<8x8x32xbf16>
    %22 = vector.shape_cast %21 : vector<8x8x32xbf16> to vector<64x32xbf16>
    %c3 = arith.constant 3 : index
    %c0_13 = arith.constant 0 : index
    %c0_14 = arith.constant 0 : index
    %23 = vector.load %arg2[%c3, %c0_13, %c0_14] : memref<9x32x48xbf16, #tpu.memory_space<vmem>>, vector<1x32x48xbf16>
    %24 = vector.shape_cast %23 : vector<1x32x48xbf16> to vector<32x48xbf16>
    %cst_15 = arith.constant dense<0.000000e+00> : vector<64x48xf32>
    %25 = tpu.matmul %22, %24, %cst_15 {dimension_numbers = #tpu.dot_dimension_numbers<[1], [0], [0], [1], [0, 0, 1, 1], [], []>} : vector<64x32xbf16>, vector<32x48xbf16>, vector<64x48xf32> -> vector<64x48xf32>
    %26 = arith.addf %20, %25 : vector<64x48xf32>
    %27 = vector.extract_strided_slice %1 {offsets = [1, 1, 0], sizes = [8, 8, 32], strides = [1, 1, 1]} : vector<10x10x32xbf16> to vector<8x8x32xbf16>
    %28 = vector.shape_cast %27 : vector<8x8x32xbf16> to vector<64x32xbf16>
    %c4 = arith.constant 4 : index
    %c0_16 = arith.constant 0 : index
    %c0_17 = arith.constant 0 : index
    %29 = vector.load %arg2[%c4, %c0_16, %c0_17] : memref<9x32x48xbf16, #tpu.memory_space<vmem>>, vector<1x32x48xbf16>
    %30 = vector.shape_cast %29 : vector<1x32x48xbf16> to vector<32x48xbf16>
    %cst_18 = arith.constant dense<0.000000e+00> : vector<64x48xf32>
    %31 = tpu.matmul %28, %30, %cst_18 {dimension_numbers = #tpu.dot_dimension_numbers<[1], [0], [0], [1], [0, 0, 1, 1], [], []>} : vector<64x32xbf16>, vector<32x48xbf16>, vector<64x48xf32> -> vector<64x48xf32>
    %32 = arith.addf %26, %31 : vector<64x48xf32>
    %33 = vector.extract_strided_slice %1 {offsets = [1, 2, 0], sizes = [8, 8, 32], strides = [1, 1, 1]} : vector<10x10x32xbf16> to vector<8x8x32xbf16>
    %34 = vector.shape_cast %33 : vector<8x8x32xbf16> to vector<64x32xbf16>
    %c5 = arith.constant 5 : index
    %c0_19 = arith.constant 0 : index
    %c0_20 = arith.constant 0 : index
    %35 = vector.load %arg2[%c5, %c0_19, %c0_20] : memref<9x32x48xbf16, #tpu.memory_space<vmem>>, vector<1x32x48xbf16>
    %36 = vector.shape_cast %35 : vector<1x32x48xbf16> to vector<32x48xbf16>
    %cst_21 = arith.constant dense<0.000000e+00> : vector<64x48xf32>
    %37 = tpu.matmul %34, %36, %cst_21 {dimension_numbers = #tpu.dot_dimension_numbers<[1], [0], [0], [1], [0, 0, 1, 1], [], []>} : vector<64x32xbf16>, vector<32x48xbf16>, vector<64x48xf32> -> vector<64x48xf32>
    %38 = arith.addf %32, %37 : vector<64x48xf32>
    %39 = vector.extract_strided_slice %1 {offsets = [2, 0, 0], sizes = [8, 8, 32], strides = [1, 1, 1]} : vector<10x10x32xbf16> to vector<8x8x32xbf16>
    %40 = vector.shape_cast %39 : vector<8x8x32xbf16> to vector<64x32xbf16>
    %c6 = arith.constant 6 : index
    %c0_22 = arith.constant 0 : index
    %c0_23 = arith.constant 0 : index
    %41 = vector.load %arg2[%c6, %c0_22, %c0_23] : memref<9x32x48xbf16, #tpu.memory_space<vmem>>, vector<1x32x48xbf16>
    %42 = vector.shape_cast %41 : vector<1x32x48xbf16> to vector<32x48xbf16>
    %cst_24 = arith.constant dense<0.000000e+00> : vector<64x48xf32>
    %43 = tpu.matmul %40, %42, %cst_24 {dimension_numbers = #tpu.dot_dimension_numbers<[1], [0], [0], [1], [0, 0, 1, 1], [], []>} : vector<64x32xbf16>, vector<32x48xbf16>, vector<64x48xf32> -> vector<64x48xf32>
    %44 = arith.addf %38, %43 : vector<64x48xf32>
    %45 = vector.extract_strided_slice %1 {offsets = [2, 1, 0], sizes = [8, 8, 32], strides = [1, 1, 1]} : vector<10x10x32xbf16> to vector<8x8x32xbf16>
    %46 = vector.shape_cast %45 : vector<8x8x32xbf16> to vector<64x32xbf16>
    %c7 = arith.constant 7 : index
    %c0_25 = arith.constant 0 : index
    %c0_26 = arith.constant 0 : index
    %47 = vector.load %arg2[%c7, %c0_25, %c0_26] : memref<9x32x48xbf16, #tpu.memory_space<vmem>>, vector<1x32x48xbf16>
    %48 = vector.shape_cast %47 : vector<1x32x48xbf16> to vector<32x48xbf16>
    %cst_27 = arith.constant dense<0.000000e+00> : vector<64x48xf32>
    %49 = tpu.matmul %46, %48, %cst_27 {dimension_numbers = #tpu.dot_dimension_numbers<[1], [0], [0], [1], [0, 0, 1, 1], [], []>} : vector<64x32xbf16>, vector<32x48xbf16>, vector<64x48xf32> -> vector<64x48xf32>
    %50 = arith.addf %44, %49 : vector<64x48xf32>
    %51 = vector.extract_strided_slice %1 {offsets = [2, 2, 0], sizes = [8, 8, 32], strides = [1, 1, 1]} : vector<10x10x32xbf16> to vector<8x8x32xbf16>
    %52 = vector.shape_cast %51 : vector<8x8x32xbf16> to vector<64x32xbf16>
    %c8 = arith.constant 8 : index
    %c0_28 = arith.constant 0 : index
    %c0_29 = arith.constant 0 : index
    %53 = vector.load %arg2[%c8, %c0_28, %c0_29] : memref<9x32x48xbf16, #tpu.memory_space<vmem>>, vector<1x32x48xbf16>
    %54 = vector.shape_cast %53 : vector<1x32x48xbf16> to vector<32x48xbf16>
    %cst_30 = arith.constant dense<0.000000e+00> : vector<64x48xf32>
    %55 = tpu.matmul %52, %54, %cst_30 {dimension_numbers = #tpu.dot_dimension_numbers<[1], [0], [0], [1], [0, 0, 1, 1], [], []>} : vector<64x32xbf16>, vector<32x48xbf16>, vector<64x48xf32> -> vector<64x48xf32>
    %56 = arith.addf %50, %55 : vector<64x48xf32>
    %57 = tpu.iota {dimensions = array<i32: 1>} : vector<1x48xi32>
    %c24_i32 = arith.constant 24 : i32
    %c0_i32 = arith.constant 0 : i32
    %58 = arith.cmpi eq, %c24_i32, %c0_i32 : i32
    %c1_i32 = arith.constant 1 : i32
    %59 = arith.select %58, %c1_i32, %c24_i32 : i32
    %60 = vector.broadcast %59 : i32 to vector<1x48xi32>
    %61 = arith.remsi %57, %60 : vector<1x48xi32>
    %c0_i32_31 = arith.constant 0 : i32
    %62 = vector.broadcast %c0_i32_31 : i32 to vector<1x48xi32>
    %63 = arith.cmpi ne, %61, %62 : vector<1x48xi32>
    %c0_i32_32 = arith.constant 0 : i32
    %64 = vector.broadcast %c0_i32_32 : i32 to vector<1x48xi32>
    %65 = arith.cmpi slt, %61, %64 : vector<1x48xi32>
    %c0_i32_33 = arith.constant 0 : i32
    %66 = arith.cmpi slt, %59, %c0_i32_33 : i32
    %67 = vector.broadcast %66 : i1 to vector<1x48xi1>
    %68 = vector.broadcast %67 : vector<1x48xi1> to vector<1x48xi1>
    %69 = arith.xori %65, %68 : vector<1x48xi1>
    %70 = arith.andi %69, %63 : vector<1x48xi1>
    %71 = vector.broadcast %59 : i32 to vector<1x48xi32>
    %72 = arith.addi %61, %71 : vector<1x48xi32>
    %73 = arith.select %70, %72, %61 : vector<1x48xi1>, vector<1x48xi32>
    %c8_i32 = arith.constant 8 : i32
    %74 = vector.broadcast %c8_i32 : i32 to vector<1x48xi32>
    %75 = arith.cmpi slt, %73, %74 : vector<1x48xi32>
    %76 = math.tanh %56 : vector<64x48xf32>
    %77 = vector.shape_cast %75 : vector<1x48xi1> to vector<1x48xi1>
    %78 = vector.broadcast %77 : vector<1x48xi1> to vector<64x48xi1>
    %79 = arith.select %78, %76, %56 : vector<64x48xi1>, vector<64x48xf32>
    %80 = vector.extract_strided_slice %79 {offsets = [0, 0], sizes = [64, 24], strides = [1, 1]} : vector<64x48xf32> to vector<64x24xf32>
    %81 = vector.shape_cast %80 : vector<64x24xf32> to vector<8x8x24xf32>
    %82 = vector.extract_strided_slice %79 {offsets = [0, 24], sizes = [64, 24], strides = [1, 1]} : vector<64x48xf32> to vector<64x24xf32>
    %83 = vector.shape_cast %82 : vector<64x24xf32> to vector<8x8x24xf32>
    %84 = tpu.transpose %81, [1, 0, 2] : vector<8x8x24xf32> -> vector<8x8x24xf32>
    %85 = arith.truncf %84 : vector<8x8x24xf32> to vector<8x8x24xbf16>
    %c0_34 = arith.constant 0 : index
    %c0_35 = arith.constant 0 : index
    %c0_36 = arith.constant 0 : index
    %c0_37 = arith.constant 0 : index
    %86 = vector.load %arg3[%c0_34, %c0_35, %c0_36, %c0_37] : memref<1x8x8x24xbf16, #tpu.memory_space<vmem>>, vector<1x8x8x24xbf16>
    %87 = vector.shape_cast %86 : vector<1x8x8x24xbf16> to vector<8x8x24xbf16>
    %88 = vector.shape_cast %85 : vector<8x8x24xbf16> to vector<1x8x8x24xbf16>
    tpu.vector_store %arg3[%c0_34, %c0_35, %c0_36, %c0_37], %88 {strides = array<i32>} : memref<1x8x8x24xbf16, #tpu.memory_space<vmem>>, vector<1x8x8x24xbf16>,
    %89 = arith.truncf %83 : vector<8x8x24xf32> to vector<8x8x24xbf16>
    %c0_38 = arith.constant 0 : index
    %c0_39 = arith.constant 0 : index
    %c0_40 = arith.constant 0 : index
    %c0_41 = arith.constant 0 : index
    %90 = vector.load %arg4[%c0_38, %c0_39, %c0_40, %c0_41] : memref<1x8x8x24xbf16, #tpu.memory_space<vmem>>, vector<1x8x8x24xbf16>
    %91 = vector.shape_cast %90 : vector<1x8x8x24xbf16> to vector<8x8x24xbf16>
    %92 = vector.shape_cast %89 : vector<8x8x24xbf16> to vector<1x8x8x24xbf16>
    tpu.vector_store %arg4[%c0_38, %c0_39, %c0_40, %c0_41], %92 {strides = array<i32>} : memref<1x8x8x24xbf16, #tpu.memory_space<vmem>>, vector<1x8x8x24xbf16>,
    return
  }
  func.func @transform_0(%arg0: i32) -> (i32, i32, i32, i32) {
    %c0_i32 = arith.constant 0 : i32
    %c0_i32_0 = arith.constant 0 : i32
    %c0_i32_1 = arith.constant 0 : i32
    %c0_i32_2 = arith.constant 0 : i32
    return %arg0, %c0_i32, %c0_i32_0, %c0_i32_1 : i32, i32, i32, i32
  }
  func.func @transform_1(%arg0: i32) -> (i32, i32, i32) {
    %c0_i32 = arith.constant 0 : i32
    %c0_i32_0 = arith.constant 0 : i32
    %c0_i32_1 = arith.constant 0 : i32
    %c0_i32_2 = arith.constant 0 : i32
    return %c0_i32, %c0_i32_0, %c0_i32_1 : i32, i32, i32
  }
  func.func @transform_2(%arg0: i32) -> (i32, i32, i32, i32) {
    %c0_i32 = arith.constant 0 : i32
    %c0_i32_0 = arith.constant 0 : i32
    %c0_i32_1 = arith.constant 0 : i32
    %c0_i32_2 = arith.constant 0 : i32
    return %arg0, %c0_i32, %c0_i32_0, %c0_i32_1 : i32, i32, i32, i32
  }
  func.func @transform_3(%arg0: i32) -> (i32, i32, i32, i32) {
    %c0_i32 = arith.constant 0 : i32
    %c0_i32_0 = arith.constant 0 : i32
    %c0_i32_1 = arith.constant 0 : i32
    %c0_i32_2 = arith.constant 0 : i32
    return %arg0, %c0_i32, %c0_i32_0, %c0_i32_1 : i32, i32, i32, i32
  }
}

module attributes {stable_mosaic.version = 11 : i64} {
  func.func @kernel(%arg0: i32, %arg1: memref<1x10x10x16xbf16, #tpu.memory_space<vmem>>, %arg2: memref<9x16x32xbf16, #tpu.memory_space<vmem>>, %arg3: memref<1x64x32xf32, #tpu.memory_space<vmem>>) attributes {dimension_semantics = [#tpu.dimension_semantics<parallel>], iteration_bounds = array<i64: 2>, scalar_prefetch = 0 : i64, scratch_operands = 0 : i64, tpu.core_type = #tpu.core_type<tc>, window_params = [{transform_indices = @transform_0, window_bounds = array<i64: 1, 10, 10, 16>}, {pipeline_mode = #tpu.pipeline_mode<synchronous>, transform_indices = @transform_1, window_bounds = array<i64: 9, 16, 32>}, {transform_indices = @transform_2, window_bounds = array<i64: 1, 64, 32>}]} {
    %c0 = arith.constant 0 : index
    %c0_0 = arith.constant 0 : index
    %c0_1 = arith.constant 0 : index
    %c0_2 = arith.constant 0 : index
    %0 = vector.load %arg1[%c0, %c0_0, %c0_1, %c0_2] : memref<1x10x10x16xbf16, #tpu.memory_space<vmem>>, vector<1x10x10x16xbf16>
    %1 = vector.shape_cast %0 : vector<1x10x10x16xbf16> to vector<10x10x16xbf16>
    %cst = arith.constant 0.000000e+00 : f32
    %2 = vector.broadcast %cst : f32 to vector<64x32xf32>
    %3 = vector.extract_strided_slice %1 {offsets = [0, 0, 0], sizes = [8, 8, 16], strides = [1, 1, 1]} : vector<10x10x16xbf16> to vector<8x8x16xbf16>
    %4 = vector.shape_cast %3 : vector<8x8x16xbf16> to vector<64x16xbf16>
    %c0_3 = arith.constant 0 : index
    %c0_4 = arith.constant 0 : index
    %c0_5 = arith.constant 0 : index
    %5 = vector.load %arg2[%c0_3, %c0_4, %c0_5] : memref<9x16x32xbf16, #tpu.memory_space<vmem>>, vector<1x16x32xbf16>
    %6 = vector.shape_cast %5 : vector<1x16x32xbf16> to vector<16x32xbf16>
    %cst_6 = arith.constant dense<0.000000e+00> : vector<64x32xf32>
    %7 = tpu.matmul %4, %6, %cst_6 {dimension_numbers = #tpu.dot_dimension_numbers<[1], [0], [0], [1], [0, 0, 1, 1], [], []>} : vector<64x16xbf16>, vector<16x32xbf16>, vector<64x32xf32> -> vector<64x32xf32>
    %8 = arith.addf %2, %7 : vector<64x32xf32>
    %9 = vector.extract_strided_slice %1 {offsets = [0, 1, 0], sizes = [8, 8, 16], strides = [1, 1, 1]} : vector<10x10x16xbf16> to vector<8x8x16xbf16>
    %10 = vector.shape_cast %9 : vector<8x8x16xbf16> to vector<64x16xbf16>
    %c1 = arith.constant 1 : index
    %c0_7 = arith.constant 0 : index
    %c0_8 = arith.constant 0 : index
    %11 = vector.load %arg2[%c1, %c0_7, %c0_8] : memref<9x16x32xbf16, #tpu.memory_space<vmem>>, vector<1x16x32xbf16>
    %12 = vector.shape_cast %11 : vector<1x16x32xbf16> to vector<16x32xbf16>
    %cst_9 = arith.constant dense<0.000000e+00> : vector<64x32xf32>
    %13 = tpu.matmul %10, %12, %cst_9 {dimension_numbers = #tpu.dot_dimension_numbers<[1], [0], [0], [1], [0, 0, 1, 1], [], []>} : vector<64x16xbf16>, vector<16x32xbf16>, vector<64x32xf32> -> vector<64x32xf32>
    %14 = arith.addf %8, %13 : vector<64x32xf32>
    %15 = vector.extract_strided_slice %1 {offsets = [0, 2, 0], sizes = [8, 8, 16], strides = [1, 1, 1]} : vector<10x10x16xbf16> to vector<8x8x16xbf16>
    %16 = vector.shape_cast %15 : vector<8x8x16xbf16> to vector<64x16xbf16>
    %c2 = arith.constant 2 : index
    %c0_10 = arith.constant 0 : index
    %c0_11 = arith.constant 0 : index
    %17 = vector.load %arg2[%c2, %c0_10, %c0_11] : memref<9x16x32xbf16, #tpu.memory_space<vmem>>, vector<1x16x32xbf16>
    %18 = vector.shape_cast %17 : vector<1x16x32xbf16> to vector<16x32xbf16>
    %cst_12 = arith.constant dense<0.000000e+00> : vector<64x32xf32>
    %19 = tpu.matmul %16, %18, %cst_12 {dimension_numbers = #tpu.dot_dimension_numbers<[1], [0], [0], [1], [0, 0, 1, 1], [], []>} : vector<64x16xbf16>, vector<16x32xbf16>, vector<64x32xf32> -> vector<64x32xf32>
    %20 = arith.addf %14, %19 : vector<64x32xf32>
    %21 = vector.extract_strided_slice %1 {offsets = [1, 0, 0], sizes = [8, 8, 16], strides = [1, 1, 1]} : vector<10x10x16xbf16> to vector<8x8x16xbf16>
    %22 = vector.shape_cast %21 : vector<8x8x16xbf16> to vector<64x16xbf16>
    %c3 = arith.constant 3 : index
    %c0_13 = arith.constant 0 : index
    %c0_14 = arith.constant 0 : index
    %23 = vector.load %arg2[%c3, %c0_13, %c0_14] : memref<9x16x32xbf16, #tpu.memory_space<vmem>>, vector<1x16x32xbf16>
    %24 = vector.shape_cast %23 : vector<1x16x32xbf16> to vector<16x32xbf16>
    %cst_15 = arith.constant dense<0.000000e+00> : vector<64x32xf32>
    %25 = tpu.matmul %22, %24, %cst_15 {dimension_numbers = #tpu.dot_dimension_numbers<[1], [0], [0], [1], [0, 0, 1, 1], [], []>} : vector<64x16xbf16>, vector<16x32xbf16>, vector<64x32xf32> -> vector<64x32xf32>
    %26 = arith.addf %20, %25 : vector<64x32xf32>
    %27 = vector.extract_strided_slice %1 {offsets = [1, 1, 0], sizes = [8, 8, 16], strides = [1, 1, 1]} : vector<10x10x16xbf16> to vector<8x8x16xbf16>
    %28 = vector.shape_cast %27 : vector<8x8x16xbf16> to vector<64x16xbf16>
    %c4 = arith.constant 4 : index
    %c0_16 = arith.constant 0 : index
    %c0_17 = arith.constant 0 : index
    %29 = vector.load %arg2[%c4, %c0_16, %c0_17] : memref<9x16x32xbf16, #tpu.memory_space<vmem>>, vector<1x16x32xbf16>
    %30 = vector.shape_cast %29 : vector<1x16x32xbf16> to vector<16x32xbf16>
    %cst_18 = arith.constant dense<0.000000e+00> : vector<64x32xf32>
    %31 = tpu.matmul %28, %30, %cst_18 {dimension_numbers = #tpu.dot_dimension_numbers<[1], [0], [0], [1], [0, 0, 1, 1], [], []>} : vector<64x16xbf16>, vector<16x32xbf16>, vector<64x32xf32> -> vector<64x32xf32>
    %32 = arith.addf %26, %31 : vector<64x32xf32>
    %33 = vector.extract_strided_slice %1 {offsets = [1, 2, 0], sizes = [8, 8, 16], strides = [1, 1, 1]} : vector<10x10x16xbf16> to vector<8x8x16xbf16>
    %34 = vector.shape_cast %33 : vector<8x8x16xbf16> to vector<64x16xbf16>
    %c5 = arith.constant 5 : index
    %c0_19 = arith.constant 0 : index
    %c0_20 = arith.constant 0 : index
    %35 = vector.load %arg2[%c5, %c0_19, %c0_20] : memref<9x16x32xbf16, #tpu.memory_space<vmem>>, vector<1x16x32xbf16>
    %36 = vector.shape_cast %35 : vector<1x16x32xbf16> to vector<16x32xbf16>
    %cst_21 = arith.constant dense<0.000000e+00> : vector<64x32xf32>
    %37 = tpu.matmul %34, %36, %cst_21 {dimension_numbers = #tpu.dot_dimension_numbers<[1], [0], [0], [1], [0, 0, 1, 1], [], []>} : vector<64x16xbf16>, vector<16x32xbf16>, vector<64x32xf32> -> vector<64x32xf32>
    %38 = arith.addf %32, %37 : vector<64x32xf32>
    %39 = vector.extract_strided_slice %1 {offsets = [2, 0, 0], sizes = [8, 8, 16], strides = [1, 1, 1]} : vector<10x10x16xbf16> to vector<8x8x16xbf16>
    %40 = vector.shape_cast %39 : vector<8x8x16xbf16> to vector<64x16xbf16>
    %c6 = arith.constant 6 : index
    %c0_22 = arith.constant 0 : index
    %c0_23 = arith.constant 0 : index
    %41 = vector.load %arg2[%c6, %c0_22, %c0_23] : memref<9x16x32xbf16, #tpu.memory_space<vmem>>, vector<1x16x32xbf16>
    %42 = vector.shape_cast %41 : vector<1x16x32xbf16> to vector<16x32xbf16>
    %cst_24 = arith.constant dense<0.000000e+00> : vector<64x32xf32>
    %43 = tpu.matmul %40, %42, %cst_24 {dimension_numbers = #tpu.dot_dimension_numbers<[1], [0], [0], [1], [0, 0, 1, 1], [], []>} : vector<64x16xbf16>, vector<16x32xbf16>, vector<64x32xf32> -> vector<64x32xf32>
    %44 = arith.addf %38, %43 : vector<64x32xf32>
    %45 = vector.extract_strided_slice %1 {offsets = [2, 1, 0], sizes = [8, 8, 16], strides = [1, 1, 1]} : vector<10x10x16xbf16> to vector<8x8x16xbf16>
    %46 = vector.shape_cast %45 : vector<8x8x16xbf16> to vector<64x16xbf16>
    %c7 = arith.constant 7 : index
    %c0_25 = arith.constant 0 : index
    %c0_26 = arith.constant 0 : index
    %47 = vector.load %arg2[%c7, %c0_25, %c0_26] : memref<9x16x32xbf16, #tpu.memory_space<vmem>>, vector<1x16x32xbf16>
    %48 = vector.shape_cast %47 : vector<1x16x32xbf16> to vector<16x32xbf16>
    %cst_27 = arith.constant dense<0.000000e+00> : vector<64x32xf32>
    %49 = tpu.matmul %46, %48, %cst_27 {dimension_numbers = #tpu.dot_dimension_numbers<[1], [0], [0], [1], [0, 0, 1, 1], [], []>} : vector<64x16xbf16>, vector<16x32xbf16>, vector<64x32xf32> -> vector<64x32xf32>
    %50 = arith.addf %44, %49 : vector<64x32xf32>
    %51 = vector.extract_strided_slice %1 {offsets = [2, 2, 0], sizes = [8, 8, 16], strides = [1, 1, 1]} : vector<10x10x16xbf16> to vector<8x8x16xbf16>
    %52 = vector.shape_cast %51 : vector<8x8x16xbf16> to vector<64x16xbf16>
    %c8 = arith.constant 8 : index
    %c0_28 = arith.constant 0 : index
    %c0_29 = arith.constant 0 : index
    %53 = vector.load %arg2[%c8, %c0_28, %c0_29] : memref<9x16x32xbf16, #tpu.memory_space<vmem>>, vector<1x16x32xbf16>
    %54 = vector.shape_cast %53 : vector<1x16x32xbf16> to vector<16x32xbf16>
    %cst_30 = arith.constant dense<0.000000e+00> : vector<64x32xf32>
    %55 = tpu.matmul %52, %54, %cst_30 {dimension_numbers = #tpu.dot_dimension_numbers<[1], [0], [0], [1], [0, 0, 1, 1], [], []>} : vector<64x16xbf16>, vector<16x32xbf16>, vector<64x32xf32> -> vector<64x32xf32>
    %56 = arith.addf %50, %55 : vector<64x32xf32>
    %57 = vector.shape_cast %56 : vector<64x32xf32> to vector<8x8x32xf32>
    %58 = tpu.transpose %57, [1, 0, 2] : vector<8x8x32xf32> -> vector<8x8x32xf32>
    %59 = vector.shape_cast %58 : vector<8x8x32xf32> to vector<64x32xf32>
    %c0_31 = arith.constant 0 : index
    %c0_32 = arith.constant 0 : index
    %c0_33 = arith.constant 0 : index
    %60 = vector.load %arg3[%c0_31, %c0_32, %c0_33] : memref<1x64x32xf32, #tpu.memory_space<vmem>>, vector<1x64x32xf32>
    %61 = vector.shape_cast %60 : vector<1x64x32xf32> to vector<64x32xf32>
    %62 = vector.shape_cast %59 : vector<64x32xf32> to vector<1x64x32xf32>
    tpu.vector_store %arg3[%c0_31, %c0_32, %c0_33], %62 {strides = array<i32>} : memref<1x64x32xf32, #tpu.memory_space<vmem>>, vector<1x64x32xf32>,
    return
  }
  func.func @transform_0(%arg0: i32) -> (i32, i32, i32, i32) {
    %c0_i32 = arith.constant 0 : i32
    %c0_i32_0 = arith.constant 0 : i32
    %c0_i32_1 = arith.constant 0 : i32
    %c0_i32_2 = arith.constant 0 : i32
    return %arg0, %c0_i32, %c0_i32_0, %c0_i32_1 : i32, i32, i32, i32
  }
  func.func @transform_1(%arg0: i32) -> (i32, i32, i32) {
    %c0_i32 = arith.constant 0 : i32
    %c0_i32_0 = arith.constant 0 : i32
    %c0_i32_1 = arith.constant 0 : i32
    %c0_i32_2 = arith.constant 0 : i32
    return %c0_i32, %c0_i32_0, %c0_i32_1 : i32, i32, i32
  }
  func.func @transform_2(%arg0: i32) -> (i32, i32, i32) {
    %c0_i32 = arith.constant 0 : i32
    %c0_i32_0 = arith.constant 0 : i32
    %c0_i32_1 = arith.constant 0 : i32
    return %arg0, %c0_i32, %c0_i32_0 : i32, i32, i32
  }
}

module attributes {stable_mosaic.version = 11 : i64} {
  func.func @kernel(%arg0: i32, %arg1: memref<1x10x10x16xbf16, #tpu.memory_space<vmem>>, %arg2: memref<9x16x32xbf16, #tpu.memory_space<vmem>>, %arg3: memref<1x64x32xf32, #tpu.memory_space<vmem>>) attributes {dimension_semantics = [#tpu.dimension_semantics<parallel>], iteration_bounds = array<i64: 2>, scalar_prefetch = 0 : i64, scratch_operands = 0 : i64, tpu.core_type = #tpu.core_type<tc>, window_params = [{transform_indices = @transform_0, window_bounds = array<i64: 1, 10, 10, 16>}, {pipeline_mode = #tpu.pipeline_mode<synchronous>, transform_indices = @transform_1, window_bounds = array<i64: 9, 16, 32>}, {transform_indices = @transform_2, window_bounds = array<i64: 1, 64, 32>}]} {
    %c0 = arith.constant 0 : index
    %c0_0 = arith.constant 0 : index
    %c0_1 = arith.constant 0 : index
    %c0_2 = arith.constant 0 : index
    %0 = vector.load %arg1[%c0, %c0_0, %c0_1, %c0_2] : memref<1x10x10x16xbf16, #tpu.memory_space<vmem>>, vector<1x10x10x16xbf16>
    %1 = vector.shape_cast %0 : vector<1x10x10x16xbf16> to vector<10x10x16xbf16>
    %cst = arith.constant 0.000000e+00 : f32
    %2 = vector.broadcast %cst : f32 to vector<64x32xf32>
    %3 = vector.extract_strided_slice %1 {offsets = [0, 0, 0], sizes = [8, 8, 16], strides = [1, 1, 1]} : vector<10x10x16xbf16> to vector<8x8x16xbf16>
    %4 = vector.shape_cast %3 : vector<8x8x16xbf16> to vector<64x16xbf16>
    %c0_3 = arith.constant 0 : index
    %c0_4 = arith.constant 0 : index
    %c0_5 = arith.constant 0 : index
    %5 = vector.load %arg2[%c0_3, %c0_4, %c0_5] : memref<9x16x32xbf16, #tpu.memory_space<vmem>>, vector<1x16x32xbf16>
    %6 = vector.shape_cast %5 : vector<1x16x32xbf16> to vector<16x32xbf16>
    %cst_6 = arith.constant dense<0.000000e+00> : vector<64x32xf32>
    %7 = tpu.matmul %4, %6, %cst_6 {dimension_numbers = #tpu.dot_dimension_numbers<[1], [0], [0], [1], [0, 0, 1, 1], [], []>} : vector<64x16xbf16>, vector<16x32xbf16>, vector<64x32xf32> -> vector<64x32xf32>
    %8 = arith.addf %2, %7 : vector<64x32xf32>
    %9 = vector.extract_strided_slice %1 {offsets = [0, 1, 0], sizes = [8, 8, 16], strides = [1, 1, 1]} : vector<10x10x16xbf16> to vector<8x8x16xbf16>
    %10 = vector.shape_cast %9 : vector<8x8x16xbf16> to vector<64x16xbf16>
    %c1 = arith.constant 1 : index
    %c0_7 = arith.constant 0 : index
    %c0_8 = arith.constant 0 : index
    %11 = vector.load %arg2[%c1, %c0_7, %c0_8] : memref<9x16x32xbf16, #tpu.memory_space<vmem>>, vector<1x16x32xbf16>
    %12 = vector.shape_cast %11 : vector<1x16x32xbf16> to vector<16x32xbf16>
    %cst_9 = arith.constant dense<0.000000e+00> : vector<64x32xf32>
    %13 = tpu.matmul %10, %12, %cst_9 {dimension_numbers = #tpu.dot_dimension_numbers<[1], [0], [0], [1], [0, 0, 1, 1], [], []>} : vector<64x16xbf16>, vector<16x32xbf16>, vector<64x32xf32> -> vector<64x32xf32>
    %14 = arith.addf %8, %13 : vector<64x32xf32>
    %15 = vector.extract_strided_slice %1 {offsets = [0, 2, 0], sizes = [8, 8, 16], strides = [1, 1, 1]} : vector<10x10x16xbf16> to vector<8x8x16xbf16>
    %16 = vector.shape_cast %15 : vector<8x8x16xbf16> to vector<64x16xbf16>
    %c2 = arith.constant 2 : index
    %c0_10 = arith.constant 0 : index
    %c0_11 = arith.constant 0 : index
    %17 = vector.load %arg2[%c2, %c0_10, %c0_11] : memref<9x16x32xbf16, #tpu.memory_space<vmem>>, vector<1x16x32xbf16>
    %18 = vector.shape_cast %17 : vector<1x16x32xbf16> to vector<16x32xbf16>
    %cst_12 = arith.constant dense<0.000000e+00> : vector<64x32xf32>
    %19 = tpu.matmul %16, %18, %cst_12 {dimension_numbers = #tpu.dot_dimension_numbers<[1], [0], [0], [1], [0, 0, 1, 1], [], []>} : vector<64x16xbf16>, vector<16x32xbf16>, vector<64x32xf32> -> vector<64x32xf32>
    %20 = arith.addf %14, %19 : vector<64x32xf32>
    %21 = vector.extract_strided_slice %1 {offsets = [1, 0, 0], sizes = [8, 8, 16], strides = [1, 1, 1]} : vector<10x10x16xbf16> to vector<8x8x16xbf16>
    %22 = vector.shape_cast %21 : vector<8x8x16xbf16> to vector<64x16xbf16>
    %c3 = arith.constant 3 : index
    %c0_13 = arith.constant 0 : index
    %c0_14 = arith.constant 0 : index
    %23 = vector.load %arg2[%c3, %c0_13, %c0_14] : memref<9x16x32xbf16, #tpu.memory_space<vmem>>, vector<1x16x32xbf16>
    %24 = vector.shape_cast %23 : vector<1x16x32xbf16> to vector<16x32xbf16>
    %cst_15 = arith.constant dense<0.000000e+00> : vector<64x32xf32>
    %25 = tpu.matmul %22, %24, %cst_15 {dimension_numbers = #tpu.dot_dimension_numbers<[1], [0], [0], [1], [0, 0, 1, 1], [], []>} : vector<64x16xbf16>, vector<16x32xbf16>, vector<64x32xf32> -> vector<64x32xf32>
    %26 = arith.addf %20, %25 : vector<64x32xf32>
    %27 = vector.extract_strided_slice %1 {offsets = [1, 1, 0], sizes = [8, 8, 16], strides = [1, 1, 1]} : vector<10x10x16xbf16> to vector<8x8x16xbf16>
    %28 = vector.shape_cast %27 : vector<8x8x16xbf16> to vector<64x16xbf16>
    %c4 = arith.constant 4 : index
    %c0_16 = arith.constant 0 : index
    %c0_17 = arith.constant 0 : index
    %29 = vector.load %arg2[%c4, %c0_16, %c0_17] : memref<9x16x32xbf16, #tpu.memory_space<vmem>>, vector<1x16x32xbf16>
    %30 = vector.shape_cast %29 : vector<1x16x32xbf16> to vector<16x32xbf16>
    %cst_18 = arith.constant dense<0.000000e+00> : vector<64x32xf32>
    %31 = tpu.matmul %28, %30, %cst_18 {dimension_numbers = #tpu.dot_dimension_numbers<[1], [0], [0], [1], [0, 0, 1, 1], [], []>} : vector<64x16xbf16>, vector<16x32xbf16>, vector<64x32xf32> -> vector<64x32xf32>
    %32 = arith.addf %26, %31 : vector<64x32xf32>
    %33 = vector.extract_strided_slice %1 {offsets = [1, 2, 0], sizes = [8, 8, 16], strides = [1, 1, 1]} : vector<10x10x16xbf16> to vector<8x8x16xbf16>
    %34 = vector.shape_cast %33 : vector<8x8x16xbf16> to vector<64x16xbf16>
    %c5 = arith.constant 5 : index
    %c0_19 = arith.constant 0 : index
    %c0_20 = arith.constant 0 : index
    %35 = vector.load %arg2[%c5, %c0_19, %c0_20] : memref<9x16x32xbf16, #tpu.memory_space<vmem>>, vector<1x16x32xbf16>
    %36 = vector.shape_cast %35 : vector<1x16x32xbf16> to vector<16x32xbf16>
    %cst_21 = arith.constant dense<0.000000e+00> : vector<64x32xf32>
    %37 = tpu.matmul %34, %36, %cst_21 {dimension_numbers = #tpu.dot_dimension_numbers<[1], [0], [0], [1], [0, 0, 1, 1], [], []>} : vector<64x16xbf16>, vector<16x32xbf16>, vector<64x32xf32> -> vector<64x32xf32>
    %38 = arith.addf %32, %37 : vector<64x32xf32>
    %39 = vector.extract_strided_slice %1 {offsets = [2, 0, 0], sizes = [8, 8, 16], strides = [1, 1, 1]} : vector<10x10x16xbf16> to vector<8x8x16xbf16>
    %40 = vector.shape_cast %39 : vector<8x8x16xbf16> to vector<64x16xbf16>
    %c6 = arith.constant 6 : index
    %c0_22 = arith.constant 0 : index
    %c0_23 = arith.constant 0 : index
    %41 = vector.load %arg2[%c6, %c0_22, %c0_23] : memref<9x16x32xbf16, #tpu.memory_space<vmem>>, vector<1x16x32xbf16>
    %42 = vector.shape_cast %41 : vector<1x16x32xbf16> to vector<16x32xbf16>
    %cst_24 = arith.constant dense<0.000000e+00> : vector<64x32xf32>
    %43 = tpu.matmul %40, %42, %cst_24 {dimension_numbers = #tpu.dot_dimension_numbers<[1], [0], [0], [1], [0, 0, 1, 1], [], []>} : vector<64x16xbf16>, vector<16x32xbf16>, vector<64x32xf32> -> vector<64x32xf32>
    %44 = arith.addf %38, %43 : vector<64x32xf32>
    %45 = vector.extract_strided_slice %1 {offsets = [2, 1, 0], sizes = [8, 8, 16], strides = [1, 1, 1]} : vector<10x10x16xbf16> to vector<8x8x16xbf16>
    %46 = vector.shape_cast %45 : vector<8x8x16xbf16> to vector<64x16xbf16>
    %c7 = arith.constant 7 : index
    %c0_25 = arith.constant 0 : index
    %c0_26 = arith.constant 0 : index
    %47 = vector.load %arg2[%c7, %c0_25, %c0_26] : memref<9x16x32xbf16, #tpu.memory_space<vmem>>, vector<1x16x32xbf16>
    %48 = vector.shape_cast %47 : vector<1x16x32xbf16> to vector<16x32xbf16>
    %cst_27 = arith.constant dense<0.000000e+00> : vector<64x32xf32>
    %49 = tpu.matmul %46, %48, %cst_27 {dimension_numbers = #tpu.dot_dimension_numbers<[1], [0], [0], [1], [0, 0, 1, 1], [], []>} : vector<64x16xbf16>, vector<16x32xbf16>, vector<64x32xf32> -> vector<64x32xf32>
    %50 = arith.addf %44, %49 : vector<64x32xf32>
    %51 = vector.extract_strided_slice %1 {offsets = [2, 2, 0], sizes = [8, 8, 16], strides = [1, 1, 1]} : vector<10x10x16xbf16> to vector<8x8x16xbf16>
    %52 = vector.shape_cast %51 : vector<8x8x16xbf16> to vector<64x16xbf16>
    %c8 = arith.constant 8 : index
    %c0_28 = arith.constant 0 : index
    %c0_29 = arith.constant 0 : index
    %53 = vector.load %arg2[%c8, %c0_28, %c0_29] : memref<9x16x32xbf16, #tpu.memory_space<vmem>>, vector<1x16x32xbf16>
    %54 = vector.shape_cast %53 : vector<1x16x32xbf16> to vector<16x32xbf16>
    %cst_30 = arith.constant dense<0.000000e+00> : vector<64x32xf32>
    %55 = tpu.matmul %52, %54, %cst_30 {dimension_numbers = #tpu.dot_dimension_numbers<[1], [0], [0], [1], [0, 0, 1, 1], [], []>} : vector<64x16xbf16>, vector<16x32xbf16>, vector<64x32xf32> -> vector<64x32xf32>
    %56 = arith.addf %50, %55 : vector<64x32xf32>
    %c0_31 = arith.constant 0 : index
    %c0_32 = arith.constant 0 : index
    %c0_33 = arith.constant 0 : index
    %57 = vector.load %arg3[%c0_31, %c0_32, %c0_33] : memref<1x64x32xf32, #tpu.memory_space<vmem>>, vector<1x64x32xf32>
    %58 = vector.shape_cast %57 : vector<1x64x32xf32> to vector<64x32xf32>
    %59 = vector.shape_cast %56 : vector<64x32xf32> to vector<1x64x32xf32>
    tpu.vector_store %arg3[%c0_31, %c0_32, %c0_33], %59 {strides = array<i32>} : memref<1x64x32xf32, #tpu.memory_space<vmem>>, vector<1x64x32xf32>,
    return
  }
  func.func @transform_0(%arg0: i32) -> (i32, i32, i32, i32) {
    %c0_i32 = arith.constant 0 : i32
    %c0_i32_0 = arith.constant 0 : i32
    %c0_i32_1 = arith.constant 0 : i32
    %c0_i32_2 = arith.constant 0 : i32
    return %arg0, %c0_i32, %c0_i32_0, %c0_i32_1 : i32, i32, i32, i32
  }
  func.func @transform_1(%arg0: i32) -> (i32, i32, i32) {
    %c0_i32 = arith.constant 0 : i32
    %c0_i32_0 = arith.constant 0 : i32
    %c0_i32_1 = arith.constant 0 : i32
    %c0_i32_2 = arith.constant 0 : i32
    return %c0_i32, %c0_i32_0, %c0_i32_1 : i32, i32, i32
  }
  func.func @transform_2(%arg0: i32) -> (i32, i32, i32) {
    %c0_i32 = arith.constant 0 : i32
    %c0_i32_0 = arith.constant 0 : i32
    %c0_i32_1 = arith.constant 0 : i32
    return %arg0, %c0_i32, %c0_i32_0 : i32, i32, i32
  }
}

module attributes {stable_mosaic.version = 11 : i64} {
  func.func @_combine_se_kernel(%arg0: i32, %arg1: memref<1x64x32xf32, #tpu.memory_space<vmem>>, %arg2: memref<1x64x32xf32, #tpu.memory_space<vmem>>, %arg3: memref<1x64x32xf32, #tpu.memory_space<vmem>>, %arg4: memref<32x2xf32, #tpu.memory_space<vmem>>, %arg5: memref<2x32xf32, #tpu.memory_space<vmem>>, %arg6: memref<1x64x32xf32, #tpu.memory_space<vmem>>) attributes {dimension_semantics = [#tpu.dimension_semantics<parallel>], iteration_bounds = array<i64: 2>, scalar_prefetch = 0 : i64, scratch_operands = 0 : i64, tpu.core_type = #tpu.core_type<tc>, window_params = [{transform_indices = @transform_0, window_bounds = array<i64: 1, 64, 32>}, {transform_indices = @transform_1, window_bounds = array<i64: 1, 64, 32>}, {transform_indices = @transform_2, window_bounds = array<i64: 1, 64, 32>}, {pipeline_mode = #tpu.pipeline_mode<synchronous>, transform_indices = @transform_3, window_bounds = array<i64: 32, 2>}, {pipeline_mode = #tpu.pipeline_mode<synchronous>, transform_indices = @transform_4, window_bounds = array<i64: 2, 32>}, {transform_indices = @transform_5, window_bounds = array<i64: 1, 64, 32>}]} {
    %c0 = arith.constant 0 : index
    %c0_0 = arith.constant 0 : index
    %c0_1 = arith.constant 0 : index
    %0 = vector.load %arg1[%c0, %c0_0, %c0_1] : memref<1x64x32xf32, #tpu.memory_space<vmem>>, vector<1x64x32xf32>
    %1 = vector.shape_cast %0 : vector<1x64x32xf32> to vector<64x32xf32>
    %cst = arith.constant dense<0.000000e+00> : vector<32xf32>
    %2 = vector.multi_reduction <add>, %1, %cst [0] : vector<64x32xf32> to vector<32xf32>
    %3 = vector.shape_cast %2 : vector<32xf32> to vector<1x32xf32>
    %cst_2 = arith.constant 6.400000e+01 : f32
    %4 = vector.broadcast %cst_2 : f32 to vector<1x32xf32>
    %5 = arith.divf %3, %4 : vector<1x32xf32>
    %c0_3 = arith.constant 0 : index
    %c0_4 = arith.constant 0 : index
    %6 = vector.load %arg4[%c0_3, %c0_4] : memref<32x2xf32, #tpu.memory_space<vmem>>, vector<32x2xf32>
    %cst_5 = arith.constant dense<0.000000e+00> : vector<1x2xf32>
    %7 = tpu.matmul %5, %6, %cst_5 {dimension_numbers = #tpu.dot_dimension_numbers<[1], [0], [0], [1], [0, 0, 1, 1], [], []>} : vector<1x32xf32>, vector<32x2xf32>, vector<1x2xf32> -> vector<1x2xf32>
    %cst_6 = arith.constant 0.000000e+00 : f32
    %8 = vector.broadcast %cst_6 : f32 to vector<1x2xf32>
    %9 = arith.maximumf %7, %8 : vector<1x2xf32>
    %c0_7 = arith.constant 0 : index
    %c0_8 = arith.constant 0 : index
    %10 = vector.load %arg5[%c0_7, %c0_8] : memref<2x32xf32, #tpu.memory_space<vmem>>, vector<2x32xf32>
    %cst_9 = arith.constant dense<0.000000e+00> : vector<1x32xf32>
    %11 = tpu.matmul %9, %10, %cst_9 {dimension_numbers = #tpu.dot_dimension_numbers<[1], [0], [0], [1], [0, 0, 1, 1], [], []>} : vector<1x2xf32>, vector<2x32xf32>, vector<1x32xf32> -> vector<1x32xf32>
    %cst_10 = arith.constant 0.000000e+00 : f32
    %12 = vector.broadcast %cst_10 : f32 to vector<1x32xf32>
    %13 = arith.subf %12, %11 : vector<1x32xf32>
    %14 = math.exp %13 : vector<1x32xf32>
    %cst_11 = arith.constant 1.000000e+00 : f32
    %15 = vector.broadcast %cst_11 : f32 to vector<1x32xf32>
    %16 = arith.addf %15, %14 : vector<1x32xf32>
    %cst_12 = arith.constant 1.000000e+00 : f32
    %17 = vector.broadcast %cst_12 : f32 to vector<1x32xf32>
    %18 = arith.divf %17, %16 : vector<1x32xf32>
    %c0_13 = arith.constant 0 : index
    %c0_14 = arith.constant 0 : index
    %c0_15 = arith.constant 0 : index
    %19 = vector.load %arg2[%c0_13, %c0_14, %c0_15] : memref<1x64x32xf32, #tpu.memory_space<vmem>>, vector<1x64x32xf32>
    %20 = vector.shape_cast %19 : vector<1x64x32xf32> to vector<64x32xf32>
    %21 = arith.addf %1, %20 : vector<64x32xf32>
    %c0_16 = arith.constant 0 : index
    %c0_17 = arith.constant 0 : index
    %c0_18 = arith.constant 0 : index
    %22 = vector.load %arg3[%c0_16, %c0_17, %c0_18] : memref<1x64x32xf32, #tpu.memory_space<vmem>>, vector<1x64x32xf32>
    %23 = vector.shape_cast %22 : vector<1x64x32xf32> to vector<64x32xf32>
    %24 = arith.addf %21, %23 : vector<64x32xf32>
    %25 = vector.broadcast %18 : vector<1x32xf32> to vector<64x32xf32>
    %26 = arith.mulf %24, %25 : vector<64x32xf32>
    %c0_19 = arith.constant 0 : index
    %c0_20 = arith.constant 0 : index
    %c0_21 = arith.constant 0 : index
    %27 = vector.load %arg6[%c0_19, %c0_20, %c0_21] : memref<1x64x32xf32, #tpu.memory_space<vmem>>, vector<1x64x32xf32>
    %28 = vector.shape_cast %27 : vector<1x64x32xf32> to vector<64x32xf32>
    %29 = vector.shape_cast %26 : vector<64x32xf32> to vector<1x64x32xf32>
    tpu.vector_store %arg6[%c0_19, %c0_20, %c0_21], %29 {strides = array<i32>} : memref<1x64x32xf32, #tpu.memory_space<vmem>>, vector<1x64x32xf32>,
    return
  }
  func.func @transform_0(%arg0: i32) -> (i32, i32, i32) {
    %c0_i32 = arith.constant 0 : i32
    %c0_i32_0 = arith.constant 0 : i32
    %c0_i32_1 = arith.constant 0 : i32
    return %arg0, %c0_i32, %c0_i32_0 : i32, i32, i32
  }
  func.func @transform_1(%arg0: i32) -> (i32, i32, i32) {
    %c0_i32 = arith.constant 0 : i32
    %c0_i32_0 = arith.constant 0 : i32
    %c0_i32_1 = arith.constant 0 : i32
    return %arg0, %c0_i32, %c0_i32_0 : i32, i32, i32
  }
  func.func @transform_2(%arg0: i32) -> (i32, i32, i32) {
    %c0_i32 = arith.constant 0 : i32
    %c0_i32_0 = arith.constant 0 : i32
    %c0_i32_1 = arith.constant 0 : i32
    return %arg0, %c0_i32, %c0_i32_0 : i32, i32, i32
  }
  func.func @transform_3(%arg0: i32) -> (i32, i32) {
    %c0_i32 = arith.constant 0 : i32
    %c0_i32_0 = arith.constant 0 : i32
    %c0_i32_1 = arith.constant 0 : i32
    return %c0_i32, %c0_i32_0 : i32, i32
  }
  func.func @transform_4(%arg0: i32) -> (i32, i32) {
    %c0_i32 = arith.constant 0 : i32
    %c0_i32_0 = arith.constant 0 : i32
    %c0_i32_1 = arith.constant 0 : i32
    return %c0_i32, %c0_i32_0 : i32, i32
  }
  func.func @transform_5(%arg0: i32) -> (i32, i32, i32) {
    %c0_i32 = arith.constant 0 : i32
    %c0_i32_0 = arith.constant 0 : i32
    %c0_i32_1 = arith.constant 0 : i32
    return %arg0, %c0_i32, %c0_i32_0 : i32, i32, i32
  }
}

</mosaic_0001>

<bundles_post_ra>
// kernel: parallel_attention_forward.7
= control target key start
LH: loop header
LB: loop body
LE: loop exit
PB: predicated region body
PF: predicated region fallthrough
CT: control target
= control target key end

     0   :  { %s879_s6 = smov 0   ;;  %s979_s0 = inlined_call_operand.vmem [shape: bf16[16,8,24], index: 0, kind: input, shape index: {}]   ;;  %s980_s1 = inlined_call_operand.vmem [shape: bf16[16,8,16], index: 1, kind: output, shape index: {}]  }
   0x1 LB: > { %s723_s7 = sadd.s32 4294967295, %s865_s6   ;;  %p727_p0 = scmp.ge.s32.totalorder %s865_s6, 1  ;;  %s865_s6 = sphi %s879_s6, %s11_s6  }
   0x2   : > { %p88_p1 = scmp.lt.s32.totalorder %s865_s6, 3 }
   0x4   : > { %p89_p2 = pnand %p727_p0, %p88_p1 }
   0x5   : > { %s728_s8 = sshll.u32 (!%p89_p2), %s723_s7, 3  ;;  %s867_s13 = smov (!%p89_p2), 124  }
   0x6   : > { %92 = sbr.rel (%p89_p2) target bundleno = 715 (0x2cb), region = 24  ;;  %p109_p3 = scmp.lt.s32.totalorder (!%p89_p2), %s728_s8, 15 }
   0x7   : > { %s868_s14 = smov (!%p89_p2), 120  }
   0xb   : > { %s982_s8 = smov (!%p109_p3, %s728_s8), 15  ;;  %vm139_vm0 = vcmask 31744   ;;  %vm353_vm1 = vcmask 64512   ;;  %vm658_vm2 = vcmask 125952  }
   0xc   : > { %s729_s9 = sshll.u32 %s982_s8, 2 }
   0xd   : > { %s112_s12 = scalar_lea.vmem %s979_s0, %s729_s9  ;;  %s118_s17 = scalar_lea.vmem %s980_s1, %s729_s9 }
   0xe   : > { %v774_v0 = vld [vmem:[%s112_s12 + $0x8] sm:$0xff]   ;;  %v759_v1 = vld [vmem:[%s112_s12] sm:$0xff]   ;;  %v775_v6 = vld [vmem:[%s112_s12 + $0x10] sm:$0xff]  }
   0xf   : > { %v764_v2 = vunpack.c.l.bf16 %v774_v0  ;;  %v765_v3 = vunpack.c.h.bf16 %v774_v0  ;;  %v760_v4 = vunpack.c.l.bf16 %v759_v1  ;;  %v761_v5 = vunpack.c.h.bf16 %v759_v1  ;;  %v776_v7 = vld [vmem:[%s112_s12 + $0x18] sm:$0xff]  }
  0x10   : > { %v768_v10 = vunpack.c.l.bf16 %v775_v6  ;;  %v769_v11 = vunpack.c.h.bf16 %v775_v6  ;;  %v772_v12 = vunpack.c.l.bf16 %v776_v7  ;;  %v773_v13 = vunpack.c.h.bf16 %v776_v7 }
  0x11   : > { %v787_v8 = vpack.i.bf16 %v765_v3, %v764_v2  ;;  %v895_v9 = vpack.i.bf16 %v761_v5, %v760_v4 }
  0x12   : > { %v898_v14 = vpack.i.bf16 %v769_v11, %v768_v10  ;;  %v900_v15 = vpack.i.bf16 %v773_v13, %v772_v12 }
  0x13   : > { %788 = vrot.lane.b32.xlu0 %v787_v8, %s867_s13  ;;  %798 = vrot.lane.b32.xlu1 %v895_v9, %s867_s13 }
  0x1b   : > { %803 = vrot.lane.b32.xlu1 %v898_v14, %s867_s13  ;;  %793 = vrot.lane.b32.xlu0 %v900_v15, %s867_s13 }
  0x85   : > { %v789_v16 = vpop.permute.xlu0 %788  ;;  %v799_v17 = vpop.permute.xlu1 %798 }
  0x86   : > { %v800_v18 = vunpack.i.l.bf16 %v799_v17  ;;  %v801_v19 = vunpack.i.h.bf16 %v799_v17  ;;  %v790_v20 = vunpack.i.l.bf16 %v789_v16  ;;  %v791_v21 = vunpack.i.h.bf16 %v789_v16 }
  0x88   : > { %732 = vmatpush.xpose.msk.msra.mxu0 %vm139_vm0, %v800_v18  ;;  %734 = vmatpush.xpose.msk.msra.mxu1 %vm139_vm0, %v801_v19 }
  0x89   : > { %736 = vmatpush.xpose.msk.msra.mxu2 %vm139_vm0, %v790_v20  ;;  %738 = vmatpush.xpose.msk.msra.mxu3 %vm139_vm0, %v791_v21 }
  0x8b   : > { %733 = vmatmul.msk.f32.vlgmr.msra.gmra.mxu0 %vm139_vm0, %v760_v4  ;;  %735 = vmatmul.msk.f32.vlgmr.msra.gmra.mxu1 %vm139_vm0, %v761_v5 }
  0x8c   : > { %737 = vmatmul.msk.f32.vlgmr.msra.gmra.mxu2 %vm139_vm0, %v764_v2  ;;  %739 = vmatmul.msk.f32.vlgmr.msra.gmra.mxu3 %vm139_vm0, %v765_v3 }
  0x8d   : > { %v804_v22 = vpop.permute.xlu1 %803  ;;  %v794_v23 = vpop.permute.xlu0 %793 }
  0x8e   : > { %v806_v24 = vunpack.i.h.bf16 %v804_v22  ;;  %v805_v25 = vunpack.i.l.bf16 %v804_v22  ;;  %v796_v26 = vunpack.i.h.bf16 %v794_v23  ;;  %v795_v27 = vunpack.i.l.bf16 %v794_v23 }
  0x90   : > { %740 = vmatpush.xpose.msk.msrb.mxu0 %vm139_vm0, %v805_v25  ;;  %742 = vmatpush.xpose.msk.msrb.mxu1 %vm139_vm0, %v806_v24 }
  0x91   : > { %744 = vmatpush.xpose.msk.msrb.mxu2 %vm139_vm0, %v795_v27  ;;  %746 = vmatpush.xpose.msk.msrb.mxu3 %vm139_vm0, %v796_v26 }
  0x93   : > { %741 = vmatmul.msk.f32.vlgmr.msrb.gmra.mxu0 %vm139_vm0, %v768_v10  ;;  %743 = vmatmul.msk.f32.vlgmr.msrb.gmra.mxu1 %vm139_vm0, %v769_v11 }
  0x94   : > { %745 = vmatmul.msk.f32.vlgmr.msrb.gmra.mxu2 %vm139_vm0, %v772_v12  ;;  %747 = vmatmul.msk.f32.vlgmr.msrb.gmra.mxu3 %vm139_vm0, %v773_v13 }
 0x108   : > { %v161_v28 = vpop.f32.mrf.mxu0  ;;  %v188_v29 = vpop.f32.mrf.mxu1 }
 0x109   : > { %v357_v30 = vsel %vm353_vm1, %v188_v29, -inf  ;;  %v354_v31 = vsel %vm353_vm1, %v161_v28, -inf }
 0x10a   : > { %358 = vmax.xlane.f32.xlu1 %v357_v30  ;;  %355 = vmax.xlane.f32.xlu0 %v354_v31 }
 0x10f   : > { %v215_v32 = vpop.f32.mrf.mxu2  ;;  %v242_v34 = vpop.f32.mrf.mxu3 }
 0x110   : > { %v360_v33 = vsel %vm353_vm1, %v215_v32, -inf  ;;  %v363_v35 = vsel %vm353_vm1, %v242_v34, -inf  ;;  %v269_v36 = vpop.f32.mrf.mxu0  ;;  %v296_v38 = vpop.f32.mrf.mxu1 }
 0x111   : > { %361 = vmax.xlane.f32.xlu2 %v360_v33  ;;  %v366_v37 = vsel %vm353_vm1, %v269_v36, -inf  ;;  %v369_v39 = vsel %vm353_vm1, %v296_v38, -inf }
 0x117   : > { %v323_v40 = vpop.f32.mrf.mxu2  ;;  %v350_v42 = vpop.f32.mrf.mxu3 }
 0x118   : > { %v372_v41 = vsel %vm353_vm1, %v323_v40, -inf  ;;  %v375_v43 = vsel %vm353_vm1, %v350_v42, -inf }
 0x119   : > { %364 = vmax.xlane.f32.xlu2 %v363_v35 }
 0x121   : > { %367 = vmax.xlane.f32.xlu2 %v366_v37 }
 0x123   : > { %808 = vrot.lane.b32.xlu1 %v787_v8, %s868_s14 }
 0x129   : > { %370 = vmax.xlane.f32.xlu2 %v369_v39 }
 0x131   : > { %373 = vmax.xlane.f32.xlu2 %v372_v41 }
 0x139   : > { %376 = vmax.xlane.f32.xlu2 %v375_v43 }
 0x17d   : > { %v359_v44 = vpop.xlane.xlu1 %358  ;;  %v356_v45 = vpop.xlane.xlu0 %355 }
 0x17e   : > { %v379_v46 = vsub.f32 %v188_v29, %v359_v44  ;;  %v378_v47 = vsub.f32 %v161_v28, %v356_v45 }
 0x180   : > { %v388_v48 = vmul.f32 1.442695, %v379_v46  ;;  %v386_v49 = vmul.f32 1.442695, %v378_v47 }
 0x182   : > { %827 = vpow2.f32 %v388_v48 }
 0x183   : > { %829 = vpow2.f32 %v386_v49 }
 0x184   : > { %v362_v50 = vpop.xlane.xlu2 %361 }
 0x185   : > { %v380_v51 = vsub.f32 %v215_v32, %v362_v50 }
 0x187   : > { %v390_v52 = vmul.f32 1.442695, %v380_v51 }
 0x188   : > { %v929_v53 = vpop.eup %827 }
 0x189   : > { %v931_v54 = vpop.eup %829  ;;  %831 = vpow2.f32 %v390_v52  ;;  %v405_v55 = vsel %vm353_vm1, %v929_v53, 0.0 }
 0x18a   : > { %406 = vadd.xlane.f32.xlu1 %v405_v55  ;;  %v402_v56 = vsel %vm353_vm1, %v931_v54, 0.0 }
 0x18b   : > { %403 = vadd.xlane.f32.xlu0 %v402_v56 }
 0x18c   : > { %v365_v57 = vpop.xlane.xlu2 %364 }
 0x18d   : > { %v381_v58 = vsub.f32 %v242_v34, %v365_v57 }
 0x18f   : > { %v832_v59 = vpop.eup %831  ;;  %v392_v60 = vmul.f32 1.442695, %v381_v58 }
 0x190   : > { %v408_v61 = vsel %vm353_vm1, %v832_v59, 0.0 }
 0x191   : > { %833 = vpow2.f32 %v392_v60  ;;  %409 = vadd.xlane.f32.xlu2 %v408_v61 }
 0x194   : > { %v368_v62 = vpop.xlane.xlu2 %367 }
 0x195   : > { %v382_v63 = vsub.f32 %v269_v36, %v368_v62  ;;  %v809_v18 = vpop.permute.xlu1 %808 }
 0x196   : > { %v811_v19 = vunpack.i.h.bf16 %v809_v18  ;;  %v810_v20 = vunpack.i.l.bf16 %v809_v18 }
 0x197   : > { %v834_v0 = vpop.eup %833  ;;  %v394_v1 = vmul.f32 1.442695, %v382_v63 }
 0x198   : > { %v411_v2 = vsel %vm353_vm1, %v834_v0, 0.0  ;;  %515 = vmatpush.msra.mxu2 %v810_v20  ;;  %541 = vmatpush.msra.mxu3 %v811_v19 }
 0x199   : > { %835 = vpow2.f32 %v394_v1  ;;  %412 = vadd.xlane.f32.xlu2 %v411_v2 }
 0x19c   : > { %v371_v3 = vpop.xlane.xlu2 %370 }
 0x19d   : > { %v383_v4 = vsub.f32 %v296_v38, %v371_v3 }
 0x19f   : > { %v939_v5 = vpop.eup %835  ;;  %v396_v6 = vmul.f32 1.442695, %v383_v4 }
 0x1a0   : > { %v414_v7 = vsel %vm353_vm1, %v939_v5, 0.0 }
 0x1a1   : > { %837 = vpow2.f32 %v396_v6  ;;  %415 = vadd.xlane.f32.xlu2 %v414_v7 }
 0x1a3   : > { %823 = vrot.lane.b32.xlu1 %v898_v14, %s868_s14 }
 0x1a4   : > { %v374_v8 = vpop.xlane.xlu2 %373 }
 0x1a5   : > { %v384_v10 = vsub.f32 %v323_v40, %v374_v8 }
 0x1a7   : > { %v838_v11 = vpop.eup %837  ;;  %v398_v12 = vmul.f32 1.442695, %v384_v10 }
 0x1a8   : > { %v417_v13 = vsel %vm353_vm1, %v838_v11, 0.0 }
 0x1a9   : > { %839 = vpow2.f32 %v398_v12  ;;  %418 = vadd.xlane.f32.xlu0 %v417_v13 }
 0x1ac   : > { %v377_v16 = vpop.xlane.xlu2 %376 }
 0x1ad   : > { %v385_v17 = vsub.f32 %v350_v42, %v377_v16 }
 0x1af   : > { %v840_v21 = vpop.eup %839  ;;  %v400_v22 = vmul.f32 1.442695, %v385_v17 }
 0x1b0   : > { %v420_v23 = vsel %vm353_vm1, %v840_v21, 0.0 }
 0x1b1   : > { %841 = vpow2.f32 %v400_v22  ;;  %421 = vadd.xlane.f32.xlu2 %v420_v23 }
 0x1b7   : > { %v842_v14 = vpop.eup %841 }
 0x1b8   : > { %v423_v24 = vsel %vm353_vm1, %v842_v14, 0.0 }
 0x1b9   : > { %424 = vadd.xlane.f32.xlu0 %v423_v24 }
 0x1c9   : > { %813 = vrot.lane.b32.xlu2 %v895_v9, %s868_s14 }
 0x1cd   : > { %818 = vrot.lane.b32.xlu0 %v900_v15, %s868_s14 }
 0x1fd   : > { %v407_v32 = vpop.xlane.xlu1 %406 }
 0x1fe   : > { %v404_v33 = vpop.xlane.xlu0 %403 }
 0x204   : > { %v410_v25 = vpop.xlane.xlu2 %409 }
 0x205   : > { %843 = vrcp.f32 %v410_v25 }
 0x20b   : > { %v844_v26 = vpop.eup %843 }
 0x20c   : > { %v436_v27 = vmul.f32 %v844_v26, %v832_v59  ;;  %v413_v28 = vpop.xlane.xlu2 %412 }
 0x20d   : > { %845 = vrcp.f32 %v413_v28 }
 0x20e   : > { %750 = vmatmul.msk.f32.vlgmr.msra.gmra.mxu2 %vm353_vm1, %v436_v27  ;;  %847 = vrcp.f32 %v407_v32 }
 0x20f   : > { %849 = vrcp.f32 %v404_v33 }
 0x213   : > { %v846_v29 = vpop.eup %845 }
 0x214   : > { %v437_v30 = vmul.f32 %v846_v29, %v834_v0  ;;  %v416_v31 = vpop.xlane.xlu2 %415  ;;  %v848_v15 = vpop.eup %847 }
 0x215   : > { %v824_v34 = vpop.permute.xlu1 %823  ;;  %v850_v36 = vpop.eup %849  ;;  %851 = vrcp.f32 %v416_v31  ;;  %v435_v42 = vmul.f32 %v848_v15, %v929_v53 }
 0x216   : > { %751 = vmatmul.msk.f32.vlgmr.msra.gmra.mxu3 %vm353_vm1, %v437_v30  ;;  %v826_v38 = vunpack.i.h.bf16 %v824_v34  ;;  %v825_v41 = vunpack.i.l.bf16 %v824_v34  ;;  %v434_v43 = vmul.f32 %v850_v36, %v931_v54 }
 0x21b   : > { %v852_v44 = vpop.eup %851 }
 0x21c   : > { %v419_v35 = vpop.xlane.xlu0 %418  ;;  %v438_v47 = vmul.f32 %v852_v44, %v939_v5 }
 0x21d   : > { %853 = vrcp.f32 %v419_v35 }
 0x223   : > { %v854_v45 = vpop.eup %853 }
 0x224   : > { %v422_v9 = vpop.xlane.xlu2 %421  ;;  %v439_v48 = vmul.f32 %v854_v45, %v838_v11 }
 0x225   : > { %855 = vrcp.f32 %v422_v9 }
 0x22b   : > { %v856_v49 = vpop.eup %855 }
 0x22c   : > { %v814_v37 = vpop.permute.xlu2 %813  ;;  %v425_v46 = vpop.xlane.xlu0 %424  ;;  %v440_v54 = vmul.f32 %v856_v49, %v840_v21 }
 0x22d   : > { %v816_v39 = vunpack.i.h.bf16 %v814_v37  ;;  %v815_v40 = vunpack.i.l.bf16 %v814_v37  ;;  %857 = vrcp.f32 %v425_v46 }
 0x22f   : > { %463 = vmatpush.msra.mxu0 %v815_v40  ;;  %489 = vmatpush.msra.mxu1 %v816_v39 }
 0x230   : > { %748 = vmatmul.msk.f32.vlgmr.msra.gmra.mxu0 %vm353_vm1, %v434_v43  ;;  %749 = vmatmul.msk.f32.vlgmr.msra.gmra.mxu1 %vm353_vm1, %v435_v42 }
 0x231   : > { %567 = vmatpush.msrb.mxu0 %v825_v41  ;;  %593 = vmatpush.msrb.mxu1 %v826_v38 }
 0x233   : > { %v858_v50 = vpop.eup %857 }
 0x234   : > { %v441_v55 = vmul.f32 %v858_v50, %v842_v14 }
 0x238   : > { %752 = vmatmul.msk.f32.vlgmr.msrb.gmra.mxu0 %vm353_vm1, %v438_v47  ;;  %753 = vmatmul.msk.f32.vlgmr.msrb.gmra.mxu1 %vm353_vm1, %v439_v48 }
 0x23f   : > { %v819_v51 = vpop.permute.xlu0 %818 }
 0x240   : > { %v821_v52 = vunpack.i.h.bf16 %v819_v51  ;;  %v820_v53 = vunpack.i.l.bf16 %v819_v51 }
 0x242   : > { %619 = vmatpush.msrb.mxu2 %v820_v53  ;;  %645 = vmatpush.msrb.mxu3 %v821_v52 }
 0x243   : > { %754 = vmatmul.msk.f32.vlgmr.msrb.gmra.mxu2 %vm353_vm1, %v440_v54  ;;  %755 = vmatmul.msk.f32.vlgmr.msrb.gmra.mxu3 %vm353_vm1, %v441_v55 }
 0x291   : > { %v517_v56 = vpop.f32.mrf.mxu2 }
 0x292   : > { %v652_v57 = vpack.c.bf16 %v517_v56, %v517_v56 }
 0x294   : > { %661 = vst.msk [vmem:[%s118_s17 + $0x8] sm:$0xf] %vm658_vm2, %v652_v57 }
 0x299   : > { %v543_v58 = vpop.f32.mrf.mxu3 }
 0x29a   : > { %v653_v59 = vpack.c.bf16 %v543_v58, %v543_v58 }
 0x29c   : > { %662 = vst.msk [vmem:[%s118_s17 + $0xc] sm:$0xf] %vm658_vm2, %v653_v59 }
 0x2ad   : > { %v465_v60 = vpop.f32.mrf.mxu0  ;;  %v491_v61 = vpop.f32.mrf.mxu1 }
 0x2ae   : > { %v650_v62 = vpack.c.bf16 %v465_v60, %v465_v60  ;;  %v651_v63 = vpack.c.bf16 %v491_v61, %v491_v61 }
 0x2b0   : > { %659 = vst.msk [vmem:[%s118_s17] sm:$0xf] %vm658_vm2, %v650_v62 }
 0x2b1   : > { %660 = vst.msk [vmem:[%s118_s17 + $0x4] sm:$0xf] %vm658_vm2, %v651_v63 }
 0x2b5   : > { %v569_v0 = vpop.f32.mrf.mxu0  ;;  %v595_v1 = vpop.f32.mrf.mxu1 }
 0x2b6   : > { %v654_v2 = vpack.c.bf16 %v569_v0, %v569_v0  ;;  %v655_v3 = vpack.c.bf16 %v595_v1, %v595_v1 }
 0x2b8   : > { %663 = vst.msk [vmem:[%s118_s17 + $0x10] sm:$0xf] %vm658_vm2, %v654_v2 }
 0x2b9   : > { %664 = vst.msk [vmem:[%s118_s17 + $0x14] sm:$0xf] %vm658_vm2, %v655_v3 }
 0x2c6   : > { %v621_v4 = vpop.f32.mrf.mxu2  ;;  %v647_v5 = vpop.f32.mrf.mxu3 }
 0x2c7   : > { %v656_v6 = vpack.c.bf16 %v621_v4, %v621_v4  ;;  %v657_v7 = vpack.c.bf16 %v647_v5, %v647_v5 }
 0x2c9   : > { %665 = vst.msk [vmem:[%s118_s17 + $0x18] sm:$0xf] %vm658_vm2, %v656_v6 }
 0x2ca   : > { %666 = vst.msk [vmem:[%s118_s17 + $0x1c] sm:$0xf] %vm658_vm2, %v657_v7 }
 0x2cb PF: > { %s11_s6 = sadd.s32 1, %s865_s6  }
 0x2cc   : > { %p8_p4 = scmp.ge.s32.totalorder %s11_s6, 4  }
 0x2ce   :  { %10 = sbr.rel (!%p8_p4) target bundleno = 1 (0x1), region = 54 }

// kernel: parallel_attention_forward.9
= control target key start
LH: loop header
LB: loop body
LE: loop exit
PB: predicated region body
PF: predicated region fallthrough
CT: control target
= control target key end

     0   :  { %s1241_s9 = smov 0   ;;  %s1617_s0 = inlined_call_operand.vmem [shape: bf16[2,10,10,16], index: 0, kind: input, shape index: {}]   ;;  %s1618_s1 = inlined_call_operand.vmem [shape: bf16[9,16,32], index: 1, kind: input, shape index: {}]   ;;  %s1619_s2 = inlined_call_operand.vmem [shape: f32[2,64,32], index: 2, kind: output, shape index: {}]  }
   0x1 LB: > { %s1084_s10 = sadd.s32 4294967295, %s1222_s9   ;;  %p1088_p0 = scmp.ge.s32.totalorder %s1222_s9, 1  ;;  %s1222_s9 = sphi %s1241_s9, %s12_s9  }
   0x2   : > { %p112_p1 = scmp.lt.s32.totalorder %s1222_s9, 3 }
   0x4   : > { %p113_p2 = pnand %p1088_p0, %p112_p1 }
   0x5   : > { %p134_p3 = scmp.lt.s32.totalorder (!%p113_p2), %s1084_s10, 1 }
   0x6   : > { %116 = sbr.rel (%p113_p2) target bundleno = 328 (0x148), region = 28 }
   0xb   : > { %v1194_v0 = vld [vmem:[%s1618_s1 + $0x8] sm:$0xff]  ;;  %v1195_v1 = vld [vmem:[%s1618_s1 + $0x10] sm:$0xff]  ;;  %s1625_s10 = smov (!%p134_p3, %s1084_s10), 1  ;;  %v1196_v2 = vld [vmem:[%s1618_s1 + $0x18] sm:$0xff]  ;;  %vm167_vm0 = vsmask.f32 3328 }
   0xc   : > { %1202 = vmatpush.bf16.msra.mxu1 %v1194_v0  ;;  %1203 = vmatpush.bf16.msra.mxu2 %v1194_v0  ;;  %s1205_s15 = smul.u32 80, %s1625_s10  ;;  %v1193_v3 = vld [vmem:[%s1618_s1] sm:$0xff]  ;;  %vm168_vm1 = vsmask.f32 7440  ;;  %vm303_vm2 = vcmask 130048   ;;  %vm420_vm4 = vcmask 1042432  }
   0xd   : > { %1204 = vmatpush.bf16.msra.mxu3 %v1194_v0  ;;  %323 = vmatpush.bf16.msra.mxu0 %v1194_v0  ;;  %v1197_v4 = vld [vmem:[%s1618_s1 + $0x20] sm:$0xff]  ;;  %vm1312_vm3 = vmor %vm167_vm0, %vm168_vm1  ;;  %vm421_vm5 = vcmask 1046532   ;;  %vm908_vm7 = vcmask 1047556   ;;  %s1192_s5 = sshll.u32 %s1625_s10, 6  ;;  %vm1020_vm8 = vcmask 261120  }
   0xe   : > { %s1270_s24 = scalar_lea.vmem %s1617_s0, %s1205_s15  ;;  %vm1385_vm6 = vmor %vm420_vm4, %vm421_vm5  ;;  %s1585_s8 = scalar_lea.vmem %s1619_s2, %s1192_s5 }
   0xf   : > { %v1273_v5 = vld [vmem:[%s1270_s24 + $0x10] sm:$0xf]  ;;  %v1276_v6 = vld [vmem:[%s1270_s24 + $0x14] sm:$0x1]  ;;  %v1279_v7 = vld [vmem:[%s1270_s24 + $0x18] sm:$0xf] }
  0x10   : > { %495 = vmatpush.bf16.msrb.mxu2 %v1195_v1  ;;  %390 = vmatpush.bf16.msrb.mxu1 %v1193_v3  ;;  %v1282_v8 = vld [vmem:[%s1270_s24 + $0x1c] sm:$0x1]  ;;  %v199_v9 = vshrl.u32 %v1273_v5, 16  ;;  %v202_v10 = vshll.u32 %v1273_v5, 16  ;;  %v208_v11 = vshll.u32 %v1276_v6, 16  ;;  %v213_v12 = vshrl.u32 %v1279_v7, 16 }
  0x11   : > { %559 = vmatpush.bf16.msrb.mxu3 %v1196_v2  ;;  %636 = vmatpush.bf16.msrb.mxu0 %v1197_v4  ;;  %v216_v13 = vshll.u32 %v1279_v7, 16  ;;  %v222_v14 = vshll.u32 %v1282_v8, 16  ;;  %v1291_v15 = vld [vmem:[%s1270_s24 + $0x20] sm:$0xf]  ;;  %v1294_v16 = vld [vmem:[%s1270_s24 + $0x24] sm:$0x1] }
  0x12   : > { %v201_v17 = vrot.slane %v199_v9, 4  ;;  %v204_v18 = vrot.slane %v202_v10, 5  ;;  %v210_v19 = vrot.slane %v208_v11, 5  ;;  %v215_v20 = vrot.slane %v213_v12, 4  ;;  %v1297_v21 = vld [vmem:[%s1270_s24 + $0x28] sm:$0xf] }
  0x13   : > { %v218_v22 = vrot.slane %v216_v13, 5  ;;  %v224_v23 = vrot.slane %v222_v14, 5  ;;  %v1300_v24 = vld [vmem:[%s1270_s24 + $0x2c] sm:$0x1]  ;;  %v227_v25 = vshrl.u32 %v1291_v15, 16  ;;  %v230_v26 = vshll.u32 %v1291_v15, 16 }
  0x14   : > { %v205_v27 = vor.u32 %v204_v18, %v201_v17  ;;  %v236_v28 = vshll.u32 %v1294_v16, 16  ;;  %v241_v29 = vshrl.u32 %v1297_v21, 16  ;;  %v244_v30 = vshll.u32 %v1297_v21, 16  ;;  %v1308_v31 = vld [vmem:[%s1270_s24 + $0x30] sm:$0xf]  ;;  %v1198_v11 = vld [vmem:[%s1618_s1 + $0x28] sm:$0xff] }
  0x15   : > { %v219_v33 = vor.u32 %v218_v22, %v215_v20  ;;  %v229_v34 = vrot.slane %v227_v25, 4  ;;  %v232_v35 = vrot.slane %v230_v26, 5  ;;  %v250_v36 = vshll.u32 %v1300_v24, 16  ;;  %v1318_v37 = vld [vmem:[%s1270_s24 + $0x34] sm:$0x1] }
  0x16   : > { %v206_v38 = vrot.slane %v205_v27, 4  ;;  %v238_v39 = vrot.slane %v236_v28, 5  ;;  %v243_v40 = vrot.slane %v241_v29, 4  ;;  %v246_v41 = vrot.slane %v244_v30, 5  ;;  %v1324_v48 = vld [vmem:[%s1270_s24 + $0x38] sm:$0xf] }
  0x17   : > { %v220_v42 = vrot.slane %v219_v33, 4  ;;  %v233_v43 = vor.u32 %v232_v35, %v229_v34  ;;  %v252_v44 = vrot.slane %v250_v36, 5  ;;  %v255_v45 = vshrl.u32 %v1308_v31, 16  ;;  %v1327_v49 = vld [vmem:[%s1270_s24 + $0x3c] sm:$0x1] }
  0x18   : > { %v211_v46 = vsel %vm1312_vm3, %v206_v38, %v210_v19  ;;  %v247_v47 = vor.u32 %v246_v41, %v243_v40  ;;  %v258_v50 = vshll.u32 %v1308_v31, 16  ;;  %v264_v51 = vshll.u32 %v1318_v37, 16  ;;  %v1338_v60 = vld [vmem:[%s1270_s24] sm:$0xf]  ;;  %v146_v1 = vld [vmem:[%s1270_s24 + $0x4] sm:$0x1] }
  0x19   : > { %v225_v52 = vsel %vm1312_vm3, %v220_v42, %v224_v23  ;;  %v1333_v53 = vunpack.c.l.b16 %v211_v46  ;;  %v234_v54 = vrot.slane %v233_v43, 4  ;;  %v257_v55 = vrot.slane %v255_v45, 4  ;;  %v1355_v10 = vld [vmem:[%s1270_s24 + $0x8] sm:$0xf]  ;;  %v1199_v23 = vld [vmem:[%s1618_s1 + $0x30] sm:$0xff] }
  0x1a   : > { %v1335_v56 = vunpack.c.l.b16 %v225_v52  ;;  %v248_v57 = vrot.slane %v247_v47, 4  ;;  %v260_v58 = vrot.slane %v258_v50, 5  ;;  %v266_v59 = vrot.slane %v264_v51, 5  ;;  %v148_v27 = vld [vmem:[%s1270_s24 + $0xc] sm:$0x1] }
  0x1b   : > { %v239_v61 = vsel %vm1312_vm3, %v234_v54, %v238_v39  ;;  %v269_v62 = vshrl.u32 %v1324_v48, 16  ;;  %v272_v63 = vshll.u32 %v1324_v48, 16  ;;  %v278_v0 = vshll.u32 %v1327_v49, 16 }
  0x1c   : > { %v1348_v2 = vpack.c.b16 %v1335_v56, %v1333_v53  ;;  %v253_v3 = vsel %vm1312_vm3, %v248_v57, %v252_v44  ;;  %v1352_v4 = vunpack.c.l.b16 %v239_v61  ;;  %v261_v9 = vor.u32 %v260_v58, %v257_v55 }
  0x1d   : > { %v1360_v12 = vunpack.c.l.b16 %v253_v3  ;;  %v271_v13 = vrot.slane %v269_v62, 4  ;;  %v274_v14 = vrot.slane %v272_v63, 5  ;;  %v280_v17 = vrot.slane %v278_v0, 5 }
  0x1e   : > { %1099 = vmatmul.msk.bf16.vlgmr.msra.gmra.mxu1 %vm303_vm2, %v1348_v2  ;;  %v262_v18 = vrot.slane %v261_v9, 4  ;;  %v171_v19 = vshrl.u32 %v1338_v60, 16  ;;  %v174_v20 = vshll.u32 %v1338_v60, 16  ;;  %v180_v22 = vshll.u32 %v146_v1, 16 }
  0x1f   : > { %v1371_v25 = vpack.c.b16 %v1360_v12, %v1352_v4  ;;  %v275_v26 = vor.u32 %v274_v14, %v271_v13  ;;  %v185_v28 = vshrl.u32 %v1355_v10, 16  ;;  %v188_v29 = vshll.u32 %v1355_v10, 16  ;;  %704 = vmatpush.bf16.msra.mxu1 %v1198_v11 }
  0x20   : > { %v267_v30 = vsel %vm1312_vm3, %v262_v18, %v266_v59  ;;  %v173_v33 = vrot.slane %v171_v19, 4  ;;  %v176_v34 = vrot.slane %v174_v20, 5  ;;  %v182_v36 = vrot.slane %v180_v22, 5  ;;  %v1200_v59 = vld [vmem:[%s1618_s1 + $0x38] sm:$0xff] }
  0x21   : > { %1100 = vmatmul.msk.bf16.vlgmr.msra.gmra.mxu2 %vm303_vm2, %v1371_v25  ;;  %v276_v35 = vrot.slane %v275_v26, 4  ;;  %v187_v38 = vrot.slane %v185_v28, 4  ;;  %v190_v39 = vrot.slane %v188_v29, 5  ;;  %v1380_v40 = vunpack.c.l.b16 %v267_v30 }
  0x22   : > { %v177_v41 = vor.u32 %v176_v34, %v173_v33  ;;  %v194_v42 = vshll.u32 %v148_v27, 16  ;;  %v425_v43 = vrot.slane %v146_v1, 5  ;;  %756 = vmatpush.bf16.msra.mxu2 %v1199_v23  ;;  %v429_v46 = vrot.slane %v148_v27, 5 }
  0x23   : > { %v281_v44 = vsel %vm1312_vm3, %v276_v35, %v280_v17  ;;  %v191_v45 = vor.u32 %v190_v39, %v187_v38  ;;  %v1110_v54 = vrot.slane %v1338_v60, 9  ;;  %v353_v57 = vunpack.c.l.b16 %v1338_v60 }
  0x24   : > { %v1389_v50 = vunpack.c.l.b16 %v281_v44  ;;  %v178_v51 = vrot.slane %v177_v41, 4  ;;  %v196_v52 = vrot.slane %v194_v42, 5  ;;  %v1111_v58 = vrot.slane %v1355_v10, 9 }
  0x25   : > { %v192_v55 = vrot.slane %v191_v45, 4  ;;  %v354_v63 = vunpack.c.l.b16 %v1355_v10  ;;  %v426_v0 = vsel %vm1385_vm6, %v1110_v54, %v425_v43  ;;  %v1201_v10 = vld [vmem:[%s1618_s1 + $0x40] sm:$0xff]  ;;  %v355_v19 = vunpack.c.l.b16 %v1273_v5 }
  0x26   : > { %v1399_v61 = vpack.c.b16 %v1389_v50, %v1380_v40  ;;  %v183_v62 = vsel %vm1312_vm3, %v178_v51, %v182_v36  ;;  %v1410_v3 = vsel %vm1385_vm6, %v1111_v58, %v429_v46  ;;  %v458_v11 = vunpack.c.l.b16 %v426_v0 }
  0x27   : > { %v197_v60 = vsel %vm1312_vm3, %v192_v55, %v196_v52  ;;  %v285_v1 = vunpack.c.l.b16 %v183_v62  ;;  %v459_v13 = vunpack.c.l.b16 %v1410_v3  ;;  %v361_v17 = vpack.c.b16 %v354_v63, %v353_v57  ;;  %v163_v3 = vld [vmem:[%s1270_s24 + $0x48] sm:$0xf] }
  0x28   : > { %1101 = vmatmul.msk.bf16.vlgmr.msra.gmra.mxu3 %vm303_vm2, %v1399_v61  ;;  %v286_v9 = vunpack.c.l.b16 %v197_v60  ;;  %v1112_v20 = vrot.slane %v1273_v5, 9  ;;  %v433_v22 = vrot.slane %v1276_v6, 5  ;;  %v1113_v23 = vrot.slane %v1279_v7, 9  ;;  %v162_v60 = vld [vmem:[%s1270_s24 + $0x44] sm:$0x1] }
  0x29   : > { %821 = vmatpush.bf16.msra.mxu3 %v1200_v59  ;;  %v466_v18 = vpack.c.b16 %v459_v13, %v458_v11  ;;  %v437_v26 = vrot.slane %v1282_v8, 5  ;;  %v530_v27 = vpack.c.b16 %v355_v19, %v354_v63  ;;  %v356_v28 = vunpack.c.l.b16 %v1279_v7 }
  0x2a   : > { %v293_v14 = vpack.c.b16 %v286_v9, %v285_v1  ;;  %v1431_v29 = vsel %vm1385_vm6, %v1112_v20, %v433_v22  ;;  %v607_v5 = vpack.c.b16 %v1333_v53, %v286_v9  ;;  %v357_v34 = vunpack.c.l.b16 %v1291_v15 }
  0x2b   : > { %v1435_v30 = vsel %vm1385_vm6, %v1113_v23, %v437_v26  ;;  %v460_v6 = vunpack.c.l.b16 %v1431_v29  ;;  %v362_v8 = vpack.c.b16 %v356_v28, %v355_v19  ;;  %v1114_v35 = vrot.slane %v1291_v15, 9  ;;  %v164_v29 = vld [vmem:[%s1270_s24 + $0x4c] sm:$0x1] }
  0x2c   : > { %1098 = vmatmul.msk.bf16.vlgmr.msra.gmra.mxu0 %vm303_vm2, %v293_v14  ;;  %v461_v33 = vunpack.c.l.b16 %v1435_v30  ;;  %v441_v53 = vrot.slane %v1294_v16, 5  ;;  %v1115_v36 = vrot.slane %v1297_v21, 9  ;;  %v445_v38 = vrot.slane %v1300_v24, 5 }
  0x2d   : > { %877 = vmatpush.bf16.msra.mxu0 %v1201_v10  ;;  %v531_v39 = vpack.c.b16 %v357_v34, %v356_v28  ;;  %v358_v41 = vunpack.c.l.b16 %v1297_v21  ;;  %v608_v15 = vpack.c.b16 %v1352_v4, %v1335_v56  ;;  %v1462_v21 = vld [vmem:[%s1270_s24 + $0x40] sm:$0xf]  ;;  %v359_v46 = vunpack.c.l.b16 %v1308_v31 }
  0x2e   : > { %1106 = vmatmul.msk.bf16.vlgmr.msrb.gmra.mxu1 %vm303_vm2, %v361_v17  ;;  %v467_v7 = vpack.c.b16 %v461_v33, %v460_v6  ;;  %v442_v42 = vsel %vm1385_vm6, %v1114_v35, %v441_v53  ;;  %v446_v43 = vsel %vm1385_vm6, %v1115_v36, %v445_v38  ;;  %v590_v51 = vshrl.u32 %v1462_v21, 16 }
  0x2f   : > { %v462_v44 = vunpack.c.l.b16 %v442_v42  ;;  %v463_v16 = vunpack.c.l.b16 %v446_v43  ;;  %v363_v45 = vpack.c.b16 %v358_v41, %v357_v34  ;;  %v593_v52 = vshll.u32 %v1462_v21, 16 }
  0x30   : > { %v1116_v56 = vrot.slane %v1308_v31, 9  ;;  %v449_v4 = vrot.slane %v1318_v37, 5  ;;  %v1117_v54 = vrot.slane %v1324_v48, 9  ;;  %v453_v55 = vrot.slane %v1327_v49, 5 }
  0x31   : > { %1124 = vmatmul.msk.bf16.vlgmr.msrb.gmra.mxu2 %vm303_vm2, %v466_v18  ;;  %v468_v24 = vpack.c.b16 %v463_v16, %v462_v44  ;;  %v532_v57 = vpack.c.b16 %v359_v46, %v358_v41  ;;  %v592_v58 = vrot.slane %v590_v51, 4  ;;  %v595_v59 = vrot.slane %v593_v52, 5 }
  0x32   : > { %v360_v62 = vunpack.c.l.b16 %v1324_v48  ;;  %v450_v63 = vsel %vm1385_vm6, %v1116_v56, %v449_v4  ;;  %v454_v0 = vsel %vm1385_vm6, %v1117_v54, %v453_v55  ;;  %v609_v31 = vpack.c.b16 %v1380_v40, %v1360_v12 }
  0x33   : > { %v464_v37 = vunpack.c.l.b16 %v450_v63  ;;  %v465_v1 = vunpack.c.l.b16 %v454_v0  ;;  %v596_v49 = vor.u32 %v595_v59, %v592_v58  ;;  %v599_v9 = vshll.u32 %v162_v60, 16 }
  0x34   : > { %v364_v11 = vpack.c.b16 %v360_v62, %v359_v46  ;;  %v529_v17 = vunpack.c.l.b16 %v1462_v21  ;;  %v675_v20 = vpack.c.b16 %v460_v6, %v459_v13  ;;  %v676_v22 = vpack.c.b16 %v462_v44, %v461_v33 }
  0x35   : > { %v469_v48 = vpack.c.b16 %v465_v1, %v464_v37  ;;  %v597_v10 = vrot.slane %v596_v49, 4  ;;  %v601_v14 = vrot.slane %v599_v9, 5  ;;  %v787_v13 = vshrl.u32 %v163_v3, 16 }
  0x36   : > { %v533_v12 = vpack.c.b16 %v529_v17, %v360_v62  ;;  %v790_v23 = vshll.u32 %v163_v3, 16  ;;  %v669_v26 = vrot.slane %v162_v60, 5  ;;  %v738_v33 = vunpack.c.l.b16 %v163_v3 }
  0x37   : > { %v602_v18 = vsel %vm1312_vm3, %v597_v10, %v601_v14  ;;  %v1179_v38 = vrot.slane %v163_v3, 9 }
  0x38   : > { %1134 = vmatmul.msk.bf16.vlgmr.msrb.gmra.mxu3 %vm303_vm2, %v530_v27  ;;  %v606_v40 = vunpack.c.l.b16 %v602_v18  ;;  %v789_v27 = vrot.slane %v787_v13, 4  ;;  %v792_v28 = vrot.slane %v790_v23, 5  ;;  %v739_v53 = vpack.c.b16 %v738_v33, %v529_v17 }
  0x3a   : > { %v610_v19 = vpack.c.b16 %v606_v40, %v1389_v50  ;;  %v677_v50 = vpack.c.b16 %v464_v37, %v463_v16 }
  0x3c   : > { %1144 = vmatmul.msk.bf16.vlgmr.msrb.gmra.mxu0 %vm303_vm2, %v607_v5  ;;  %v796_v5 = vshll.u32 %v164_v29, 16 }
  0x3e   : > { %1107 = vmatmul.msk.bf16.gmra.mxu1 %vm303_vm2, %v362_v8 }
  0x41   : > { %1125 = vmatmul.msk.bf16.gmra.mxu2 %vm303_vm2, %v467_v7 }
  0x48   : > { %1135 = vmatmul.msk.bf16.gmra.mxu3 %vm303_vm2, %v531_v39  ;;  %v854_v39 = vrot.slane %v164_v29, 5 }
  0x4c   : > { %1145 = vmatmul.msk.bf16.gmra.mxu0 %vm303_vm2, %v608_v15 }
  0x4e   : > { %1108 = vmatmul.msk.bf16.gmra.mxu1 %vm303_vm2, %v363_v45 }
  0x51   : > { %1126 = vmatmul.msk.bf16.gmra.mxu2 %vm303_vm2, %v468_v24 }
  0x58   : > { %1136 = vmatmul.msk.bf16.gmra.mxu3 %vm303_vm2, %v532_v57 }
  0x5c   : > { %1146 = vmatmul.msk.bf16.gmra.mxu0 %vm303_vm2, %v609_v31 }
  0x5e   : > { %1109 = vmatmul.msk.bf16.gmra.mxu1 %vm303_vm2, %v364_v11 }
  0x61   : > { %1127 = vmatmul.msk.bf16.gmra.mxu2 %vm303_vm2, %v469_v48 }
  0x68   : > { %1137 = vmatmul.msk.bf16.gmra.mxu3 %vm303_vm2, %v533_v12 }
  0x6c   : > { %1147 = vmatmul.msk.bf16.gmra.mxu0 %vm303_vm2, %v610_v19 }
  0x6e   : > { %1155 = vmatmul.msk.bf16.vlgmr.msra.gmra.mxu1 %vm303_vm2, %v675_v20 }
  0x71   : > { %1165 = vmatmul.msk.bf16.vlgmr.msra.gmra.mxu2 %vm303_vm2, %v362_v8 }
  0x78   : > { %1175 = vmatmul.msk.bf16.vlgmr.msra.gmra.mxu3 %vm303_vm2, %v1348_v2  ;;  %v1148_v2 = vrot.slane %v1462_v21, 9 }
  0x7a   : > { %v670_v30 = vsel %vm1385_vm6, %v1148_v2, %v669_v26 }
  0x7b   : > { %v674_v6 = vunpack.c.l.b16 %v670_v30 }
  0x7c   : > { %1186 = vmatmul.msk.bf16.vlgmr.msra.gmra.mxu0 %vm303_vm2, %v467_v7  ;;  %v798_v7 = vrot.slane %v796_v5, 5 }
  0x7d   : > { %v678_v34 = vpack.c.b16 %v674_v6, %v465_v1 }
  0x7e   : > { %1156 = vmatmul.msk.bf16.gmra.mxu1 %vm303_vm2, %v676_v22 }
  0x81   : > { %1166 = vmatmul.msk.bf16.gmra.mxu2 %vm303_vm2, %v363_v45 }
  0x88   : > { %1176 = vmatmul.msk.bf16.gmra.mxu3 %vm303_vm2, %v1371_v25  ;;  %v793_v25 = vor.u32 %v792_v28, %v789_v27 }
  0x8a   : > { %v794_v8 = vrot.slane %v793_v25, 4 }
  0x8c   : > { %1187 = vmatmul.msk.bf16.gmra.mxu0 %vm303_vm2, %v468_v24  ;;  %v799_v36 = vsel %vm1312_vm3, %v794_v8, %v798_v7 }
  0x8d   : > { %v803_v41 = vunpack.c.l.b16 %v799_v36 }
  0x8e   : > { %1157 = vmatmul.msk.bf16.gmra.mxu1 %vm303_vm2, %v677_v50 }
  0x8f   : > { %v804_v43 = vpack.c.b16 %v803_v41, %v606_v40 }
  0x91   : > { %1167 = vmatmul.msk.bf16.gmra.mxu2 %vm303_vm2, %v364_v11 }
  0x98   : > { %1177 = vmatmul.msk.bf16.gmra.mxu3 %vm303_vm2, %v1399_v61  ;;  %v855_v61 = vsel %vm1385_vm6, %v1179_v38, %v854_v39 }
  0x99   : > { %v859_v15 = vunpack.c.l.b16 %v855_v61 }
  0x9b   : > { %v330_v35 = vpop.f32.mrf.mxu1  ;;  %v860_v16 = vpack.c.b16 %v859_v15, %v674_v6 }
  0x9c   : > { %1188 = vmatmul.msk.bf16.gmra.mxu0 %vm303_vm2, %v469_v48 }
  0x9e   : > { %1158 = vmatmul.msk.bf16.gmra.mxu1 %vm303_vm2, %v678_v34 }
  0xa1   : > { %1168 = vmatmul.msk.bf16.gmra.mxu2 %vm303_vm2, %v739_v53 }
  0xa3   : > { %v332_v42 = vpop.f32.mrf.mxu1 }
  0xa4   : > { %v335_v44 = vpop.f32.mrf.mxu2 }
  0xa8   : > { %1178 = vmatmul.msk.bf16.gmra.mxu3 %vm303_vm2, %v804_v43 }
  0xa9   : > { %v325_v45 = vpop.f32.mrf.mxu0 }
  0xab   : > { %v1521_v32 = vpop.f32.mrf.mxu3  ;;  %v392_v24 = vpop.f32.mrf.mxu1 }
  0xac   : > { %1189 = vmatmul.msk.bf16.gmra.mxu0 %vm303_vm2, %v860_v16  ;;  %v337_v21 = vpop.f32.mrf.mxu2  ;;  %v393_v46 = vadd.f32 %v392_v24, %v325_v45 }
  0xb1   : > { %v327_v51 = vpop.f32.mrf.mxu0 }
  0xb3   : > { %v1524_v52 = vpop.f32.mrf.mxu3  ;;  %v394_v47 = vpop.f32.mrf.mxu1 }
  0xb4   : > { %v497_v56 = vpop.f32.mrf.mxu2  ;;  %v395_v4 = vadd.f32 %v394_v47, %v327_v51 }
  0xb5   : > { %v517_v54 = vadd.f32 %v497_v56, %v393_v46 }
  0xb9   : > { %v638_v55 = vpop.f32.mrf.mxu0 }
  0xbb   : > { %v561_v57 = vpop.f32.mrf.mxu3  ;;  %v397_v58 = vpop.f32.mrf.mxu1 }
  0xbc   : > { %v581_v59 = vadd.f32 %v561_v57, %v517_v54  ;;  %v499_v62 = vpop.f32.mrf.mxu2  ;;  %v398_v63 = vadd.f32 %v397_v58, %v330_v35 }
  0xbd   : > { %v518_v0 = vadd.f32 %v499_v62, %v395_v4 }
  0xbe   : > { %v658_v60 = vadd.f32 %v638_v55, %v581_v59 }
  0xc1   : > { %v640_v31 = vpop.f32.mrf.mxu0 }
  0xc3   : > { %v563_v37 = vpop.f32.mrf.mxu3  ;;  %v399_v1 = vpop.f32.mrf.mxu1 }
  0xc4   : > { %v582_v49 = vadd.f32 %v563_v37, %v518_v0  ;;  %v502_v9 = vpop.f32.mrf.mxu2  ;;  %v400_v11 = vadd.f32 %v399_v1, %v332_v42 }
  0xc5   : > { %v519_v48 = vadd.f32 %v502_v9, %v398_v63 }
  0xc6   : > { %v659_v10 = vadd.f32 %v640_v31, %v582_v49 }
  0xc9   : > { %v643_v14 = vpop.f32.mrf.mxu0 }
  0xcb   : > { %v566_v17 = vpop.f32.mrf.mxu3  ;;  %v402_v18 = vpop.f32.mrf.mxu1 }
  0xcc   : > { %v583_v12 = vadd.f32 %v566_v17, %v519_v48  ;;  %v504_v40 = vpop.f32.mrf.mxu2  ;;  %v403_v19 = vadd.f32 %v402_v18, %v335_v44 }
  0xcd   : > { %v520_v20 = vadd.f32 %v504_v40, %v400_v11  ;;  %v1224_v11 = vmov 1983009808  }
  0xce   : > { %v660_v22 = vadd.f32 %v643_v14, %v583_v12  ;;  %v913_v48 = vunpack.c.l.s4 %v1224_v11 }
  0xd1   : > { %v645_v50 = vpop.f32.mrf.mxu0 }
  0xd3   : > { %v568_v3 = vpop.f32.mrf.mxu3  ;;  %v404_v13 = vpop.f32.mrf.mxu1 }
  0xd4   : > { %v584_v23 = vadd.f32 %v568_v3, %v520_v20  ;;  %v507_v2 = vpop.f32.mrf.mxu2  ;;  %v405_v26 = vadd.f32 %v404_v13, %v337_v21 }
  0xd5   : > { %v521_v27 = vadd.f32 %v507_v2, %v403_v19 }
  0xd6   : > { %v661_v28 = vadd.f32 %v645_v50, %v584_v23 }
  0xd9   : > { %v648_v29 = vpop.f32.mrf.mxu0 }
  0xdb   : > { %v571_v30 = vpop.f32.mrf.mxu3  ;;  %v1526_v25 = vpop.f32.mrf.mxu1 }
  0xdc   : > { %v585_v5 = vadd.f32 %v571_v30, %v521_v27  ;;  %v509_v6 = vpop.f32.mrf.mxu2 }
  0xdd   : > { %v522_v33 = vadd.f32 %v509_v6, %v405_v26 }
  0xde   : > { %v1528_v8 = vadd.f32 %v648_v29, %v585_v5 }
  0xe1   : > { %v650_v7 = vpop.f32.mrf.mxu0 }
  0xe3   : > { %v573_v34 = vpop.f32.mrf.mxu3  ;;  %v1530_v35 = vpop.f32.mrf.mxu1 }
  0xe4   : > { %v586_v53 = vadd.f32 %v573_v34, %v522_v33  ;;  %v1532_v36 = vpop.f32.mrf.mxu2  ;;  %v408_v34 = vadd.f32 %v1526_v25, %v1521_v32 }
  0xe6   : > { %v1534_v38 = vadd.f32 %v650_v7, %v586_v53 }
  0xe9   : > { %v1536_v39 = vpop.f32.mrf.mxu0 }
  0xeb   : > { %v1538_v41 = vpop.f32.mrf.mxu3  ;;  %v706_v61 = vpop.f32.mrf.mxu1 }
  0xec   : > { %v1540_v42 = vpop.f32.mrf.mxu2  ;;  %v726_v51 = vadd.f32 %v706_v61, %v658_v60 }
  0xf1   : > { %v1542_v43 = vpop.f32.mrf.mxu0 }
  0xf3   : > { %v1544_v15 = vpop.f32.mrf.mxu3  ;;  %v708_v44 = vpop.f32.mrf.mxu1 }
  0xf4   : > { %v758_v16 = vpop.f32.mrf.mxu2  ;;  %v727_v59 = vadd.f32 %v708_v44, %v659_v10  ;;  %v1547_v10 = vunpack.c.0.s8 %v913_v48 }
  0xf5   : > { %v778_v56 = vadd.f32 %v758_v16, %v726_v51 }
  0xf9   : > { %v879_v45 = vpop.f32.mrf.mxu0 }
  0xfb   : > { %v823_v24 = vpop.f32.mrf.mxu3  ;;  %v711_v21 = vpop.f32.mrf.mxu1 }
  0xfc   : > { %v760_v46 = vpop.f32.mrf.mxu2  ;;  %v843_v57 = vadd.f32 %v823_v24, %v778_v56  ;;  %v728_v58 = vadd.f32 %v711_v21, %v660_v22  ;;  %v523_v21 = vadd.f32 %v1532_v36, %v408_v34 }
  0xfd   : > { %v779_v31 = vadd.f32 %v760_v46, %v727_v59 }
  0xfe   : > { %v899_v0 = vadd.f32 %v879_v45, %v843_v57  ;;  %v587_v32 = vadd.f32 %v1538_v41, %v523_v21  ;;  %v410_v57 = vadd.f32 %v1530_v35, %v1524_v52 }
 0x100   : > { %v910_v60 = vrot.slane %v899_v0, 4  ;;  %v524_v36 = vadd.f32 %v1540_v42, %v410_v57 }
 0x101   : > { %v881_v47 = vpop.f32.mrf.mxu0 }
 0x103   : > { %v825_v4 = vpop.f32.mrf.mxu3  ;;  %v713_v54 = vpop.f32.mrf.mxu1 }
 0x104   : > { %v763_v55 = vpop.f32.mrf.mxu2  ;;  %v844_v14 = vadd.f32 %v825_v4, %v779_v31  ;;  %v729_v18 = vadd.f32 %v713_v54, %v661_v28 }
 0x105   : > { %v780_v62 = vadd.f32 %v763_v55, %v728_v58 }
 0x106   : > { %v900_v22 = vadd.f32 %v881_v47, %v844_v14 }
 0x108   : > { %v922_v26 = vrot.slane %v900_v22, 4 }
 0x109   : > { %v884_v63 = vpop.f32.mrf.mxu0 }
 0x10b   : > { %v828_v37 = vpop.f32.mrf.mxu3  ;;  %v716_v9 = vpop.f32.mrf.mxu1 }
 0x10c   : > { %v845_v1 = vadd.f32 %v828_v37, %v780_v62  ;;  %v765_v49 = vpop.f32.mrf.mxu2  ;;  %v730_v25 = vadd.f32 %v716_v9, %v1528_v8  ;;  %v664_v62 = vadd.f32 %v1536_v39, %v587_v32  ;;  %v588_v37 = vadd.f32 %v1544_v15, %v524_v36 }
 0x10d   : > { %v781_v19 = vadd.f32 %v765_v49, %v729_v18  ;;  %v1225_v18 = vmov 1934713408  }
 0x10e   : > { %v901_v17 = vadd.f32 %v884_v63, %v845_v1  ;;  %v665_v35 = vadd.f32 %v1542_v43, %v588_v37 }
 0x110   : > { %v907_v12 = vrot.slane %v901_v17, 4  ;;  %v911_v40 = vsel %vm908_vm7, %v901_v17, %v910_v60 }
 0x111   : > { %v886_v20 = vpop.f32.mrf.mxu0  ;;  %v919_v2 = vperm.slane %v911_v40, %v1547_v10 }
 0x112   : > { %v909_v50 = vsel %vm908_vm7, %v907_v12, %v899_v0  ;;  %v961_v12 = vunpack.c.l.s4 %v1225_v18 }
 0x113   : > { %v830_v3 = vpop.f32.mrf.mxu3  ;;  %v718_v29 = vpop.f32.mrf.mxu1  ;;  %v915_v28 = vperm.slane %v909_v50, %v1547_v10  ;;  %v970_v6 = vrot.slane %v919_v2, 4 }
 0x114   : > { %v846_v13 = vadd.f32 %v830_v3, %v781_v19  ;;  %v768_v23 = vpop.f32.mrf.mxu2  ;;  %v731_v41 = vadd.f32 %v718_v29, %v1534_v38  ;;  %v962_v50 = vunpack.c.0.s8 %v961_v12 }
 0x115   : > { %v958_v61 = vrot.slane %v915_v28, 4  ;;  %v782_v58 = vadd.f32 %v768_v23, %v730_v25 }
 0x116   : > { %v902_v27 = vadd.f32 %v886_v20, %v846_v13 }
 0x118   : > { %v920_v30 = vrot.slane %v902_v27, 4  ;;  %v923_v5 = vsel %vm908_vm7, %v902_v27, %v922_v26 }
 0x119   : > { %v931_v33 = vperm.slane %v923_v5, %v1547_v10  ;;  %v889_v7 = vpop.f32.mrf.mxu0 }
 0x11a   : > { %v921_v53 = vsel %vm908_vm7, %v920_v30, %v900_v22 }
 0x11b   : > { %v927_v44 = vperm.slane %v921_v53, %v1547_v10  ;;  %v968_v16 = vrot.slane %v931_v33, 4  ;;  %v971_v45 = vsel %vm908_vm7, %v931_v33, %v970_v6  ;;  %v833_v24 = vpop.f32.mrf.mxu3  ;;  %v721_v54 = vpop.f32.mrf.mxu1 }
 0x11c   : > { %v770_v46 = vpop.f32.mrf.mxu2  ;;  %v847_v0 = vadd.f32 %v833_v24, %v782_v58  ;;  %v732_v31 = vadd.f32 %v721_v54, %v664_v62  ;;  %v979_v27 = vperm.slane %v971_v45, %v962_v50 }
 0x11d   : > { %v956_v51 = vrot.slane %v927_v44, 4  ;;  %v959_v47 = vsel %vm908_vm7, %v927_v44, %v958_v61  ;;  %v969_v56 = vsel %vm908_vm7, %v968_v16, %v919_v2  ;;  %v783_v49 = vadd.f32 %v770_v46, %v731_v41 }
 0x11e   : > { %v903_v8 = vadd.f32 %v889_v7, %v847_v0  ;;  %v967_v30 = vperm.slane %v959_v47, %v962_v50  ;;  %v975_v7 = vperm.slane %v969_v56, %v962_v50  ;;  %v1018_v24 = vrot.slane %v979_v27, 4 }
 0x11f   : > { %v957_v4 = vsel %vm908_vm7, %v956_v51, %v915_v28 }
 0x120   : > { %v934_v42 = vrot.slane %v903_v8, 4  ;;  %v963_v33 = vperm.slane %v957_v4, %v962_v50  ;;  %v1010_v21 = vrot.slane %v967_v30, 4  ;;  %v1014_v54 = vrot.slane %v975_v7, 4 }
 0x121   : > { %v891_v55 = vpop.f32.mrf.mxu0 }
 0x122   : > { %v1006_v25 = vrot.slane %v963_v33, 4 }
 0x123   : > { %v835_v59 = vpop.f32.mrf.mxu3  ;;  %v723_v9 = vpop.f32.mrf.mxu1 }
 0x124   : > { %v773_v63 = vpop.f32.mrf.mxu2  ;;  %v848_v14 = vadd.f32 %v835_v59, %v783_v49  ;;  %v733_v17 = vadd.f32 %v723_v9, %v665_v35 }
 0x125   : > { %v784_v1 = vadd.f32 %v773_v63, %v732_v31 }
 0x126   : > { %v904_v19 = vadd.f32 %v891_v55, %v848_v14 }
 0x128   : > { %v946_v23 = vrot.slane %v904_v19, 4 }
 0x129   : > { %v894_v11 = vpop.f32.mrf.mxu0 }
 0x12b   : > { %v838_v48 = vpop.f32.mrf.mxu3 }
 0x12c   : > { %v849_v52 = vadd.f32 %v838_v48, %v784_v1  ;;  %v775_v60 = vpop.f32.mrf.mxu2 }
 0x12d   : > { %v785_v38 = vadd.f32 %v775_v60, %v733_v17 }
 0x12e   : > { %v905_v39 = vadd.f32 %v894_v11, %v849_v52 }
 0x130   : > { %v932_v40 = vrot.slane %v905_v39, 4  ;;  %v935_v15 = vsel %vm908_vm7, %v905_v39, %v934_v42 }
 0x131   : > { %v943_v43 = vperm.slane %v935_v15, %v1547_v10  ;;  %v896_v13 = vpop.f32.mrf.mxu0 }
 0x132   : > { %v933_v20 = vsel %vm908_vm7, %v932_v40, %v903_v8 }
 0x133   : > { %v840_v22 = vpop.f32.mrf.mxu3  ;;  %v939_v26 = vperm.slane %v933_v20, %v1547_v10  ;;  %v994_v5 = vrot.slane %v943_v43, 4 }
 0x134   : > { %v850_v3 = vadd.f32 %v840_v22, %v785_v38 }
 0x135   : > { %v982_v53 = vrot.slane %v939_v26, 4 }
 0x136   : > { %v906_v2 = vadd.f32 %v896_v13, %v850_v3 }
 0x138   : > { %v944_v29 = vrot.slane %v906_v2, 4  ;;  %v947_v28 = vsel %vm908_vm7, %v906_v2, %v946_v23 }
 0x139   : > { %v955_v6 = vperm.slane %v947_v28, %v1547_v10 }
 0x13a   : > { %v945_v34 = vsel %vm908_vm7, %v944_v29, %v904_v19 }
 0x13b   : > { %v951_v61 = vperm.slane %v945_v34, %v1547_v10  ;;  %v992_v44 = vrot.slane %v955_v6, 4  ;;  %v995_v16 = vsel %vm908_vm7, %v955_v6, %v994_v5 }
 0x13c   : > { %v1003_v45 = vperm.slane %v995_v16, %v962_v50 }
 0x13d   : > { %v980_v46 = vrot.slane %v951_v61, 4  ;;  %v983_v51 = vsel %vm908_vm7, %v951_v61, %v982_v53  ;;  %v993_v47 = vsel %vm908_vm7, %v992_v44, %v943_v43 }
 0x13e   : > { %v991_v10 = vperm.slane %v983_v51, %v962_v50  ;;  %v999_v56 = vperm.slane %v993_v47, %v962_v50  ;;  %v1016_v4 = vrot.slane %v1003_v45, 4  ;;  %v1019_v32 = vsel %vm908_vm7, %v1003_v45, %v1018_v24 }
 0x13f   : > { %v981_v55 = vsel %vm908_vm7, %v980_v46, %v939_v26  ;;  %1028 = vst.msk [vmem:[%s1585_s8 + $0x38] sm:$0xff] %vm1020_vm8, %v1019_v32 }
 0x140   : > { %v987_v57 = vperm.slane %v981_v55, %v962_v50  ;;  %v1008_v58 = vrot.slane %v991_v10, 4  ;;  %v1011_v59 = vsel %vm908_vm7, %v991_v10, %v1010_v21  ;;  %v1012_v36 = vrot.slane %v999_v56, 4 }
 0x141   : > { %v1015_v62 = vsel %vm908_vm7, %v999_v56, %v1014_v54  ;;  %v1017_v63 = vsel %vm908_vm7, %v1016_v4, %v979_v27  ;;  %1024 = vst.msk [vmem:[%s1585_s8 + $0x18] sm:$0xff] %vm1020_vm8, %v1011_v59 }
 0x142   : > { %v1004_v0 = vrot.slane %v987_v57, 4  ;;  %v1007_v31 = vsel %vm908_vm7, %v987_v57, %v1006_v25  ;;  %v1009_v37 = vsel %vm908_vm7, %v1008_v58, %v967_v30  ;;  %v1013_v41 = vsel %vm908_vm7, %v1012_v36, %v975_v7  ;;  %1026 = vst.msk [vmem:[%s1585_s8 + $0x28] sm:$0xff] %vm1020_vm8, %v1015_v62 }
 0x143   : > { %1022 = vst.msk [vmem:[%s1585_s8 + $0x8] sm:$0xff] %vm1020_vm8, %v1007_v31 }
 0x144   : > { %v1005_v1 = vsel %vm908_vm7, %v1004_v0, %v963_v33  ;;  %1023 = vst.msk [vmem:[%s1585_s8 + $0x10] sm:$0xff] %vm1020_vm8, %v1009_v37 }
 0x145   : > { %1021 = vst.msk [vmem:[%s1585_s8] sm:$0xff] %vm1020_vm8, %v1005_v1 }
 0x146   : > { %1025 = vst.msk [vmem:[%s1585_s8 + $0x20] sm:$0xff] %vm1020_vm8, %v1013_v41 }
 0x147   : > { %1027 = vst.msk [vmem:[%s1585_s8 + $0x30] sm:$0xff] %vm1020_vm8, %v1017_v63 }
 0x148 PF: > { %s12_s9 = sadd.s32 1, %s1222_s9  }
 0x149   : > { %p9_p4 = scmp.ge.s32.totalorder %s12_s9, 4  }
 0x14b   :  { %11 = sbr.rel (!%p9_p4) target bundleno = 1 (0x1), region = 66 }

// kernel: parallel_attention_forward.6
= control target key start
LH: loop header
LB: loop body
LE: loop exit
PB: predicated region body
PF: predicated region fallthrough
CT: control target
= control target key end

     0   :  { %s1589_s12 = smov 0   ;;  %s2094_s0 = inlined_call_operand.vmem [shape: bf16[2,10,10,32], index: 0, kind: input, shape index: {}]   ;;  %s2095_s1 = inlined_call_operand.vmem [shape: bf16[9,32,48], index: 1, kind: input, shape index: {}]   ;;  %s2096_s2 = inlined_call_operand.vmem [shape: bf16[2,8,8,24], index: 2, kind: output, shape index: {0}]   ;;  %s2097_s3 = inlined_call_operand.vmem [shape: bf16[2,8,8,24], index: 3, kind: output, shape index: {1}]  }
   0x1 LB: > { %s1340_s13 = sadd.s32 4294967295, %s1563_s12   ;;  %p1344_p0 = scmp.ge.s32.totalorder %s1563_s12, 1  ;;  %s1563_s12 = sphi %s1589_s12, %s14_s12  }
   0x2   : > { %p140_p1 = scmp.lt.s32.totalorder %s1563_s12, 3 }
   0x4   : > { %p141_p2 = pnand %p1344_p0, %p140_p1 }
   0x5   : > { %p169_p3 = scmp.lt.s32.totalorder (!%p141_p2), %s1340_s13, 1 }
   0x6   : > { %144 = sbr.rel (%p141_p2) target bundleno = 438 (0x1b6), region = 28 }
   0xb   : > { %v1507_v0 = vld [vmem:[%s2095_s1 + $0x18] sm:$0xff]  ;;  %v1506_v1 = vld [vmem:[%s2095_s1 + $0x10] sm:$0xff]  ;;  %s2105_s13 = smov (!%p169_p3, %s1340_s13), 1  ;;  %v1509_v2 = vld [vmem:[%s2095_s1 + $0x28] sm:$0xff]  ;;  %vm209_vm0 = vsmask.f32 3328 }
   0xc   : > { %1522 = vmatpush.bf16.msra.mxu1 %v1507_v0  ;;  %1523 = vmatpush.bf16.msra.mxu2 %v1507_v0  ;;  %s1528_s18 = smul.u32 80, %s2105_s13  ;;  %v1511_v3 = vld [vmem:[%s2095_s1 + $0x38] sm:$0xff]  ;;  %v1505_v4 = vld [vmem:[%s2095_s1 + $0x8] sm:$0xff]  ;;  %vm210_vm1 = vsmask.f32 7440  ;;  %v1508_v6 = vld [vmem:[%s2095_s1 + $0x20] sm:$0xff] }
   0xd   : > { %1524 = vmatpush.bf16.msra.mxu3 %v1507_v0  ;;  %372 = vmatpush.bf16.msra.mxu0 %v1507_v0  ;;  %v1513_v5 = vld [vmem:[%s2095_s1 + $0x48] sm:$0xff]  ;;  %v1510_v7 = vld [vmem:[%s2095_s1 + $0x30] sm:$0xff]  ;;  %v1504_v11 = vld [vmem:[%s2095_s1] sm:$0xff]  ;;  %vm353_vm2 = vcmask 261120   ;;  %vm476_vm4 = vcmask 1042432   ;;  %vm477_vm5 = vcmask 1046532  }
   0xe   : > { %s1621_s29 = scalar_lea.vmem %s2094_s0, %s1528_s18  ;;  %v1512_v12 = vld [vmem:[%s2095_s1 + $0x40] sm:$0xff]  ;;  %vm1675_vm3 = vmor %vm209_vm0, %vm210_vm1  ;;  %vm1075_vm13 = vcmask 1047556   ;;  %s1502_s30 = sshll.u32 %s2105_s13, 5  ;;  %vm1195_vm14 = vcmask 191488  }
   0xf   : > { %v1630_v8 = vld [vmem:[%s1621_s29 + $0x10] sm:$0xf]  ;;  %v1633_v9 = vld [vmem:[%s1621_s29 + $0x14] sm:$0x1]  ;;  %v1636_v10 = vld [vmem:[%s1621_s29 + $0x18] sm:$0xf]  ;;  %s178_s6 = scalar_lea.vmem %s2096_s2, %s1502_s30  ;;  %s183_s9 = scalar_lea.vmem %s2097_s3, %s1502_s30 }
  0x10   : > { %1525 = vmatpush.bf16.msra.mxu1 %v1506_v1  ;;  %1526 = vmatpush.bf16.msra.mxu2 %v1506_v1  ;;  %v1645_v13 = vld [vmem:[%s1621_s29 + $0x1c] sm:$0x1]  ;;  %v241_v14 = vshrl.u32 %v1630_v8, 16  ;;  %v244_v15 = vshll.u32 %v1630_v8, 16  ;;  %v250_v16 = vshll.u32 %v1633_v9, 16  ;;  %v255_v17 = vshrl.u32 %v1636_v10, 16  ;;  %vm1748_vm6 = vmor %vm476_vm4, %vm477_vm5 }
  0x11   : > { %1527 = vmatpush.bf16.msra.mxu3 %v1506_v1  ;;  %373 = vmatpush.bf16.msra.mxu0 %v1506_v1  ;;  %v258_v18 = vshll.u32 %v1636_v10, 16  ;;  %v264_v19 = vshll.u32 %v1645_v13, 16  ;;  %v1654_v20 = vld [vmem:[%s1621_s29 + $0x20] sm:$0xf]  ;;  %v1657_v21 = vld [vmem:[%s1621_s29 + $0x24] sm:$0x1] }
  0x12   : > { %v243_v22 = vrot.slane %v241_v14, 4  ;;  %v246_v23 = vrot.slane %v244_v15, 5  ;;  %v252_v24 = vrot.slane %v250_v16, 5  ;;  %v257_v25 = vrot.slane %v255_v17, 4  ;;  %v1660_v26 = vld [vmem:[%s1621_s29 + $0x28] sm:$0xf] }
  0x13   : > { %v260_v27 = vrot.slane %v258_v18, 5  ;;  %v266_v28 = vrot.slane %v264_v19, 5  ;;  %v1663_v29 = vld [vmem:[%s1621_s29 + $0x2c] sm:$0x1]  ;;  %v269_v30 = vshrl.u32 %v1654_v20, 16  ;;  %v272_v31 = vshll.u32 %v1654_v20, 16 }
  0x14   : > { %558 = vmatpush.bf16.msrb.mxu2 %v1509_v2  ;;  %445 = vmatpush.bf16.msrb.mxu1 %v1505_v4  ;;  %v247_v32 = vor.u32 %v246_v23, %v243_v22  ;;  %v278_v33 = vshll.u32 %v1657_v21, 16  ;;  %v283_v34 = vshrl.u32 %v1660_v26, 16  ;;  %v286_v35 = vshll.u32 %v1660_v26, 16  ;;  %v1671_v36 = vld [vmem:[%s1621_s29 + $0x30] sm:$0xf]  ;;  %v1515_v16 = vld [vmem:[%s2095_s1 + $0x58] sm:$0xff] }
  0x15   : > { %630 = vmatpush.bf16.msrb.mxu3 %v1511_v3  ;;  %715 = vmatpush.bf16.msrb.mxu0 %v1513_v5  ;;  %v261_v38 = vor.u32 %v260_v27, %v257_v25  ;;  %v271_v39 = vrot.slane %v269_v30, 4  ;;  %v274_v40 = vrot.slane %v272_v31, 5  ;;  %v292_v41 = vshll.u32 %v1663_v29, 16  ;;  %v1681_v42 = vld [vmem:[%s1621_s29 + $0x34] sm:$0x1] }
  0x16   : > { %v248_v43 = vrot.slane %v247_v32, 4  ;;  %v280_v44 = vrot.slane %v278_v33, 5  ;;  %v285_v45 = vrot.slane %v283_v34, 4  ;;  %v288_v46 = vrot.slane %v286_v35, 5  ;;  %v1687_v53 = vld [vmem:[%s1621_s29 + $0x38] sm:$0xf] }
  0x17   : > { %v262_v47 = vrot.slane %v261_v38, 4  ;;  %v275_v48 = vor.u32 %v274_v40, %v271_v39  ;;  %v294_v49 = vrot.slane %v292_v41, 5  ;;  %v297_v50 = vshrl.u32 %v1671_v36, 16  ;;  %v1690_v54 = vld [vmem:[%s1621_s29 + $0x3c] sm:$0x1] }
  0x18   : > { %559 = vmatpush.bf16.msrb.mxu2 %v1508_v6  ;;  %446 = vmatpush.bf16.msrb.mxu1 %v1504_v11  ;;  %v253_v51 = vsel %vm1675_vm3, %v248_v43, %v252_v24  ;;  %v289_v52 = vor.u32 %v288_v46, %v285_v45  ;;  %v300_v55 = vshll.u32 %v1671_v36, 16  ;;  %v306_v56 = vshll.u32 %v1681_v42, 16  ;;  %v1701_v1 = vld [vmem:[%s1621_s29] sm:$0xf]  ;;  %v186_v6 = vld [vmem:[%s1621_s29 + $0x4] sm:$0x1] }
  0x19   : > { %631 = vmatpush.bf16.msrb.mxu3 %v1510_v7  ;;  %716 = vmatpush.bf16.msrb.mxu0 %v1512_v12  ;;  %v267_v57 = vsel %vm1675_vm3, %v262_v47, %v266_v28  ;;  %v1696_v58 = vunpack.c.l.b16 %v253_v51  ;;  %v276_v59 = vrot.slane %v275_v48, 4  ;;  %v299_v60 = vrot.slane %v297_v50, 4  ;;  %v1718_v15 = vld [vmem:[%s1621_s29 + $0x8] sm:$0xf]  ;;  %v188_v32 = vld [vmem:[%s1621_s29 + $0xc] sm:$0x1] }
  0x1a   : > { %v1698_v61 = vunpack.c.l.b16 %v267_v57  ;;  %v290_v62 = vrot.slane %v289_v52, 4  ;;  %v302_v63 = vrot.slane %v300_v55, 5  ;;  %v308_v0 = vrot.slane %v306_v56, 5  ;;  %v1517_v28 = vld [vmem:[%s2095_s1 + $0x68] sm:$0xff] }
  0x1b   : > { %v281_v2 = vsel %vm1675_vm3, %v276_v59, %v280_v44  ;;  %v311_v3 = vshrl.u32 %v1687_v53, 16  ;;  %v314_v4 = vshll.u32 %v1687_v53, 16  ;;  %v320_v5 = vshll.u32 %v1690_v54, 16 }
  0x1c   : > { %v1711_v7 = vpack.c.b16 %v1698_v61, %v1696_v58  ;;  %v295_v11 = vsel %vm1675_vm3, %v290_v62, %v294_v49  ;;  %v1715_v12 = vunpack.c.l.b16 %v281_v2  ;;  %v303_v14 = vor.u32 %v302_v63, %v299_v60 }
  0x1d   : > { %v1723_v17 = vunpack.c.l.b16 %v295_v11  ;;  %v313_v18 = vrot.slane %v311_v3, 4  ;;  %v316_v19 = vrot.slane %v314_v4, 5  ;;  %v322_v22 = vrot.slane %v320_v5, 5 }
  0x1e   : > { %1363 = vmatmul.msk.bf16.vlgmr.msra.gmra.mxu1 %vm353_vm2, %v1711_v7  ;;  %v304_v23 = vrot.slane %v303_v14, 4  ;;  %v213_v24 = vshrl.u32 %v1701_v1, 16  ;;  %v216_v25 = vshll.u32 %v1701_v1, 16  ;;  %v222_v27 = vshll.u32 %v186_v6, 16 }
  0x1f   : > { %v1734_v30 = vpack.c.b16 %v1723_v17, %v1715_v12  ;;  %v317_v31 = vor.u32 %v316_v19, %v313_v18  ;;  %v227_v33 = vshrl.u32 %v1718_v15, 16  ;;  %v230_v34 = vshll.u32 %v1718_v15, 16  ;;  %791 = vmatpush.bf16.msra.mxu1 %v1515_v16 }
  0x20   : > { %v309_v35 = vsel %vm1675_vm3, %v304_v23, %v308_v0  ;;  %v215_v38 = vrot.slane %v213_v24, 4  ;;  %v218_v39 = vrot.slane %v216_v25, 5  ;;  %v224_v41 = vrot.slane %v222_v27, 5  ;;  %v1519_v0 = vld [vmem:[%s2095_s1 + $0x78] sm:$0xff] }
  0x21   : > { %1364 = vmatmul.msk.bf16.vlgmr.msra.gmra.mxu2 %vm353_vm2, %v1734_v30  ;;  %v318_v40 = vrot.slane %v317_v31, 4  ;;  %v229_v43 = vrot.slane %v227_v33, 4  ;;  %v232_v44 = vrot.slane %v230_v34, 5  ;;  %v1743_v45 = vunpack.c.l.b16 %v309_v35 }
  0x22   : > { %v219_v46 = vor.u32 %v218_v39, %v215_v38  ;;  %v236_v47 = vshll.u32 %v188_v32, 16  ;;  %v481_v48 = vrot.slane %v186_v6, 5  ;;  %851 = vmatpush.bf16.msra.mxu2 %v1517_v28  ;;  %v485_v51 = vrot.slane %v188_v32, 5  ;;  %v1518_v39 = vld [vmem:[%s2095_s1 + $0x70] sm:$0xff] }
  0x23   : > { %v323_v49 = vsel %vm1675_vm3, %v318_v40, %v322_v22  ;;  %v233_v50 = vor.u32 %v232_v44, %v229_v43  ;;  %v1378_v59 = vrot.slane %v1701_v1, 9  ;;  %v403_v62 = vunpack.c.l.b16 %v1701_v1  ;;  %v1520_v40 = vld [vmem:[%s2095_s1 + $0x80] sm:$0xff] }
  0x24   : > { %v1752_v55 = vunpack.c.l.b16 %v323_v49  ;;  %v220_v56 = vrot.slane %v219_v46, 4  ;;  %v238_v57 = vrot.slane %v236_v47, 5  ;;  %v1379_v63 = vrot.slane %v1718_v15, 9 }
  0x25   : > { %v234_v60 = vrot.slane %v233_v50, 4  ;;  %v404_v4 = vunpack.c.l.b16 %v1718_v15  ;;  %v482_v5 = vsel %vm1748_vm6, %v1378_v59, %v481_v48  ;;  %v1521_v15 = vld [vmem:[%s2095_s1 + $0x88] sm:$0xff]  ;;  %v405_v24 = vunpack.c.l.b16 %v1630_v8 }
  0x26   : > { %v1762_v2 = vpack.c.b16 %v1752_v55, %v1743_v45  ;;  %v225_v3 = vsel %vm1675_vm3, %v220_v56, %v224_v41  ;;  %v1773_v11 = vsel %vm1748_vm6, %v1379_v63, %v485_v51  ;;  %v516_v16 = vunpack.c.l.b16 %v482_v5 }
  0x27   : > { %v239_v1 = vsel %vm1675_vm3, %v234_v60, %v238_v57  ;;  %v329_v6 = vunpack.c.l.b16 %v225_v3  ;;  %v517_v18 = vunpack.c.l.b16 %v1773_v11  ;;  %v411_v22 = vpack.c.b16 %v404_v4, %v403_v62  ;;  %v203_v11 = vld [vmem:[%s1621_s29 + $0x48] sm:$0xf] }
  0x28   : > { %1365 = vmatmul.msk.bf16.vlgmr.msra.gmra.mxu3 %vm353_vm2, %v1762_v2  ;;  %v330_v14 = vunpack.c.l.b16 %v239_v1  ;;  %v1380_v25 = vrot.slane %v1630_v8, 9  ;;  %v489_v27 = vrot.slane %v1633_v9, 5  ;;  %v1381_v28 = vrot.slane %v1636_v10, 9  ;;  %v1516_v9 = vld [vmem:[%s2095_s1 + $0x60] sm:$0xff] }
  0x29   : > { %924 = vmatpush.bf16.msra.mxu3 %v1519_v0  ;;  %v524_v23 = vpack.c.b16 %v517_v18, %v516_v16  ;;  %v493_v31 = vrot.slane %v1645_v13, 5  ;;  %v596_v32 = vpack.c.b16 %v405_v24, %v404_v4  ;;  %v406_v33 = vunpack.c.l.b16 %v1636_v10  ;;  %852 = vmatpush.bf16.msra.mxu2 %v1516_v9 }
  0x2a   : > { %v337_v19 = vpack.c.b16 %v330_v14, %v329_v6  ;;  %v1794_v34 = vsel %vm1748_vm6, %v1380_v25, %v489_v27  ;;  %v681_v8 = vpack.c.b16 %v1696_v58, %v330_v14  ;;  %v1514_v58 = vld [vmem:[%s2095_s1 + $0x50] sm:$0xff]  ;;  %v407_v43 = vunpack.c.l.b16 %v1654_v20 }
  0x2b   : > { %v1798_v35 = vsel %vm1748_vm6, %v1381_v28, %v493_v31  ;;  %v518_v13 = vunpack.c.l.b16 %v1794_v34  ;;  %v1807_v38 = vpack.c.b16 %v406_v33, %v405_v24  ;;  %792 = vmatpush.bf16.msra.mxu1 %v1514_v58  ;;  %v1382_v44 = vrot.slane %v1654_v20, 9 }
  0x2c   : > { %1362 = vmatmul.msk.bf16.vlgmr.msra.gmra.mxu0 %vm353_vm2, %v337_v19  ;;  %v519_v10 = vunpack.c.l.b16 %v1798_v35  ;;  %v497_v46 = vrot.slane %v1657_v21, 5  ;;  %v1383_v47 = vrot.slane %v1660_v26, 9  ;;  %v501_v48 = vrot.slane %v1663_v29, 5 }
  0x2d   : > { %988 = vmatpush.bf16.msra.mxu0 %v1521_v15  ;;  %925 = vmatpush.bf16.msra.mxu3 %v1518_v39  ;;  %v597_v49 = vpack.c.b16 %v407_v43, %v406_v33  ;;  %v408_v50 = vunpack.c.l.b16 %v1660_v26  ;;  %v682_v20 = vpack.c.b16 %v1715_v12, %v1698_v61  ;;  %v1845_v26 = vld [vmem:[%s1621_s29 + $0x40] sm:$0xf]  ;;  %v409_v60 = vunpack.c.l.b16 %v1671_v36  ;;  %v202_v15 = vld [vmem:[%s1621_s29 + $0x44] sm:$0x1] }
  0x2e   : > { %1374 = vmatmul.msk.bf16.vlgmr.msrb.gmra.mxu1 %vm353_vm2, %v411_v22  ;;  %v1823_v41 = vpack.c.b16 %v519_v10, %v518_v13  ;;  %v498_v51 = vsel %vm1748_vm6, %v1382_v44, %v497_v46  ;;  %v502_v56 = vsel %vm1748_vm6, %v1383_v47, %v501_v48  ;;  %v662_v62 = vshrl.u32 %v1845_v26, 16 }
  0x2f   : > { %v520_v57 = vunpack.c.l.b16 %v498_v51  ;;  %v521_v21 = vunpack.c.l.b16 %v502_v56  ;;  %v413_v59 = vpack.c.b16 %v408_v50, %v407_v43  ;;  %v665_v63 = vshll.u32 %v1845_v26, 16 }
  0x30   : > { %v1384_v61 = vrot.slane %v1671_v36, 9  ;;  %v505_v12 = vrot.slane %v1681_v42, 5  ;;  %v1385_v0 = vrot.slane %v1687_v53, 9  ;;  %v509_v3 = vrot.slane %v1690_v54, 5 }
  0x31   : > { %1398 = vmatmul.msk.bf16.vlgmr.msrb.gmra.mxu2 %vm353_vm2, %v524_v23  ;;  %989 = vmatpush.bf16.msra.mxu0 %v1520_v40  ;;  %v526_v29 = vpack.c.b16 %v521_v21, %v520_v57  ;;  %v598_v4 = vpack.c.b16 %v409_v60, %v408_v50  ;;  %v664_v5 = vrot.slane %v662_v62, 4  ;;  %v667_v1 = vrot.slane %v665_v63, 5 }
  0x32   : > { %v410_v6 = vunpack.c.l.b16 %v1687_v53  ;;  %v506_v14 = vsel %vm1748_vm6, %v1384_v61, %v505_v12  ;;  %v510_v16 = vsel %vm1748_vm6, %v1385_v0, %v509_v3  ;;  %v683_v36 = vpack.c.b16 %v1743_v45, %v1723_v17 }
  0x33   : > { %v522_v42 = vunpack.c.l.b16 %v506_v14  ;;  %v523_v19 = vunpack.c.l.b16 %v510_v16  ;;  %v668_v54 = vor.u32 %v667_v1, %v664_v5  ;;  %v671_v22 = vshll.u32 %v202_v15, 16 }
  0x34   : > { %v414_v23 = vpack.c.b16 %v410_v6, %v409_v60  ;;  %v595_v27 = vunpack.c.l.b16 %v1845_v26  ;;  %v758_v33 = vpack.c.b16 %v520_v57, %v519_v10  ;;  %v1434_v34 = vrot.slane %v1845_v26, 9 }
  0x35   : > { %v527_v53 = vpack.c.b16 %v523_v19, %v522_v42  ;;  %v669_v24 = vrot.slane %v668_v54, 4  ;;  %v673_v25 = vrot.slane %v671_v22, 5  ;;  %v749_v35 = vrot.slane %v202_v15, 5 }
  0x36   : > { %v599_v17 = vpack.c.b16 %v595_v27, %v410_v6  ;;  %v828_v58 = vunpack.c.l.b16 %v203_v11  ;;  %v1483_v48 = vrot.slane %v203_v11, 9 }
  0x37   : > { %v674_v28 = vsel %vm1675_vm3, %v669_v24, %v673_v25  ;;  %v750_v10 = vsel %vm1748_vm6, %v1434_v34, %v749_v35  ;;  %v1565_v34 = vmov 0  }
  0x38   : > { %1414 = vmatmul.msk.bf16.vlgmr.msrb.gmra.mxu3 %vm353_vm2, %v596_v32  ;;  %v680_v45 = vunpack.c.l.b16 %v674_v28  ;;  %v757_v32 = vpack.c.b16 %v518_v13, %v517_v18  ;;  %v883_v18 = vshrl.u32 %v203_v11, 16  ;;  %v204_v13 = vld [vmem:[%s1621_s29 + $0x4c] sm:$0x1]  ;;  %v756_v39 = vunpack.c.l.b16 %v750_v10  ;;  %s1566_s29 = smov 104  }
  0x39   : > { %v829_v46 = vpack.c.b16 %v828_v58, %v595_v27 }
  0x3a   : > { %v684_v31 = vpack.c.b16 %v680_v45, %v1752_v55  ;;  %v759_v55 = vpack.c.b16 %v522_v42, %v521_v21  ;;  %v760_v43 = vpack.c.b16 %v756_v39, %v523_v19  ;;  %v1019_v42 = vlaneseq }
  0x3c   : > { %1430 = vmatmul.msk.bf16.vlgmr.msrb.gmra.mxu0 %vm353_vm2, %v681_v8  ;;  %v885_v8 = vrot.slane %v883_v18, 4  ;;  %v1020_v19 = vand.u32 127, %v1019_v42 }
  0x3e   : > { %1375 = vmatmul.msk.bf16.gmra.mxu1 %vm353_vm2, %v1807_v38  ;;  %v1024_v22 = vand.u32 65535, %v1020_v19  ;;  %v1025_v24 = vshrl.u32 %v1020_v19, 16 }
  0x40   : > { %v1028_v25 = vmul.u32 43690, %v1024_v22  ;;  %v1027_v28 = vmul.u32 43691, %v1024_v22  ;;  %v1030_v18 = vmul.u32 43690, %v1025_v24 }
  0x41   : > { %1399 = vmatmul.msk.bf16.gmra.mxu2 %vm353_vm2, %v1823_v41 }
  0x48   : > { %1415 = vmatmul.msk.bf16.gmra.mxu3 %vm353_vm2, %v597_v49  ;;  %v958_v49 = vrot.slane %v204_v13, 5 }
  0x4c   : > { %1431 = vmatmul.msk.bf16.gmra.mxu0 %vm353_vm2, %v682_v20 }
  0x4e   : > { %1376 = vmatmul.msk.bf16.gmra.mxu1 %vm353_vm2, %v413_v59 }
  0x51   : > { %1400 = vmatmul.msk.bf16.gmra.mxu2 %vm353_vm2, %v526_v29 }
  0x58   : > { %1416 = vmatmul.msk.bf16.gmra.mxu3 %vm353_vm2, %v598_v4 }
  0x5c   : > { %1432 = vmatmul.msk.bf16.gmra.mxu0 %vm353_vm2, %v683_v36 }
  0x5e   : > { %1377 = vmatmul.msk.bf16.gmra.mxu1 %vm353_vm2, %v414_v23 }
  0x61   : > { %1401 = vmatmul.msk.bf16.gmra.mxu2 %vm353_vm2, %v527_v53 }
  0x68   : > { %1417 = vmatmul.msk.bf16.gmra.mxu3 %vm353_vm2, %v599_v17  ;;  %v1029_v17 = vmul.u32 43691, %v1025_v24 }
  0x6c   : > { %1433 = vmatmul.msk.bf16.gmra.mxu0 %vm353_vm2, %v684_v31 }
  0x6e   : > { %1447 = vmatmul.msk.bf16.vlgmr.msra.gmra.mxu1 %vm353_vm2, %v757_v32  ;;  %v1033_v32 = vshll.u32 %v1029_v17, 16 }
  0x71   : > { %1463 = vmatmul.msk.bf16.vlgmr.msra.gmra.mxu2 %vm353_vm2, %v1807_v38  ;;  %v892_v38 = vshll.u32 %v204_v13, 16 }
  0x78   : > { %1479 = vmatmul.msk.bf16.vlgmr.msra.gmra.mxu3 %vm353_vm2, %v1711_v7  ;;  %v886_v7 = vshll.u32 %v203_v11, 16 }
  0x7a   : > { %v888_v9 = vrot.slane %v886_v7, 5 }
  0x7c   : > { %1496 = vmatmul.msk.bf16.vlgmr.msra.gmra.mxu0 %vm353_vm2, %v1823_v41  ;;  %v894_v41 = vrot.slane %v892_v38, 5  ;;  %v1032_v38 = vshrl.u32 %v1028_v25, 16 }
  0x7e   : > { %1448 = vmatmul.msk.bf16.gmra.mxu1 %vm353_vm2, %v758_v33 }
  0x81   : > { %1464 = vmatmul.msk.bf16.gmra.mxu2 %vm353_vm2, %v413_v59 }
  0x88   : > { %1480 = vmatmul.msk.bf16.gmra.mxu3 %vm353_vm2, %v1734_v30  ;;  %v889_v30 = vor.u32 %v888_v9, %v885_v8 }
  0x8a   : > { %v890_v40 = vrot.slane %v889_v30, 4 }
  0x8c   : > { %1497 = vmatmul.msk.bf16.gmra.mxu0 %vm353_vm2, %v526_v29  ;;  %v895_v47 = vsel %vm1675_vm3, %v890_v40, %v894_v41  ;;  %v1034_v40 = vshrl.u32 %v1029_v17, 16 }
  0x8d   : > { %v901_v50 = vunpack.c.l.b16 %v895_v47 }
  0x8e   : > { %1449 = vmatmul.msk.bf16.gmra.mxu1 %vm353_vm2, %v759_v55 }
  0x8f   : > { %v902_v56 = vpack.c.b16 %v901_v50, %v680_v45  ;;  %v1031_v45 = vshll.u32 %v1028_v25, 16 }
  0x91   : > { %1465 = vmatmul.msk.bf16.gmra.mxu2 %vm353_vm2, %v414_v23  ;;  %vm1035_vm7 = vc.u32 %v1027_v28, %v1031_v45  ;;  %v1037_v33 = vadd.s32 %v1031_v45, %v1027_v28 }
  0x92   : > { %v1036_v35 = vsel %vm1035_vm7, 1, %v1565_v34 }
  0x93   : > { %vm1039_vm8 = vc.u32 %v1037_v33, %v1033_v32  ;;  %v1038_v8 = vadd.s32 %v1036_v35, %v1030_v18 }
  0x94   : > { %v1040_v9 = vsel %vm1039_vm8, 1, %v1565_v34 }
  0x98   : > { %1481 = vmatmul.msk.bf16.gmra.mxu3 %vm353_vm2, %v1762_v2  ;;  %v959_v2 = vsel %vm1748_vm6, %v1483_v48, %v958_v49 }
  0x99   : > { %v965_v20 = vunpack.c.l.b16 %v959_v2 }
  0x9b   : > { %v1900_v44 = vpop.f32.mrf.mxu1  ;;  %v966_v37 = vpack.c.b16 %v965_v20, %v756_v39  ;;  %v1042_v39 = vadd.s32 %v1040_v9, %v1038_v8 }
  0x9c   : > { %1498 = vmatmul.msk.bf16.gmra.mxu0 %vm353_vm2, %v527_v53 }
  0x9d   : > { %v1043_v41 = vadd.s32 %v1042_v39, %v1032_v38 }
  0x9e   : > { %1450 = vmatmul.msk.bf16.gmra.mxu1 %vm353_vm2, %v760_v43 }
  0x9f   : > { %v1044_v49 = vadd.s32 %v1043_v41, %v1034_v40 }
  0xa1   : > { %1466 = vmatmul.msk.bf16.gmra.mxu2 %vm353_vm2, %v829_v46 }
  0xa3   : > { %v1909_v51 = vpop.f32.mrf.mxu1 }
  0xa4   : > { %v1911_v57 = vpop.f32.mrf.mxu2 }
  0xa8   : > { %1482 = vmatmul.msk.bf16.gmra.mxu3 %vm353_vm2, %v902_v56  ;;  %v1045_v56 = vshrl.u32 %v1044_v49, 4 }
  0xa9   : > { %v375_v21 = vpop.f32.mrf.mxu0 }
  0xaa   : > { %v1046_v25 = vmul.u32 24, %v1045_v56 }
  0xab   : > { %v1914_v59 = vpop.f32.mrf.mxu3  ;;  %v448_v29 = vpop.f32.mrf.mxu1 }
  0xac   : > { %1499 = vmatmul.msk.bf16.gmra.mxu0 %vm353_vm2, %v966_v37  ;;  %v1917_v26 = vpop.f32.mrf.mxu2  ;;  %v449_v46 = vadd.f32 %v448_v29, %v375_v21  ;;  %v1047_v29 = vsub.s32 %v1020_v19, %v1046_v25 }
  0xae   : > { %vm1050_vm9 = vcmp.ne.s32.totalorder %v1047_v29, 0  ;;  %vm1051_vm10 = vcmp.lt.s32.totalorder %v1047_v29, 0 }
  0xaf   : > { %vm1052_vm11 = vmand %vm1051_vm10, %vm1050_vm9 }
  0xb1   : > { %v377_v60 = vpop.f32.mrf.mxu0 }
  0xb3   : > { %v1919_v52 = vpop.f32.mrf.mxu3  ;;  %v450_v62 = vpop.f32.mrf.mxu1 }
  0xb4   : > { %v561_v63 = vpop.f32.mrf.mxu2  ;;  %v451_v42 = vadd.f32 %v450_v62, %v377_v60 }
  0xb5   : > { %v581_v50 = vadd.f32 %v561_v63, %v449_v46 }
  0xb9   : > { %v718_v61 = vpop.f32.mrf.mxu0 }
  0xbb   : > { %v633_v12 = vpop.f32.mrf.mxu3  ;;  %v1921_v0 = vpop.f32.mrf.mxu1 }
  0xbc   : > { %v563_v3 = vpop.f32.mrf.mxu2  ;;  %v653_v20 = vadd.f32 %v633_v12, %v581_v50  ;;  %v454_v63 = vadd.f32 %v1921_v0, %v1900_v44 }
  0xbd   : > { %v582_v28 = vadd.f32 %v563_v3, %v451_v42 }
  0xbe   : > { %v738_v17 = vadd.f32 %v718_v61, %v653_v20  ;;  %v1053_v61 = vadd.s32 24, %v1047_v29 }
  0xc0   : > { %v1054_v44 = vsel %vm1052_vm11, %v1053_v61, %v1047_v29 }
  0xc1   : > { %v1923_v4 = vpop.f32.mrf.mxu0  ;;  %vm1980_vm12 = vcmp.lt.s32.totalorder %v1054_v44, 8 }
  0xc3   : > { %v635_v5 = vpop.f32.mrf.mxu3  ;;  %v1925_v1 = vpop.f32.mrf.mxu1 }
  0xc4   : > { %v1927_v6 = vpop.f32.mrf.mxu2  ;;  %v654_v32 = vadd.f32 %v635_v5, %v582_v28  ;;  %v456_v0 = vadd.f32 %v1925_v1, %v1909_v51 }
  0xc5   : > { %v583_v60 = vadd.f32 %v1927_v6, %v454_v63 }
  0xc6   : > { %v739_v35 = vadd.f32 %v1923_v4, %v654_v32 }
  0xc9   : > { %v1929_v14 = vpop.f32.mrf.mxu0 }
  0xcb   : > { %v1931_v16 = vpop.f32.mrf.mxu3  ;;  %v1933_v15 = vpop.f32.mrf.mxu1 }
  0xcc   : > { %v1935_v36 = vpop.f32.mrf.mxu2  ;;  %v655_v5 = vadd.f32 %v1931_v16, %v583_v60 }
  0xcd   : > { %v584_v6 = vadd.f32 %v1935_v36, %v456_v0  ;;  %v459_v36 = vadd.f32 %v1933_v15, %v1911_v57 }
  0xce   : > { %v740_v4 = vadd.f32 %v1929_v14, %v655_v5 }
  0xd1   : > { %v1937_v54 = vpop.f32.mrf.mxu0 }
  0xd3   : > { %v1939_v23 = vpop.f32.mrf.mxu3  ;;  %v1941_v53 = vpop.f32.mrf.mxu1 }
  0xd4   : > { %v1943_v27 = vpop.f32.mrf.mxu2  ;;  %v656_v51 = vadd.f32 %v1939_v23, %v584_v6 }
  0xd5   : > { %v585_v42 = vadd.f32 %v1943_v27, %v459_v36  ;;  %v461_v27 = vadd.f32 %v1941_v53, %v1917_v26 }
  0xd6   : > { %v741_v28 = vadd.f32 %v1937_v54, %v656_v51 }
  0xd9   : > { %v1945_v31 = vpop.f32.mrf.mxu0 }
  0xdb   : > { %v1947_v55 = vpop.f32.mrf.mxu3  ;;  %v1949_v11 = vpop.f32.mrf.mxu1 }
  0xdc   : > { %v1951_v7 = vpop.f32.mrf.mxu2  ;;  %v657_v32 = vadd.f32 %v1947_v55, %v585_v42 }
  0xdd   : > { %v586_v54 = vadd.f32 %v1951_v7, %v461_v27 }
  0xe1   : > { %v1953_v13 = vpop.f32.mrf.mxu0 }
  0xe3   : > { %v1955_v10 = vpop.f32.mrf.mxu3  ;;  %v1957_v30 = vpop.f32.mrf.mxu1 }
  0xe4   : > { %v1959_v58 = vpop.f32.mrf.mxu2  ;;  %v658_v26 = vadd.f32 %v1955_v10, %v586_v54 }
  0xe6   : > { %v743_v6 = vadd.f32 %v1953_v13, %v658_v26 }
  0xe9   : > { %v1961_v43 = vpop.f32.mrf.mxu0 }
  0xeb   : > { %v1963_v47 = vpop.f32.mrf.mxu3  ;;  %v794_v48 = vpop.f32.mrf.mxu1 }
  0xec   : > { %v1965_v2 = vpop.f32.mrf.mxu2  ;;  %v814_v21 = vadd.f32 %v794_v48, %v738_v17 }
  0xf1   : > { %v1967_v37 = vpop.f32.mrf.mxu0 }
  0xf3   : > { %v1969_v22 = vpop.f32.mrf.mxu3  ;;  %v796_v24 = vpop.f32.mrf.mxu1 }
  0xf4   : > { %v854_v45 = vpop.f32.mrf.mxu2  ;;  %v815_v9 = vadd.f32 %v796_v24, %v739_v35 }
  0xf5   : > { %v874_v33 = vadd.f32 %v854_v45, %v814_v21 }
  0xf9   : > { %v991_v18 = vpop.f32.mrf.mxu0 }
  0xfb   : > { %v927_v34 = vpop.f32.mrf.mxu3  ;;  %v799_v12 = vpop.f32.mrf.mxu1 }
  0xfc   : > { %v947_v62 = vadd.f32 %v927_v34, %v874_v33  ;;  %v856_v3 = vpop.f32.mrf.mxu2  ;;  %v816_v50 = vadd.f32 %v799_v12, %v740_v4  ;;  %v742_v34 = vadd.f32 %v1945_v31, %v657_v32 }
  0xfd   : > { %v875_v19 = vadd.f32 %v856_v3, %v815_v9 }
  0xfe   : > { %v1011_v8 = vadd.f32 %v991_v18, %v947_v62  ;;  %v1567_v62 = vmov 1983009808  }
  0xff   : > { %v1080_v35 = vunpack.c.l.s4 %v1567_v62 }
 0x100   : > { %1541 = vtanh.f32 %v1011_v8 }
 0x101   : > { %v993_v38 = vpop.f32.mrf.mxu0  ;;  %v2006_v0 = vunpack.c.0.s8 %v1080_v35 }
 0x103   : > { %v929_v39 = vpop.f32.mrf.mxu3  ;;  %v801_v40 = vpop.f32.mrf.mxu1 }
 0x104   : > { %v948_v41 = vadd.f32 %v929_v39, %v875_v19  ;;  %v859_v46 = vpop.f32.mrf.mxu2  ;;  %v817_v29 = vadd.f32 %v801_v40, %v741_v28 }
 0x105   : > { %v876_v1 = vadd.f32 %v859_v46, %v816_v50 }
 0x106   : > { %v1542_v16 = vpop.eup %1541  ;;  %v1012_v49 = vadd.f32 %v993_v38, %v948_v41  ;;  %v464_v38 = vadd.f32 %v1949_v11, %v1914_v59 }
 0x107   : > { %v1066_v56 = vsel %vm1980_vm12, %v1542_v16, %v1011_v8 }
 0x108   : > { %1543 = vtanh.f32 %v1012_v49  ;;  %v1204_v20 = vpack.c.bf16 %v1066_v56, %v1066_v56  ;;  %v1077_v61 = vrot.slane %v1066_v56, 4  ;;  %v587_v10 = vadd.f32 %v1959_v58, %v464_v38 }
 0x109   : > { %v996_v14 = vpop.f32.mrf.mxu0 }
 0x10a   : > { %1220 = vrot.lane.b32.xlu0 %v1204_v20, %s1566_s29  ;;  %v659_v11 = vadd.f32 %v1963_v47, %v587_v10  ;;  %v1568_v10 = vmov 1934713408  }
 0x10b   : > { %v932_v24 = vpop.f32.mrf.mxu3  ;;  %v804_v45 = vpop.f32.mrf.mxu1 }
 0x10c   : > { %v949_v25 = vadd.f32 %v932_v24, %v876_v1  ;;  %v861_v17 = vpop.f32.mrf.mxu2  ;;  %v818_v55 = vadd.f32 %v804_v45, %v742_v34 }
 0x10d   : > { %v877_v15 = vadd.f32 %v861_v17, %v817_v29 }
 0x10e   : > { %v1544_v21 = vpop.eup %1543  ;;  %v1013_v23 = vadd.f32 %v996_v14, %v949_v25  ;;  %v466_v25 = vadd.f32 %v1957_v30, %v1919_v52 }
 0x10f   : > { %v1067_v57 = vsel %vm1980_vm12, %v1544_v21, %v1012_v49 }
 0x110   : > { %1545 = vtanh.f32 %v1013_v23  ;;  %v1205_v33 = vpack.c.bf16 %v1067_v57, %v1067_v57  ;;  %v1089_v50 = vrot.slane %v1067_v57, 4  ;;  %v588_v29 = vadd.f32 %v1965_v2, %v466_v25 }
 0x111   : > { %v998_v18 = vpop.f32.mrf.mxu0 }
 0x112   : > { %1222 = vrot.lane.b32.xlu0 %v1205_v33, %s1566_s29 }
 0x113   : > { %v934_v63 = vpop.f32.mrf.mxu3  ;;  %v806_v9 = vpop.f32.mrf.mxu1 }
 0x114   : > { %v950_v12 = vadd.f32 %v934_v63, %v877_v15  ;;  %v864_v60 = vpop.f32.mrf.mxu2  ;;  %v819_v16 = vadd.f32 %v806_v9, %v743_v6  ;;  %v744_v15 = vadd.f32 %v1961_v43, %v659_v11 }
 0x115   : > { %v878_v53 = vadd.f32 %v864_v60, %v818_v55 }
 0x116   : > { %v1546_v3 = vpop.eup %1545  ;;  %v1014_v8 = vadd.f32 %v998_v18, %v950_v12  ;;  %v660_v12 = vadd.f32 %v1969_v22, %v588_v29 }
 0x117   : > { %v1068_v5 = vsel %vm1980_vm12, %v1546_v3, %v1013_v23 }
 0x118   : > { %1547 = vtanh.f32 %v1014_v8  ;;  %v1206_v7 = vpack.c.bf16 %v1068_v5, %v1068_v5  ;;  %v1074_v19 = vrot.slane %v1068_v5, 4  ;;  %v1078_v31 = vsel %vm1075_vm13, %v1068_v5, %v1077_v61 }
 0x119   : > { %v1001_v44 = vpop.f32.mrf.mxu0  ;;  %v1086_v46 = vperm.slane %v1078_v31, %v2006_v0  ;;  %v745_v3 = vadd.f32 %v1967_v37, %v660_v12  ;;  %v1128_v37 = vunpack.c.l.s4 %v1568_v10 }
 0x11a   : > { %1224 = vrot.lane.b32.xlu1 %v1206_v7, %s1566_s29  ;;  %v1076_v39 = vsel %vm1075_vm13, %v1074_v19, %v1066_v56 }
 0x11b   : > { %v937_v40 = vpop.f32.mrf.mxu3  ;;  %v1082_v51 = vperm.slane %v1076_v39, %v2006_v0  ;;  %v809_v36 = vpop.f32.mrf.mxu1  ;;  %v1137_v14 = vrot.slane %v1086_v46, 4 }
 0x11c   : > { %v951_v41 = vadd.f32 %v937_v40, %v878_v53  ;;  %v866_v4 = vpop.f32.mrf.mxu2  ;;  %v820_v54 = vadd.f32 %v809_v36, %v744_v15 }
 0x11d   : > { %v879_v1 = vadd.f32 %v866_v4, %v819_v16  ;;  %v1125_v28 = vrot.slane %v1082_v51, 4  ;;  %v1129_v16 = vunpack.c.0.s8 %v1128_v37 }
 0x11e   : > { %v1548_v49 = vpop.eup %1547  ;;  %v1015_v59 = vadd.f32 %v1001_v44, %v951_v41 }
 0x11f   : > { %v1069_v56 = vsel %vm1980_vm12, %v1548_v49, %v1014_v8 }
 0x120   : > { %1549 = vtanh.f32 %v1015_v59  ;;  %v1207_v58 = vpack.c.bf16 %v1069_v56, %v1069_v56  ;;  %v1087_v20 = vrot.slane %v1069_v56, 4  ;;  %v1090_v13 = vsel %vm1075_vm13, %v1069_v56, %v1089_v50 }
 0x121   : > { %v1003_v42 = vpop.f32.mrf.mxu0  ;;  %v1098_v24 = vperm.slane %v1090_v13, %v2006_v0 }
 0x122   : > { %1226 = vrot.lane.b32.xlu1 %v1207_v58, %s1566_s29  ;;  %v1088_v47 = vsel %vm1075_vm13, %v1087_v20, %v1067_v57 }
 0x123   : > { %v939_v17 = vpop.f32.mrf.mxu3  ;;  %v1094_v45 = vperm.slane %v1088_v47, %v2006_v0  ;;  %v1135_v21 = vrot.slane %v1098_v24, 4  ;;  %v1138_v23 = vsel %vm1075_vm13, %v1098_v24, %v1137_v14  ;;  %v811_v43 = vpop.f32.mrf.mxu1 }
 0x124   : > { %v952_v32 = vadd.f32 %v939_v17, %v879_v1  ;;  %v869_v33 = vpop.f32.mrf.mxu2  ;;  %v821_v26 = vadd.f32 %v811_v43, %v745_v3  ;;  %v1146_v11 = vperm.slane %v1138_v23, %v1129_v16 }
 0x125   : > { %v1123_v27 = vrot.slane %v1094_v45, 4  ;;  %v1126_v52 = vsel %vm1075_vm13, %v1094_v45, %v1125_v28  ;;  %v1136_v30 = vsel %vm1075_vm13, %v1135_v21, %v1086_v46  ;;  %v880_v2 = vadd.f32 %v869_v33, %v820_v54 }
 0x126   : > { %v1550_v18 = vpop.eup %1549  ;;  %v1016_v57 = vadd.f32 %v1003_v42, %v952_v32  ;;  %v1134_v56 = vperm.slane %v1126_v52, %v1129_v16  ;;  %v1142_v24 = vperm.slane %v1136_v30, %v1129_v16  ;;  %v1185_v21 = vrot.slane %v1146_v11, 4 }
 0x127   : > { %v1124_v63 = vsel %vm1075_vm13, %v1123_v27, %v1082_v51  ;;  %v1070_v34 = vsel %vm1980_vm12, %v1550_v18, %v1015_v59 }
 0x128   : > { %1551 = vtanh.f32 %v1016_v57  ;;  %v1208_v60 = vpack.c.bf16 %v1070_v34, %v1070_v34  ;;  %v1101_v44 = vrot.slane %v1070_v34, 4  ;;  %v1130_v42 = vperm.slane %v1124_v63, %v1129_v16 }
 0x129   : > { %v1006_v55 = vpop.f32.mrf.mxu0  ;;  %v1177_v45 = vrot.slane %v1134_v56, 4  ;;  %v1181_v18 = vrot.slane %v1142_v24, 4 }
 0x12a   : > { %1228 = vrot.lane.b32.xlu2 %v1208_v60, %s1566_s29 }
 0x12b   : > { %v942_v62 = vpop.f32.mrf.mxu3 }
 0x12c   : > { %v953_v35 = vadd.f32 %v942_v62, %v880_v2  ;;  %v871_v61 = vpop.f32.mrf.mxu2 }
 0x12d   : > { %v881_v22 = vadd.f32 %v871_v61, %v821_v26 }
 0x12e   : > { %v1552_v8 = vpop.eup %1551  ;;  %v1017_v9 = vadd.f32 %v1006_v55, %v953_v35 }
 0x12f   : > { %v1071_v53 = vsel %vm1980_vm12, %v1552_v8, %v1016_v57 }
 0x130   : > { %1553 = vtanh.f32 %v1017_v9  ;;  %v1209_v5 = vpack.c.bf16 %v1071_v53, %v1071_v53  ;;  %v1113_v59 = vrot.slane %v1071_v53, 4 }
 0x131   : > { %v1008_v31 = vpop.f32.mrf.mxu0 }
 0x132   : > { %1230 = vrot.lane.b32.xlu2 %v1209_v5, %s1566_s29 }
 0x133   : > { %v944_v7 = vpop.f32.mrf.mxu3 }
 0x134   : > { %v954_v19 = vadd.f32 %v944_v7, %v881_v22 }
 0x136   : > { %v1554_v38 = vpop.eup %1553  ;;  %v1018_v39 = vadd.f32 %v1008_v31, %v954_v19 }
 0x137   : > { %v1072_v40 = vsel %vm1980_vm12, %v1554_v38, %v1017_v9 }
 0x138   : > { %v1099_v6 = vrot.slane %v1072_v40, 4  ;;  %v1102_v41 = vsel %vm1075_vm13, %v1072_v40, %v1101_v44  ;;  %1555 = vtanh.f32 %v1018_v39  ;;  %v1210_v4 = vpack.c.bf16 %v1072_v40, %v1072_v40 }
 0x139   : > { %v1110_v49 = vperm.slane %v1102_v41, %v2006_v0 }
 0x13a   : > { %v1100_v46 = vsel %vm1075_vm13, %v1099_v6, %v1070_v34  ;;  %1232 = vrot.lane.b32.xlu0 %v1210_v4, %s1566_s29 }
 0x13b   : > { %v1106_v51 = vperm.slane %v1100_v46, %v2006_v0  ;;  %v1161_v36 = vrot.slane %v1110_v49, 4 }
 0x13d   : > { %v1149_v47 = vrot.slane %v1106_v51, 4 }
 0x13e   : > { %v1556_v50 = vpop.eup %1555 }
 0x13f   : > { %v1073_v1 = vsel %vm1980_vm12, %v1556_v50, %v1018_v39 }
 0x140   : > { %v1211_v58 = vpack.c.bf16 %v1073_v1, %v1073_v1  ;;  %v1111_v20 = vrot.slane %v1073_v1, 4  ;;  %v1114_v13 = vsel %vm1075_vm13, %v1073_v1, %v1113_v59 }
 0x141   : > { %v1122_v14 = vperm.slane %v1114_v13, %v2006_v0 }
 0x142   : > { %1234 = vrot.lane.b32.xlu1 %v1211_v58, %s1566_s29  ;;  %v1112_v25 = vsel %vm1075_vm13, %v1111_v20, %v1071_v53 }
 0x143   : > { %v1118_v48 = vperm.slane %v1112_v25, %v2006_v0  ;;  %v1159_v28 = vrot.slane %v1122_v14, 4  ;;  %v1162_v17 = vsel %vm1075_vm13, %v1122_v14, %v1161_v36  ;;  %v1173_v0 = vrot.slane %v1130_v42, 4 }
 0x144   : > { %v1170_v23 = vperm.slane %v1162_v17, %v1129_v16 }
 0x145   : > { %v1147_v29 = vrot.slane %v1118_v48, 4  ;;  %v1150_v32 = vsel %vm1075_vm13, %v1118_v48, %v1149_v47  ;;  %v1160_v15 = vsel %vm1075_vm13, %v1159_v28, %v1110_v49 }
 0x146   : > { %v1158_v33 = vperm.slane %v1150_v32, %v1129_v16  ;;  %v1166_v27 = vperm.slane %v1160_v15, %v1129_v16  ;;  %v1183_v52 = vrot.slane %v1170_v23, 4  ;;  %v1186_v30 = vsel %vm1075_vm13, %v1170_v23, %v1185_v21 }
 0x147   : > { %v1148_v57 = vsel %vm1075_vm13, %v1147_v29, %v1106_v51  ;;  %v1194_v54 = vpack.c.bf16 %v1186_v30, %v1186_v30 }
 0x148   : > { %v1154_v63 = vperm.slane %v1148_v57, %v1129_v16  ;;  %v1175_v34 = vrot.slane %v1158_v33, 4  ;;  %v1178_v12 = vsel %vm1075_vm13, %v1158_v33, %v1177_v45  ;;  %v1179_v2 = vrot.slane %v1166_v27, 4 }
 0x149   : > { %v1182_v60 = vsel %vm1075_vm13, %v1166_v27, %v1181_v18  ;;  %v1184_v43 = vsel %vm1075_vm13, %v1183_v52, %v1146_v11  ;;  %v1190_v55 = vpack.c.bf16 %v1178_v12, %v1178_v12  ;;  %1203 = vst.msk [vmem:[%s178_s6 + $0x1c] sm:$0xf] %vm1195_vm14, %v1194_v54 }
 0x14a   : > { %v1171_v62 = vrot.slane %v1154_v63, 4  ;;  %v1174_v35 = vsel %vm1075_vm13, %v1154_v63, %v1173_v0  ;;  %v1176_v3 = vsel %vm1075_vm13, %v1175_v34, %v1134_v56  ;;  %v1180_v61 = vsel %vm1075_vm13, %v1179_v2, %v1142_v24 }
 0x14b   : > { %v1188_v8 = vpack.c.bf16 %v1174_v35, %v1174_v35  ;;  %v1189_v9 = vpack.c.bf16 %v1176_v3, %v1176_v3  ;;  %1199 = vst.msk [vmem:[%s178_s6 + $0xc] sm:$0xf] %vm1195_vm14, %v1190_v55  ;;  %v1191_v53 = vpack.c.bf16 %v1180_v61, %v1180_v61  ;;  %v1192_v5 = vpack.c.bf16 %v1182_v60, %v1182_v60 }
 0x14c   : > { %v1172_v26 = vsel %vm1075_vm13, %v1171_v62, %v1130_v42  ;;  %v1193_v7 = vpack.c.bf16 %v1184_v43, %v1184_v43 }
 0x14d   : > { %v1187_v22 = vpack.c.bf16 %v1172_v26, %v1172_v26  ;;  %1197 = vst.msk [vmem:[%s178_s6 + $0x4] sm:$0xf] %vm1195_vm14, %v1188_v8 }
 0x14e   : > { %1198 = vst.msk [vmem:[%s178_s6 + $0x8] sm:$0xf] %vm1195_vm14, %v1189_v9 }
 0x14f   : > { %1196 = vst.msk [vmem:[%s178_s6] sm:$0xf] %vm1195_vm14, %v1187_v22 }
 0x150   : > { %1200 = vst.msk [vmem:[%s178_s6 + $0x10] sm:$0xf] %vm1195_vm14, %v1191_v53 }
 0x151   : > { %1201 = vst.msk [vmem:[%s178_s6 + $0x14] sm:$0xf] %vm1195_vm14, %v1192_v5 }
 0x152   : > { %1202 = vst.msk [vmem:[%s178_s6 + $0x18] sm:$0xf] %vm1195_vm14, %v1193_v7 }
 0x17c   : > { %v1221_v19 = vpop.permute.xlu0 %1220 }
 0x17d   : > { %1244 = vst.msk [vmem:[%s183_s9] sm:$0xf] %vm1195_vm14, %v1221_v19 }
 0x184   : > { %v1223_v31 = vpop.permute.xlu0 %1222  ;;  %v1229_v38 = vpop.permute.xlu2 %1228 }
 0x185   : > { %1245 = vst.msk [vmem:[%s183_s9 + $0x4] sm:$0xf] %vm1195_vm14, %v1223_v31 }
 0x186   : > { %1248 = vst.msk [vmem:[%s183_s9 + $0x10] sm:$0xf] %vm1195_vm14, %v1229_v38 }
 0x18c   : > { %v1225_v44 = vpop.permute.xlu1 %1224  ;;  %v1231_v39 = vpop.permute.xlu2 %1230 }
 0x18d   : > { %1246 = vst.msk [vmem:[%s183_s9 + $0x8] sm:$0xf] %vm1195_vm14, %v1225_v44 }
 0x18e   : > { %1249 = vst.msk [vmem:[%s183_s9 + $0x14] sm:$0xf] %vm1195_vm14, %v1231_v39 }
 0x194   : > { %v1227_v10 = vpop.permute.xlu1 %1226 }
 0x195   : > { %1247 = vst.msk [vmem:[%s183_s9 + $0xc] sm:$0xf] %vm1195_vm14, %v1227_v10 }
 0x1ac   : > { %v1233_v37 = vpop.permute.xlu0 %1232 }
 0x1ad   : > { %1250 = vst.msk [vmem:[%s183_s9 + $0x18] sm:$0xf] %vm1195_vm14, %v1233_v37 }
 0x1b4   : > { %v1235_v40 = vpop.permute.xlu1 %1234 }
 0x1b5   : > { %1251 = vst.msk [vmem:[%s183_s9 + $0x1c] sm:$0xf] %vm1195_vm14, %v1235_v40 }
 0x1b6 PF: > { %s14_s12 = sadd.s32 1, %s1563_s12  }
 0x1b7   : > { %p11_p4 = scmp.ge.s32.totalorder %s14_s12, 4  }
 0x1b9   :  { %13 = sbr.rel (!%p11_p4) target bundleno = 1 (0x1), region = 78 }

// kernel: parallel_attention_forward.10
= control target key start
LH: loop header
LB: loop body
LE: loop exit
PB: predicated region body
PF: predicated region fallthrough
CT: control target
= control target key end

     0   :  { %s1124_s9 = smov 0   ;;  %s1493_s0 = inlined_call_operand.vmem [shape: bf16[2,10,10,16], index: 0, kind: input, shape index: {}]   ;;  %s1494_s1 = inlined_call_operand.vmem [shape: bf16[9,16,32], index: 1, kind: input, shape index: {}]   ;;  %s1495_s2 = inlined_call_operand.vmem [shape: f32[2,64,32], index: 2, kind: output, shape index: {}]  }
   0x1 LB: > { %s971_s10 = sadd.s32 4294967295, %s1107_s9   ;;  %p975_p0 = scmp.ge.s32.totalorder %s1107_s9, 1  ;;  %s1107_s9 = sphi %s1124_s9, %s12_s9  }
   0x2   : > { %p112_p1 = scmp.lt.s32.totalorder %s1107_s9, 3 }
   0x4   : > { %p113_p2 = pnand %p975_p0, %p112_p1 }
   0x5   : > { %p134_p3 = scmp.lt.s32.totalorder (!%p113_p2), %s971_s10, 1 }
   0x6   : > { %116 = sbr.rel (%p113_p2) target bundleno = 313 (0x139), region = 28 }
   0xb   : > { %v1081_v0 = vld [vmem:[%s1494_s1 + $0x8] sm:$0xff]  ;;  %v1082_v1 = vld [vmem:[%s1494_s1 + $0x10] sm:$0xff]  ;;  %s1501_s10 = smov (!%p134_p3, %s971_s10), 1  ;;  %v1083_v2 = vld [vmem:[%s1494_s1 + $0x18] sm:$0xff]  ;;  %vm167_vm0 = vsmask.f32 3328 }
   0xc   : > { %1089 = vmatpush.bf16.msra.mxu1 %v1081_v0  ;;  %1090 = vmatpush.bf16.msra.mxu2 %v1081_v0  ;;  %s1092_s15 = smul.u32 80, %s1501_s10  ;;  %v1080_v3 = vld [vmem:[%s1494_s1] sm:$0xff]  ;;  %vm168_vm1 = vsmask.f32 7440  ;;  %vm303_vm2 = vcmask 130048   ;;  %vm420_vm4 = vcmask 1042432  }
   0xd   : > { %1091 = vmatpush.bf16.msra.mxu3 %v1081_v0  ;;  %323 = vmatpush.bf16.msra.mxu0 %v1081_v0  ;;  %v1084_v4 = vld [vmem:[%s1494_s1 + $0x20] sm:$0xff]  ;;  %vm1195_vm3 = vmor %vm167_vm0, %vm168_vm1  ;;  %vm421_vm5 = vcmask 1046532   ;;  %s1079_s5 = sshll.u32 %s1501_s10, 6  ;;  %vm907_vm7 = vcmask 261120  }
   0xe   : > { %s1153_s24 = scalar_lea.vmem %s1493_s0, %s1092_s15  ;;  %vm1268_vm6 = vmor %vm420_vm4, %vm421_vm5  ;;  %s1452_s8 = scalar_lea.vmem %s1495_s2, %s1079_s5 }
   0xf   : > { %v1156_v5 = vld [vmem:[%s1153_s24 + $0x10] sm:$0xf]  ;;  %v1159_v6 = vld [vmem:[%s1153_s24 + $0x14] sm:$0x1]  ;;  %v1162_v7 = vld [vmem:[%s1153_s24 + $0x18] sm:$0xf] }
  0x10   : > { %495 = vmatpush.bf16.msrb.mxu2 %v1082_v1  ;;  %390 = vmatpush.bf16.msrb.mxu1 %v1080_v3  ;;  %v1165_v8 = vld [vmem:[%s1153_s24 + $0x1c] sm:$0x1]  ;;  %v199_v9 = vshrl.u32 %v1156_v5, 16  ;;  %v202_v10 = vshll.u32 %v1156_v5, 16  ;;  %v208_v11 = vshll.u32 %v1159_v6, 16  ;;  %v213_v12 = vshrl.u32 %v1162_v7, 16 }
  0x11   : > { %559 = vmatpush.bf16.msrb.mxu3 %v1083_v2  ;;  %636 = vmatpush.bf16.msrb.mxu0 %v1084_v4  ;;  %v216_v13 = vshll.u32 %v1162_v7, 16  ;;  %v222_v14 = vshll.u32 %v1165_v8, 16  ;;  %v1174_v15 = vld [vmem:[%s1153_s24 + $0x20] sm:$0xf]  ;;  %v1177_v16 = vld [vmem:[%s1153_s24 + $0x24] sm:$0x1] }
  0x12   : > { %v201_v17 = vrot.slane %v199_v9, 4  ;;  %v204_v18 = vrot.slane %v202_v10, 5  ;;  %v210_v19 = vrot.slane %v208_v11, 5  ;;  %v215_v20 = vrot.slane %v213_v12, 4  ;;  %v1180_v21 = vld [vmem:[%s1153_s24 + $0x28] sm:$0xf] }
  0x13   : > { %v218_v22 = vrot.slane %v216_v13, 5  ;;  %v224_v23 = vrot.slane %v222_v14, 5  ;;  %v1183_v24 = vld [vmem:[%s1153_s24 + $0x2c] sm:$0x1]  ;;  %v227_v25 = vshrl.u32 %v1174_v15, 16  ;;  %v230_v26 = vshll.u32 %v1174_v15, 16 }
  0x14   : > { %v205_v27 = vor.u32 %v204_v18, %v201_v17  ;;  %v236_v28 = vshll.u32 %v1177_v16, 16  ;;  %v241_v29 = vshrl.u32 %v1180_v21, 16  ;;  %v244_v30 = vshll.u32 %v1180_v21, 16  ;;  %v1191_v31 = vld [vmem:[%s1153_s24 + $0x30] sm:$0xf]  ;;  %v1085_v11 = vld [vmem:[%s1494_s1 + $0x28] sm:$0xff] }
  0x15   : > { %v219_v33 = vor.u32 %v218_v22, %v215_v20  ;;  %v229_v34 = vrot.slane %v227_v25, 4  ;;  %v232_v35 = vrot.slane %v230_v26, 5  ;;  %v250_v36 = vshll.u32 %v1183_v24, 16  ;;  %v1201_v37 = vld [vmem:[%s1153_s24 + $0x34] sm:$0x1] }
  0x16   : > { %v206_v38 = vrot.slane %v205_v27, 4  ;;  %v238_v39 = vrot.slane %v236_v28, 5  ;;  %v243_v40 = vrot.slane %v241_v29, 4  ;;  %v246_v41 = vrot.slane %v244_v30, 5  ;;  %v1207_v48 = vld [vmem:[%s1153_s24 + $0x38] sm:$0xf] }
  0x17   : > { %v220_v42 = vrot.slane %v219_v33, 4  ;;  %v233_v43 = vor.u32 %v232_v35, %v229_v34  ;;  %v252_v44 = vrot.slane %v250_v36, 5  ;;  %v255_v45 = vshrl.u32 %v1191_v31, 16  ;;  %v1210_v49 = vld [vmem:[%s1153_s24 + $0x3c] sm:$0x1] }
  0x18   : > { %v211_v46 = vsel %vm1195_vm3, %v206_v38, %v210_v19  ;;  %v247_v47 = vor.u32 %v246_v41, %v243_v40  ;;  %v258_v50 = vshll.u32 %v1191_v31, 16  ;;  %v264_v51 = vshll.u32 %v1201_v37, 16  ;;  %v1221_v60 = vld [vmem:[%s1153_s24] sm:$0xf]  ;;  %v146_v1 = vld [vmem:[%s1153_s24 + $0x4] sm:$0x1] }
  0x19   : > { %v225_v52 = vsel %vm1195_vm3, %v220_v42, %v224_v23  ;;  %v1216_v53 = vunpack.c.l.b16 %v211_v46  ;;  %v234_v54 = vrot.slane %v233_v43, 4  ;;  %v257_v55 = vrot.slane %v255_v45, 4  ;;  %v1238_v10 = vld [vmem:[%s1153_s24 + $0x8] sm:$0xf]  ;;  %v1086_v23 = vld [vmem:[%s1494_s1 + $0x30] sm:$0xff] }
  0x1a   : > { %v1218_v56 = vunpack.c.l.b16 %v225_v52  ;;  %v248_v57 = vrot.slane %v247_v47, 4  ;;  %v260_v58 = vrot.slane %v258_v50, 5  ;;  %v266_v59 = vrot.slane %v264_v51, 5  ;;  %v148_v27 = vld [vmem:[%s1153_s24 + $0xc] sm:$0x1] }
  0x1b   : > { %v239_v61 = vsel %vm1195_vm3, %v234_v54, %v238_v39  ;;  %v269_v62 = vshrl.u32 %v1207_v48, 16  ;;  %v272_v63 = vshll.u32 %v1207_v48, 16  ;;  %v278_v0 = vshll.u32 %v1210_v49, 16 }
  0x1c   : > { %v1231_v2 = vpack.c.b16 %v1218_v56, %v1216_v53  ;;  %v253_v3 = vsel %vm1195_vm3, %v248_v57, %v252_v44  ;;  %v1235_v4 = vunpack.c.l.b16 %v239_v61  ;;  %v261_v9 = vor.u32 %v260_v58, %v257_v55 }
  0x1d   : > { %v1243_v12 = vunpack.c.l.b16 %v253_v3  ;;  %v271_v13 = vrot.slane %v269_v62, 4  ;;  %v274_v14 = vrot.slane %v272_v63, 5  ;;  %v280_v17 = vrot.slane %v278_v0, 5 }
  0x1e   : > { %986 = vmatmul.msk.bf16.vlgmr.msra.gmra.mxu1 %vm303_vm2, %v1231_v2  ;;  %v262_v18 = vrot.slane %v261_v9, 4  ;;  %v171_v19 = vshrl.u32 %v1221_v60, 16  ;;  %v174_v20 = vshll.u32 %v1221_v60, 16  ;;  %v180_v22 = vshll.u32 %v146_v1, 16 }
  0x1f   : > { %v1254_v25 = vpack.c.b16 %v1243_v12, %v1235_v4  ;;  %v275_v26 = vor.u32 %v274_v14, %v271_v13  ;;  %v185_v28 = vshrl.u32 %v1238_v10, 16  ;;  %v188_v29 = vshll.u32 %v1238_v10, 16  ;;  %704 = vmatpush.bf16.msra.mxu1 %v1085_v11 }
  0x20   : > { %v267_v30 = vsel %vm1195_vm3, %v262_v18, %v266_v59  ;;  %v173_v33 = vrot.slane %v171_v19, 4  ;;  %v176_v34 = vrot.slane %v174_v20, 5  ;;  %v182_v36 = vrot.slane %v180_v22, 5  ;;  %v1087_v59 = vld [vmem:[%s1494_s1 + $0x38] sm:$0xff] }
  0x21   : > { %987 = vmatmul.msk.bf16.vlgmr.msra.gmra.mxu2 %vm303_vm2, %v1254_v25  ;;  %v276_v35 = vrot.slane %v275_v26, 4  ;;  %v187_v38 = vrot.slane %v185_v28, 4  ;;  %v190_v39 = vrot.slane %v188_v29, 5  ;;  %v1263_v40 = vunpack.c.l.b16 %v267_v30 }
  0x22   : > { %v177_v41 = vor.u32 %v176_v34, %v173_v33  ;;  %v194_v42 = vshll.u32 %v148_v27, 16  ;;  %v425_v43 = vrot.slane %v146_v1, 5  ;;  %756 = vmatpush.bf16.msra.mxu2 %v1086_v23  ;;  %v429_v46 = vrot.slane %v148_v27, 5 }
  0x23   : > { %v281_v44 = vsel %vm1195_vm3, %v276_v35, %v280_v17  ;;  %v191_v45 = vor.u32 %v190_v39, %v187_v38  ;;  %v997_v54 = vrot.slane %v1221_v60, 9  ;;  %v353_v57 = vunpack.c.l.b16 %v1221_v60 }
  0x24   : > { %v1272_v50 = vunpack.c.l.b16 %v281_v44  ;;  %v178_v51 = vrot.slane %v177_v41, 4  ;;  %v196_v52 = vrot.slane %v194_v42, 5  ;;  %v998_v58 = vrot.slane %v1238_v10, 9 }
  0x25   : > { %v192_v55 = vrot.slane %v191_v45, 4  ;;  %v354_v63 = vunpack.c.l.b16 %v1238_v10  ;;  %v426_v0 = vsel %vm1268_vm6, %v997_v54, %v425_v43  ;;  %v1088_v10 = vld [vmem:[%s1494_s1 + $0x40] sm:$0xff]  ;;  %v355_v19 = vunpack.c.l.b16 %v1156_v5 }
  0x26   : > { %v1282_v61 = vpack.c.b16 %v1272_v50, %v1263_v40  ;;  %v183_v62 = vsel %vm1195_vm3, %v178_v51, %v182_v36  ;;  %v1293_v3 = vsel %vm1268_vm6, %v998_v58, %v429_v46  ;;  %v458_v11 = vunpack.c.l.b16 %v426_v0 }
  0x27   : > { %v197_v60 = vsel %vm1195_vm3, %v192_v55, %v196_v52  ;;  %v285_v1 = vunpack.c.l.b16 %v183_v62  ;;  %v459_v13 = vunpack.c.l.b16 %v1293_v3  ;;  %v361_v17 = vpack.c.b16 %v354_v63, %v353_v57  ;;  %v163_v3 = vld [vmem:[%s1153_s24 + $0x48] sm:$0xf] }
  0x28   : > { %988 = vmatmul.msk.bf16.vlgmr.msra.gmra.mxu3 %vm303_vm2, %v1282_v61  ;;  %v286_v9 = vunpack.c.l.b16 %v197_v60  ;;  %v999_v20 = vrot.slane %v1156_v5, 9  ;;  %v433_v22 = vrot.slane %v1159_v6, 5  ;;  %v1000_v23 = vrot.slane %v1162_v7, 9  ;;  %v162_v60 = vld [vmem:[%s1153_s24 + $0x44] sm:$0x1] }
  0x29   : > { %821 = vmatpush.bf16.msra.mxu3 %v1087_v59  ;;  %v466_v18 = vpack.c.b16 %v459_v13, %v458_v11  ;;  %v437_v26 = vrot.slane %v1165_v8, 5  ;;  %v530_v27 = vpack.c.b16 %v355_v19, %v354_v63  ;;  %v356_v28 = vunpack.c.l.b16 %v1162_v7 }
  0x2a   : > { %v293_v14 = vpack.c.b16 %v286_v9, %v285_v1  ;;  %v1314_v29 = vsel %vm1268_vm6, %v999_v20, %v433_v22  ;;  %v607_v5 = vpack.c.b16 %v1216_v53, %v286_v9  ;;  %v357_v34 = vunpack.c.l.b16 %v1174_v15 }
  0x2b   : > { %v1318_v30 = vsel %vm1268_vm6, %v1000_v23, %v437_v26  ;;  %v460_v6 = vunpack.c.l.b16 %v1314_v29  ;;  %v362_v8 = vpack.c.b16 %v356_v28, %v355_v19  ;;  %v1001_v35 = vrot.slane %v1174_v15, 9  ;;  %v164_v29 = vld [vmem:[%s1153_s24 + $0x4c] sm:$0x1] }
  0x2c   : > { %985 = vmatmul.msk.bf16.vlgmr.msra.gmra.mxu0 %vm303_vm2, %v293_v14  ;;  %v461_v33 = vunpack.c.l.b16 %v1318_v30  ;;  %v441_v53 = vrot.slane %v1177_v16, 5  ;;  %v1002_v36 = vrot.slane %v1180_v21, 9  ;;  %v445_v38 = vrot.slane %v1183_v24, 5 }
  0x2d   : > { %877 = vmatpush.bf16.msra.mxu0 %v1088_v10  ;;  %v531_v39 = vpack.c.b16 %v357_v34, %v356_v28  ;;  %v358_v41 = vunpack.c.l.b16 %v1180_v21  ;;  %v608_v15 = vpack.c.b16 %v1235_v4, %v1218_v56  ;;  %v1345_v21 = vld [vmem:[%s1153_s24 + $0x40] sm:$0xf]  ;;  %v359_v46 = vunpack.c.l.b16 %v1191_v31 }
  0x2e   : > { %993 = vmatmul.msk.bf16.vlgmr.msrb.gmra.mxu1 %vm303_vm2, %v361_v17  ;;  %v467_v7 = vpack.c.b16 %v461_v33, %v460_v6  ;;  %v442_v42 = vsel %vm1268_vm6, %v1001_v35, %v441_v53  ;;  %v446_v43 = vsel %vm1268_vm6, %v1002_v36, %v445_v38  ;;  %v590_v51 = vshrl.u32 %v1345_v21, 16 }
  0x2f   : > { %v462_v44 = vunpack.c.l.b16 %v442_v42  ;;  %v463_v16 = vunpack.c.l.b16 %v446_v43  ;;  %v363_v45 = vpack.c.b16 %v358_v41, %v357_v34  ;;  %v593_v52 = vshll.u32 %v1345_v21, 16 }
  0x30   : > { %v1003_v56 = vrot.slane %v1191_v31, 9  ;;  %v449_v4 = vrot.slane %v1201_v37, 5  ;;  %v1004_v54 = vrot.slane %v1207_v48, 9  ;;  %v453_v55 = vrot.slane %v1210_v49, 5 }
  0x31   : > { %1011 = vmatmul.msk.bf16.vlgmr.msrb.gmra.mxu2 %vm303_vm2, %v466_v18  ;;  %v468_v24 = vpack.c.b16 %v463_v16, %v462_v44  ;;  %v532_v57 = vpack.c.b16 %v359_v46, %v358_v41  ;;  %v592_v58 = vrot.slane %v590_v51, 4  ;;  %v595_v59 = vrot.slane %v593_v52, 5 }
  0x32   : > { %v360_v62 = vunpack.c.l.b16 %v1207_v48  ;;  %v450_v63 = vsel %vm1268_vm6, %v1003_v56, %v449_v4  ;;  %v454_v0 = vsel %vm1268_vm6, %v1004_v54, %v453_v55  ;;  %v609_v31 = vpack.c.b16 %v1263_v40, %v1243_v12 }
  0x33   : > { %v464_v37 = vunpack.c.l.b16 %v450_v63  ;;  %v465_v1 = vunpack.c.l.b16 %v454_v0  ;;  %v596_v49 = vor.u32 %v595_v59, %v592_v58  ;;  %v599_v9 = vshll.u32 %v162_v60, 16 }
  0x34   : > { %v364_v11 = vpack.c.b16 %v360_v62, %v359_v46  ;;  %v529_v17 = vunpack.c.l.b16 %v1345_v21  ;;  %v675_v20 = vpack.c.b16 %v460_v6, %v459_v13  ;;  %v676_v22 = vpack.c.b16 %v462_v44, %v461_v33 }
  0x35   : > { %v469_v48 = vpack.c.b16 %v465_v1, %v464_v37  ;;  %v597_v10 = vrot.slane %v596_v49, 4  ;;  %v601_v14 = vrot.slane %v599_v9, 5  ;;  %v787_v13 = vshrl.u32 %v163_v3, 16 }
  0x36   : > { %v533_v12 = vpack.c.b16 %v529_v17, %v360_v62  ;;  %v790_v23 = vshll.u32 %v163_v3, 16  ;;  %v669_v26 = vrot.slane %v162_v60, 5  ;;  %v738_v33 = vunpack.c.l.b16 %v163_v3 }
  0x37   : > { %v602_v18 = vsel %vm1195_vm3, %v597_v10, %v601_v14  ;;  %v1066_v38 = vrot.slane %v163_v3, 9 }
  0x38   : > { %1021 = vmatmul.msk.bf16.vlgmr.msrb.gmra.mxu3 %vm303_vm2, %v530_v27  ;;  %v606_v40 = vunpack.c.l.b16 %v602_v18  ;;  %v789_v27 = vrot.slane %v787_v13, 4  ;;  %v792_v28 = vrot.slane %v790_v23, 5  ;;  %v739_v53 = vpack.c.b16 %v738_v33, %v529_v17 }
  0x3a   : > { %v610_v19 = vpack.c.b16 %v606_v40, %v1272_v50  ;;  %v677_v50 = vpack.c.b16 %v464_v37, %v463_v16 }
  0x3c   : > { %1031 = vmatmul.msk.bf16.vlgmr.msrb.gmra.mxu0 %vm303_vm2, %v607_v5  ;;  %v796_v5 = vshll.u32 %v164_v29, 16 }
  0x3e   : > { %994 = vmatmul.msk.bf16.gmra.mxu1 %vm303_vm2, %v362_v8 }
  0x41   : > { %1012 = vmatmul.msk.bf16.gmra.mxu2 %vm303_vm2, %v467_v7 }
  0x48   : > { %1022 = vmatmul.msk.bf16.gmra.mxu3 %vm303_vm2, %v531_v39  ;;  %v854_v39 = vrot.slane %v164_v29, 5 }
  0x4c   : > { %1032 = vmatmul.msk.bf16.gmra.mxu0 %vm303_vm2, %v608_v15 }
  0x4e   : > { %995 = vmatmul.msk.bf16.gmra.mxu1 %vm303_vm2, %v363_v45 }
  0x51   : > { %1013 = vmatmul.msk.bf16.gmra.mxu2 %vm303_vm2, %v468_v24 }
  0x58   : > { %1023 = vmatmul.msk.bf16.gmra.mxu3 %vm303_vm2, %v532_v57 }
  0x5c   : > { %1033 = vmatmul.msk.bf16.gmra.mxu0 %vm303_vm2, %v609_v31 }
  0x5e   : > { %996 = vmatmul.msk.bf16.gmra.mxu1 %vm303_vm2, %v364_v11 }
  0x61   : > { %1014 = vmatmul.msk.bf16.gmra.mxu2 %vm303_vm2, %v469_v48 }
  0x68   : > { %1024 = vmatmul.msk.bf16.gmra.mxu3 %vm303_vm2, %v533_v12 }
  0x6c   : > { %1034 = vmatmul.msk.bf16.gmra.mxu0 %vm303_vm2, %v610_v19 }
  0x6e   : > { %1042 = vmatmul.msk.bf16.vlgmr.msra.gmra.mxu1 %vm303_vm2, %v675_v20 }
  0x71   : > { %1052 = vmatmul.msk.bf16.vlgmr.msra.gmra.mxu2 %vm303_vm2, %v362_v8 }
  0x78   : > { %1062 = vmatmul.msk.bf16.vlgmr.msra.gmra.mxu3 %vm303_vm2, %v1231_v2  ;;  %v1035_v2 = vrot.slane %v1345_v21, 9 }
  0x7a   : > { %v670_v30 = vsel %vm1268_vm6, %v1035_v2, %v669_v26 }
  0x7b   : > { %v674_v6 = vunpack.c.l.b16 %v670_v30 }
  0x7c   : > { %1073 = vmatmul.msk.bf16.vlgmr.msra.gmra.mxu0 %vm303_vm2, %v467_v7  ;;  %v798_v7 = vrot.slane %v796_v5, 5 }
  0x7d   : > { %v678_v34 = vpack.c.b16 %v674_v6, %v465_v1 }
  0x7e   : > { %1043 = vmatmul.msk.bf16.gmra.mxu1 %vm303_vm2, %v676_v22 }
  0x81   : > { %1053 = vmatmul.msk.bf16.gmra.mxu2 %vm303_vm2, %v363_v45 }
  0x88   : > { %1063 = vmatmul.msk.bf16.gmra.mxu3 %vm303_vm2, %v1254_v25  ;;  %v793_v25 = vor.u32 %v792_v28, %v789_v27 }
  0x8a   : > { %v794_v8 = vrot.slane %v793_v25, 4 }
  0x8c   : > { %1074 = vmatmul.msk.bf16.gmra.mxu0 %vm303_vm2, %v468_v24  ;;  %v799_v36 = vsel %vm1195_vm3, %v794_v8, %v798_v7 }
  0x8d   : > { %v803_v41 = vunpack.c.l.b16 %v799_v36 }
  0x8e   : > { %1044 = vmatmul.msk.bf16.gmra.mxu1 %vm303_vm2, %v677_v50 }
  0x8f   : > { %v804_v43 = vpack.c.b16 %v803_v41, %v606_v40 }
  0x91   : > { %1054 = vmatmul.msk.bf16.gmra.mxu2 %vm303_vm2, %v364_v11 }
  0x98   : > { %1064 = vmatmul.msk.bf16.gmra.mxu3 %vm303_vm2, %v1282_v61  ;;  %v855_v61 = vsel %vm1268_vm6, %v1066_v38, %v854_v39 }
  0x99   : > { %v859_v15 = vunpack.c.l.b16 %v855_v61 }
  0x9b   : > { %v1396_v35 = vpop.f32.mrf.mxu1  ;;  %v860_v32 = vpack.c.b16 %v859_v15, %v674_v6 }
  0x9c   : > { %1075 = vmatmul.msk.bf16.gmra.mxu0 %vm303_vm2, %v469_v48 }
  0x9e   : > { %1045 = vmatmul.msk.bf16.gmra.mxu1 %vm303_vm2, %v678_v34 }
  0xa1   : > { %1055 = vmatmul.msk.bf16.gmra.mxu2 %vm303_vm2, %v739_v53 }
  0xa3   : > { %v1405_v42 = vpop.f32.mrf.mxu1 }
  0xa4   : > { %v1407_v44 = vpop.f32.mrf.mxu2 }
  0xa8   : > { %1065 = vmatmul.msk.bf16.gmra.mxu3 %vm303_vm2, %v804_v43 }
  0xa9   : > { %v325_v16 = vpop.f32.mrf.mxu0 }
  0xab   : > { %v1410_v45 = vpop.f32.mrf.mxu3  ;;  %v392_v24 = vpop.f32.mrf.mxu1 }
  0xac   : > { %1076 = vmatmul.msk.bf16.gmra.mxu0 %vm303_vm2, %v860_v32  ;;  %v1413_v21 = vpop.f32.mrf.mxu2  ;;  %v393_v20 = vadd.f32 %v392_v24, %v325_v16 }
  0xb1   : > { %v327_v46 = vpop.f32.mrf.mxu0 }
  0xb3   : > { %v1415_v47 = vpop.f32.mrf.mxu3  ;;  %v394_v51 = vpop.f32.mrf.mxu1 }
  0xb4   : > { %v497_v52 = vpop.f32.mrf.mxu2  ;;  %v395_v26 = vadd.f32 %v394_v51, %v327_v46 }
  0xb5   : > { %v517_v3 = vadd.f32 %v497_v52, %v393_v20 }
  0xb9   : > { %v638_v56 = vpop.f32.mrf.mxu0 }
  0xbb   : > { %v561_v4 = vpop.f32.mrf.mxu3  ;;  %v397_v54 = vpop.f32.mrf.mxu1 }
  0xbc   : > { %v499_v55 = vpop.f32.mrf.mxu2  ;;  %v581_v23 = vadd.f32 %v561_v4, %v517_v3  ;;  %v398_v7 = vadd.f32 %v397_v54, %v1396_v35 }
  0xbd   : > { %v518_v29 = vadd.f32 %v499_v55, %v395_v26 }
  0xbe   : > { %v658_v30 = vadd.f32 %v638_v56, %v581_v23 }
  0xc1   : > { %v640_v57 = vpop.f32.mrf.mxu0 }
  0xc3   : > { %v563_v58 = vpop.f32.mrf.mxu3  ;;  %v399_v59 = vpop.f32.mrf.mxu1 }
  0xc4   : > { %v502_v62 = vpop.f32.mrf.mxu2  ;;  %v582_v6 = vadd.f32 %v563_v58, %v518_v29  ;;  %v400_v16 = vadd.f32 %v399_v59, %v1405_v42 }
  0xc5   : > { %v519_v36 = vadd.f32 %v502_v62, %v398_v7 }
  0xc6   : > { %v659_v39 = vadd.f32 %v640_v57, %v582_v6 }
  0xc9   : > { %v643_v63 = vpop.f32.mrf.mxu0 }
  0xcb   : > { %v566_v0 = vpop.f32.mrf.mxu3  ;;  %v402_v60 = vpop.f32.mrf.mxu1 }
  0xcc   : > { %v504_v31 = vpop.f32.mrf.mxu2  ;;  %v583_v15 = vadd.f32 %v566_v0, %v519_v36  ;;  %v403_v0 = vadd.f32 %v402_v60, %v1407_v44 }
  0xcd   : > { %v520_v51 = vadd.f32 %v504_v31, %v400_v16 }
  0xce   : > { %v660_v56 = vadd.f32 %v643_v63, %v583_v15 }
  0xd1   : > { %v1417_v37 = vpop.f32.mrf.mxu0 }
  0xd3   : > { %v568_v1 = vpop.f32.mrf.mxu3  ;;  %v1419_v49 = vpop.f32.mrf.mxu1 }
  0xd4   : > { %v507_v9 = vpop.f32.mrf.mxu2  ;;  %v584_v57 = vadd.f32 %v568_v1, %v520_v51  ;;  %v405_v29 = vadd.f32 %v1419_v49, %v1413_v21 }
  0xd6   : > { %v661_v42 = vadd.f32 %v1417_v37, %v584_v57 }
  0xd9   : > { %v1421_v11 = vpop.f32.mrf.mxu0 }
  0xdb   : > { %v1423_v48 = vpop.f32.mrf.mxu3  ;;  %v1425_v10 = vpop.f32.mrf.mxu1 }
  0xdc   : > { %v1427_v14 = vpop.f32.mrf.mxu2  ;;  %v408_v21 = vadd.f32 %v1425_v10, %v1410_v45 }
  0xdd   : > { %v522_v60 = vadd.f32 %v1427_v14, %v405_v29 }
  0xe1   : > { %v1429_v17 = vpop.f32.mrf.mxu0 }
  0xe3   : > { %v1431_v18 = vpop.f32.mrf.mxu3  ;;  %v1433_v12 = vpop.f32.mrf.mxu1 }
  0xe4   : > { %v1435_v40 = vpop.f32.mrf.mxu2  ;;  %v410_v45 = vadd.f32 %v1433_v12, %v1415_v47 }
  0xe5   : > { %v523_v14 = vadd.f32 %v1435_v40, %v408_v21 }
  0xe9   : > { %v1437_v19 = vpop.f32.mrf.mxu0 }
  0xeb   : > { %v1439_v22 = vpop.f32.mrf.mxu3  ;;  %v706_v50 = vpop.f32.mrf.mxu1 }
  0xec   : > { %v1441_v13 = vpop.f32.mrf.mxu2  ;;  %v726_v5 = vadd.f32 %v706_v50, %v658_v30  ;;  %v521_v50 = vadd.f32 %v507_v9, %v403_v0 }
  0xed   : > { %v524_v40 = vadd.f32 %v1441_v13, %v410_v45 }
  0xee   : > { %v585_v26 = vadd.f32 %v1423_v48, %v521_v50  ;;  %v586_v48 = vadd.f32 %v1431_v18, %v522_v60 }
  0xf0   : > { %v662_v37 = vadd.f32 %v1421_v11, %v585_v26  ;;  %v663_v11 = vadd.f32 %v1429_v17, %v586_v48 }
  0xf1   : > { %v1443_v2 = vpop.f32.mrf.mxu0 }
  0xf3   : > { %v1445_v27 = vpop.f32.mrf.mxu3  ;;  %v708_v28 = vpop.f32.mrf.mxu1 }
  0xf4   : > { %v758_v25 = vpop.f32.mrf.mxu2  ;;  %v727_v43 = vadd.f32 %v708_v28, %v659_v39 }
  0xf5   : > { %v778_v33 = vadd.f32 %v758_v25, %v726_v5 }
  0xf9   : > { %v879_v8 = vpop.f32.mrf.mxu0 }
  0xfb   : > { %v823_v34 = vpop.f32.mrf.mxu3  ;;  %v711_v53 = vpop.f32.mrf.mxu1 }
  0xfc   : > { %v843_v38 = vadd.f32 %v823_v34, %v778_v33  ;;  %v760_v41 = vpop.f32.mrf.mxu2  ;;  %v728_v55 = vadd.f32 %v711_v53, %v660_v56 }
  0xfd   : > { %v779_v35 = vadd.f32 %v760_v41, %v727_v43 }
  0xfe   : > { %v899_v61 = vadd.f32 %v879_v8, %v843_v38  ;;  %v587_v38 = vadd.f32 %v1439_v22, %v523_v14  ;;  %v588_v22 = vadd.f32 %v1445_v27, %v524_v40 }
 0x100   : > { %908 = vst.msk [vmem:[%s1452_s8] sm:$0xff] %vm907_vm7, %v899_v61  ;;  %v664_v17 = vadd.f32 %v1437_v19, %v587_v38  ;;  %v665_v12 = vadd.f32 %v1443_v2, %v588_v22 }
 0x101   : > { %v881_v32 = vpop.f32.mrf.mxu0 }
 0x103   : > { %v825_v24 = vpop.f32.mrf.mxu3  ;;  %v713_v46 = vpop.f32.mrf.mxu1 }
 0x104   : > { %v844_v52 = vadd.f32 %v825_v24, %v779_v35  ;;  %v763_v4 = vpop.f32.mrf.mxu2  ;;  %v729_v63 = vadd.f32 %v713_v46, %v661_v42 }
 0x105   : > { %v780_v58 = vadd.f32 %v763_v4, %v728_v55 }
 0x106   : > { %v900_v54 = vadd.f32 %v881_v32, %v844_v52 }
 0x108   : > { %909 = vst.msk [vmem:[%s1452_s8 + $0x8] sm:$0xff] %vm907_vm7, %v900_v54 }
 0x109   : > { %v884_v62 = vpop.f32.mrf.mxu0 }
 0x10b   : > { %v828_v20 = vpop.f32.mrf.mxu3  ;;  %v716_v31 = vpop.f32.mrf.mxu1 }
 0x10c   : > { %v845_v3 = vadd.f32 %v828_v20, %v780_v58  ;;  %v765_v59 = vpop.f32.mrf.mxu2  ;;  %v730_v5 = vadd.f32 %v716_v31, %v662_v37 }
 0x10d   : > { %v781_v1 = vadd.f32 %v765_v59, %v729_v63 }
 0x10e   : > { %v901_v23 = vadd.f32 %v884_v62, %v845_v3 }
 0x110   : > { %910 = vst.msk [vmem:[%s1452_s8 + $0x10] sm:$0xff] %vm907_vm7, %v901_v23 }
 0x111   : > { %v886_v28 = vpop.f32.mrf.mxu0 }
 0x113   : > { %v830_v44 = vpop.f32.mrf.mxu3  ;;  %v718_v6 = vpop.f32.mrf.mxu1 }
 0x114   : > { %v846_v9 = vadd.f32 %v830_v44, %v781_v1  ;;  %v768_v30 = vpop.f32.mrf.mxu2  ;;  %v731_v36 = vadd.f32 %v718_v6, %v663_v11 }
 0x115   : > { %v782_v33 = vadd.f32 %v768_v30, %v730_v5 }
 0x116   : > { %v902_v25 = vadd.f32 %v886_v28, %v846_v9 }
 0x118   : > { %911 = vst.msk [vmem:[%s1452_s8 + $0x18] sm:$0xff] %vm907_vm7, %v902_v25 }
 0x119   : > { %v889_v8 = vpop.f32.mrf.mxu0 }
 0x11b   : > { %v833_v49 = vpop.f32.mrf.mxu3  ;;  %v721_v39 = vpop.f32.mrf.mxu1 }
 0x11c   : > { %v847_v7 = vadd.f32 %v833_v49, %v782_v33  ;;  %v770_v34 = vpop.f32.mrf.mxu2  ;;  %v732_v35 = vadd.f32 %v721_v39, %v664_v17 }
 0x11d   : > { %v783_v18 = vadd.f32 %v770_v34, %v731_v36 }
 0x11e   : > { %v903_v53 = vadd.f32 %v889_v8, %v847_v7 }
 0x120   : > { %912 = vst.msk [vmem:[%s1452_s8 + $0x20] sm:$0xff] %vm907_vm7, %v903_v53 }
 0x121   : > { %v891_v41 = vpop.f32.mrf.mxu0 }
 0x123   : > { %v835_v10 = vpop.f32.mrf.mxu3  ;;  %v723_v16 = vpop.f32.mrf.mxu1 }
 0x124   : > { %v848_v61 = vadd.f32 %v835_v10, %v783_v18  ;;  %v773_v43 = vpop.f32.mrf.mxu2  ;;  %v733_v52 = vadd.f32 %v723_v16, %v665_v12 }
 0x125   : > { %v784_v32 = vadd.f32 %v773_v43, %v732_v35 }
 0x126   : > { %v904_v15 = vadd.f32 %v891_v41, %v848_v61 }
 0x128   : > { %913 = vst.msk [vmem:[%s1452_s8 + $0x28] sm:$0xff] %vm907_vm7, %v904_v15 }
 0x129   : > { %v894_v24 = vpop.f32.mrf.mxu0 }
 0x12b   : > { %v838_v46 = vpop.f32.mrf.mxu3 }
 0x12c   : > { %v849_v47 = vadd.f32 %v838_v46, %v784_v32  ;;  %v775_v13 = vpop.f32.mrf.mxu2 }
 0x12d   : > { %v785_v19 = vadd.f32 %v775_v13, %v733_v52 }
 0x12e   : > { %v905_v51 = vadd.f32 %v894_v24, %v849_v47 }
 0x130   : > { %914 = vst.msk [vmem:[%s1452_s8 + $0x30] sm:$0xff] %vm907_vm7, %v905_v51 }
 0x131   : > { %v896_v54 = vpop.f32.mrf.mxu0 }
 0x133   : > { %v840_v56 = vpop.f32.mrf.mxu3 }
 0x134   : > { %v850_v4 = vadd.f32 %v840_v56, %v785_v19 }
 0x136   : > { %v906_v27 = vadd.f32 %v896_v54, %v850_v4 }
 0x138   : > { %915 = vst.msk [vmem:[%s1452_s8 + $0x38] sm:$0xff] %vm907_vm7, %v906_v27 }
 0x139 PF: > { %s12_s9 = sadd.s32 1, %s1107_s9  }
 0x13a   : > { %p9_p4 = scmp.ge.s32.totalorder %s12_s9, 4  }
 0x13c   :  { %11 = sbr.rel (!%p9_p4) target bundleno = 1 (0x1), region = 66 }

// kernel: parallel_attention_forward.11
= control target key start
LH: loop header
LB: loop body
LE: loop exit
PB: predicated region body
PF: predicated region fallthrough
CT: control target
= control target key end

     0   :  { %10 = vsyncpa [#allocation3], 0  ;;  %s842_s0 = inlined_call_operand.vmem [shape: f32[2,64,32], index: 0, kind: input, shape index: {}]   ;;  %s843_s1 = inlined_call_operand.vmem [shape: f32[2,64,32], index: 1, kind: input, shape index: {}]   ;;  %s844_s2 = inlined_call_operand.vmem [shape: f32[2,64,32], index: 2, kind: input, shape index: {}]   ;;  %s845_s3 = inlined_call_operand.vmem [shape: f32[32,2], index: 3, kind: input, shape index: {}]   ;;  %s846_s4 = inlined_call_operand.vmem [shape: f32[2,32], index: 4, kind: input, shape index: {}]   ;;  %s847_s5 = inlined_call_operand.hbm [shape: f32[2,64,32], index: 5, kind: output, shape index: {}]  }
   0x1   :  { %12 = vsyncpa [#allocation3 + $0x1], 0  ;;  %s696_s18 = smov 0   ;;  %s698_s19 = smov 0  }
   0x2   :  { %s700_s20 = smov 0   ;;  %s702_s21 = smov 0  }
   0x3 LB: > { %s717_s22 = sadd.s32 4294967295, %s661_s21   ;;  %s528_s23 = sadd.s32 4294967294, %s661_s21   ;;  %s661_s21 = sphi %s702_s21, %s853_s21   ;;  %s657_s20 = sphi %s700_s20, %s852_s20   ;;  %s653_s19 = sphi %s698_s19, %s851_s19   ;;  %s649_s18 = sphi %s696_s18, %s850_s18  }
   0x4   : > { %s721_s24 = sadd.s32 1, %s661_s21   ;;  %s145_s25 = sadd.s32 1, %s657_s20 }
   0x5   : > { %s142_s26 = ssub.s32 %s661_s21, %s721_s24  ;;  %p155_p0 = scmp.ne.s32.totalorder %s657_s20, %s653_s19 }
   0x6   : > { %p143_p1 = scmp.eq.s32.totalorder %s142_s26, 0  ;;  %p156_p2 = scmp.eq.s32.totalorder %s717_s22, 1 }
   0x7   : > { %p161_p3 = scmp.ne.s32.totalorder %s653_s19, %s649_s18  ;;  %p162_p4 = scmp.eq.s32.totalorder %s528_s23, 1 }
   0x8   : > { %s732_s27 = scalar_select %p143_p1, %s657_s20, %s145_s25  }
   0x9   : > { %p734_p5 = por %p156_p2, %p155_p0  ;;  %p738_p6 = por %p162_p4, %p161_p3 }
   0xa   : > { %p531_p7 = scmp.ge.s32.totalorder %s661_s21, 1  ;;  %p210_p8 = scmp.lt.s32.totalorder %s661_s21, 3 }
   0xc   : > { %p211_p9 = pnand %p531_p7, %p210_p8 }
   0xd   : > { %p248_p10 = scmp.lt.s32.totalorder (!%p211_p9), %s717_s22, 1  ;;  %s245_s10 = sand.u32 (!%p211_p9), 1, %s653_s19  }
   0xe   : > { %214 = sbr.rel (%p211_p9) target bundleno = 352 (0x160), region = 40  ;;  %s550_s12 = sshll.u32 (!%p211_p9), %s717_s22, 6 }
   0xf   : > { %s438_s15 = scalar_lea.hbm (!%p211_p9), %s847_s5, %s550_s12  ;;  %s427_s23 = scalar_lea.sflag (!%p211_p9), [#allocation3], %s245_s10 }
  0x13   : > { %v304_v0 = vld [vmem:[%s845_s3 + $0x18] sm:$0xff]  ;;  %v303_v1 = vld [vmem:[%s845_s3 + $0x10] sm:$0xff]  ;;  %v302_v2 = vld [vmem:[%s845_s3 + $0x8] sm:$0xff]  ;;  %s249_s11 = scalar_select %p248_p10, %s717_s22, 1  ;;  %vm271_vm0 = vcmask 261120   ;;  %v663_v7 = vmov 64.0  }
  0x14   : > { %320 = vmatpush.msra.mxu0 %v304_v0  ;;  %v301_v3 = vld [vmem:[%s845_s3] sm:$0xff]  ;;  %593 = vrcp.f32 %v663_v7  ;;  %vm334_vm2 = vcmask 1041408   ;;  %vm330_vm3 = vcmask 15360   ;;  %s441_s22 = sshll.u32 %s438_s15, 4  ;;  %s442_s22 = int_to_ptr.hbm [resolvable:$true] %s441_s22 }
  0x15   : > { %s547_s14 = sshll.u32 %s249_s11, 6  ;;  %s532_s11 = sshll.u32 %s245_s10, 6 }
  0x16   : > { %321 = vmatpush.msra.mxu0 %v303_v1  ;;  %s252_s17 = scalar_lea.vmem %s842_s0, %s547_s14  ;;  %s257_s26 = scalar_lea.vmem %s843_s1, %s547_s14 }
  0x17   : > { %v263_v4 = vld [vmem:[%s252_s17] sm:$0xff]  ;;  %v264_v5 = vld [vmem:[%s252_s17 + $0x8] sm:$0xff]  ;;  %v265_v6 = vld [vmem:[%s252_s17 + $0x10] sm:$0xff]  ;;  %s770_s7 = scalar_lea.vmem %s844_s2, %s547_s14  ;;  %s247_s16 = scalar_lea.vmem [#allocation2], %s532_s11 }
  0x18   : > { %322 = vmatpush.msra.mxu0 %v302_v2  ;;  %v266_v8 = vld [vmem:[%s252_s17 + $0x18] sm:$0xff]  ;;  %v272_v9 = vsel %vm271_vm0, %v263_v4, 0.0  ;;  %v273_v10 = vsel %vm271_vm0, %v264_v5, 0.0  ;;  %v275_v11 = vsel %vm271_vm0, %v265_v6, 0.0  ;;  %v267_v12 = vld [vmem:[%s252_s17 + $0x20] sm:$0xff]  ;;  %v268_v13 = vld [vmem:[%s252_s17 + $0x28] sm:$0xff] }
  0x19   : > { %v274_v14 = vadd.f32 %v273_v10, %v272_v9  ;;  %v377_v15 = vld [vmem:[%s257_s26] sm:$0xff]  ;;  %v269_v16 = vld [vmem:[%s252_s17 + $0x30] sm:$0xff]  ;;  %v270_v17 = vld [vmem:[%s252_s17 + $0x38] sm:$0xff]  ;;  %v277_v18 = vsel %vm271_vm0, %v266_v8, 0.0  ;;  %v279_v29 = vsel %vm271_vm0, %v267_v12, 0.0  ;;  %v281_v44 = vsel %vm271_vm0, %v268_v13, 0.0 }
  0x1a   : > { %323 = vmatpush.msra.mxu0 %v301_v3  ;;  %v378_v19 = vld [vmem:[%s257_s26 + $0x8] sm:$0xff]  ;;  %v379_v20 = vld [vmem:[%s257_s26 + $0x10] sm:$0xff]  ;;  %v380_v21 = vld [vmem:[%s257_s26 + $0x18] sm:$0xff]  ;;  %v385_v26 = vadd.f32 %v377_v15, %v263_v4  ;;  %v594_v36 = vpop.eup %593  ;;  %v283_v55 = vsel %vm271_vm0, %v269_v16, 0.0  ;;  %v285_v59 = vsel %vm271_vm0, %v270_v17, 0.0  ;;  %s439_s17 = sshll.u32 %s247_s16, 4  ;;  %s440_s17 = int_to_ptr.vmem [resolvable:$true] %s439_s17 }
  0x1b   : > { %v276_v22 = vadd.f32 %v275_v11, %v274_v14  ;;  %v381_v23 = vld [vmem:[%s257_s26 + $0x20] sm:$0xff]  ;;  %v382_v24 = vld [vmem:[%s257_s26 + $0x28] sm:$0xff]  ;;  %v383_v25 = vld [vmem:[%s257_s26 + $0x30] sm:$0xff]  ;;  %v386_v27 = vadd.f32 %v378_v19, %v264_v5  ;;  %v387_v28 = vadd.f32 %v379_v20, %v265_v6  ;;  %v388_v31 = vadd.f32 %v380_v21, %v266_v8  ;;  %s613_s25 = sshra.s32 %s442_s22, 4  ;;  %s614_s25 = int_to_ptr.hbm [resolvable:$true] %s613_s25 }
  0x1c   : > { %v384_v30 = vld [vmem:[%s257_s26 + $0x38] sm:$0xff]  ;;  %v389_v32 = vadd.f32 %v381_v23, %v267_v12  ;;  %v390_v33 = vadd.f32 %v382_v24, %v268_v13  ;;  %v393_v34 = vld [vmem:[%s770_s7] sm:$0xff]  ;;  %v394_v35 = vld [vmem:[%s770_s7 + $0x8] sm:$0xff]  ;;  %v391_v38 = vadd.f32 %v383_v25, %v269_v16  ;;  %v294_v56 = vmul.f32 64.0, %v594_v36  ;;  %s615_s26 = scalar_lea.hbm %s614_s25, 64  ;;  %p620_p0 = scmp.lt.s32.totalorder %s614_s25, %s847_s5 }
  0x1d   : > { %v278_v37 = vadd.f32 %v277_v18, %v276_v22  ;;  %v392_v39 = vadd.f32 %v384_v30, %v270_v17  ;;  %v395_v40 = vld [vmem:[%s770_s7 + $0x10] sm:$0xff]  ;;  %v396_v41 = vld [vmem:[%s770_s7 + $0x18] sm:$0xff]  ;;  %v397_v42 = vld [vmem:[%s770_s7 + $0x20] sm:$0xff]  ;;  %v779_v43 = vadd.f32 %v393_v34, %v385_v26  ;;  %v402_v48 = vadd.f32 %v394_v35, %v386_v27  ;;  %p616_p11 = scmp.ne.s32.totalorder %s614_s25, %s615_s26 }
  0x1e   : > { %v398_v45 = vld [vmem:[%s770_s7 + $0x28] sm:$0xff]  ;;  %v399_v46 = vld [vmem:[%s770_s7 + $0x30] sm:$0xff]  ;;  %v400_v47 = vld [vmem:[%s770_s7 + $0x38] sm:$0xff]  ;;  %v403_v49 = vadd.f32 %v395_v40, %v387_v28  ;;  %v404_v50 = vadd.f32 %v396_v41, %v388_v31  ;;  %v405_v52 = vadd.f32 %v397_v42, %v389_v32  ;;  %v295_v61 = vsub.f32 1.0, %v294_v56  ;;  %s619_s7 = scalar_lea.hbm %s847_s5, 128 }
  0x1f   : > { %v280_v51 = vadd.f32 %v279_v29, %v278_v37  ;;  %v406_v53 = vadd.f32 %v398_v45, %v390_v33  ;;  %v785_v54 = vadd.f32 %v399_v46, %v391_v38  ;;  %v788_v57 = vadd.f32 %v400_v47, %v392_v39  ;;  %v329_v9 = vld [vmem:[%s846_s4] sm:$0x3]  ;;  %p617_p12 = pnand %p616_p11, %p734_p5  ;;  %p621_p1 = scmp.lt.s32.totalorder %s619_s7, %s615_s26 }
  0x20   : > { %v296_v0 = vmul.f32 %v594_v36, %v295_v61  ;;  %vm298_vm1 = vweird.f32 %v594_v36  ;;  %540 = vmatpush.msk.msra.mxu1 %vm334_vm2, %v329_v9 }
  0x21   : > { %v282_v58 = vadd.f32 %v281_v44, %v280_v51  ;;  %p618_p13 = pneg %p617_p12  ;;  %p622_p2 = por %p621_p1, %p620_p0 }
  0x22   : > { %v297_v3 = vadd.f32 %v594_v36, %v296_v0 }
  0x23   : > { %v284_v60 = vadd.f32 %v283_v55, %v282_v58  ;;  %p623_p3 = pnand %p622_p2, %p618_p13 }
  0x24   : > { %v299_v6 = vsel %vm298_vm1, %v594_v36, %v297_v3 }
  0x25   : > { %v286_v62 = vadd.f32 %v285_v59, %v284_v60 }
  0x27   : > { %v287_v63 = vrot.slane %v286_v62, 4 }
  0x29   : > { %v288_v1 = vadd.f32 %v287_v63, %v286_v62 }
  0x2b   : > { %v289_v2 = vrot.slane %v288_v1, 2 }
  0x2d   : > { %v290_v4 = vadd.f32 %v289_v2, %v288_v1 }
  0x2f   : > { %v291_v5 = vrot.slane %v290_v4, 1 }
  0x31   : > { %v292_v7 = vadd.f32 %v291_v5, %v290_v4 }
  0x33   : > { %v300_v8 = vmul.f32 %v299_v6, %v292_v7 }
  0x35   : > { %539 = vmatmul.msk.f32.vlgmr.msra.gmra.mxu0 %vm271_vm0, %v300_v8 }
  0xb2   : > { %v325_v10 = vpop.f32.mrf.mxu0 }
  0xb3   : > { %v328_v11 = vmax.f32 %v325_v10, 0.0 }
  0xb5   : > { %541 = vmatmul.msk.f32.vlgmr.msra.gmra.mxu1 %vm330_vm3, %v328_v11 }
 0x132   : > { %v355_v12 = vpop.f32.mrf.mxu1 }
 0x133   : > { %v358_v13 = vsub.f32 0.0, %v355_v12 }
 0x135   : > { %v359_v14 = vmul.f32 1.442695, %v358_v13 }
 0x137   : > { %595 = vpow2.f32 %v359_v14 }
 0x13d   : > { %v596_v15 = vpop.eup %595 }
 0x13e   : > { %v361_v16 = vadd.f32 1.0, %v596_v15 }
 0x140   : > { %597 = vrcp.f32 %v361_v16  ;;  %v373_v20 = vand.u32 2147483648, %v361_v16  ;;  %v371_v22 = vand.u32 2147483647, %v361_v16  ;;  %vm367_vm5 = vweird.f32 %v361_v16 }
 0x142   : > { %v374_v24 = vor.u32 1.1754944e-38, %v373_v20  ;;  %vm372_vm7 = vcmp.eq.f32.partialorder %v371_v22, 8.507059e+37 }
 0x146   : > { %v598_v17 = vpop.eup %597 }
 0x147   : > { %v363_v18 = vmul.f32 %v598_v17, %v361_v16  ;;  %vm368_vm4 = vweird.f32 %v598_v17 }
 0x148   : > { %vm369_vm6 = vmor %vm367_vm5, %vm368_vm4 }
 0x149   : > { %v364_v19 = vsub.f32 1.0, %v363_v18 }
 0x14b   : > { %v365_v21 = vmul.f32 %v598_v17, %v364_v19 }
 0x14d   : > { %v366_v23 = vadd.f32 %v598_v17, %v365_v21 }
 0x14f   : > { %v370_v25 = vsel %vm369_vm6, %v598_v17, %v366_v23 }
 0x150   : > { %v375_v26 = vsel %vm372_vm7, %v374_v24, %v370_v25 }
 0x151   : > { %v409_v27 = vperm.slane %v375_v26, 0 }
 0x153   : > { %v410_v28 = vmul.f32 %v409_v27, %v779_v43  ;;  %v411_v29 = vmul.f32 %v409_v27, %v402_v48  ;;  %v412_v30 = vmul.f32 %v409_v27, %v403_v49  ;;  %v413_v31 = vmul.f32 %v409_v27, %v404_v50 }
 0x154   : > { %v414_v32 = vmul.f32 %v409_v27, %v405_v52  ;;  %v415_v33 = vmul.f32 %v409_v27, %v406_v53  ;;  %v416_v34 = vmul.f32 %v409_v27, %v785_v54  ;;  %v417_v35 = vmul.f32 %v409_v27, %v788_v57 }
 0x155   : > { %418 = vst.msk [vmem:[%s247_s16] sm:$0xff] %vm271_vm0, %v410_v28 }
 0x156   : > { %419 = vst.msk [vmem:[%s247_s16 + $0x8] sm:$0xff] %vm271_vm0, %v411_v29 }
 0x157   : > { %420 = vst.msk [vmem:[%s247_s16 + $0x10] sm:$0xff] %vm271_vm0, %v412_v30 }
 0x158   : > { %421 = vst.msk [vmem:[%s247_s16 + $0x18] sm:$0xff] %vm271_vm0, %v413_v31 }
 0x159   : > { %422 = vst.msk [vmem:[%s247_s16 + $0x20] sm:$0xff] %vm271_vm0, %v414_v32 }
 0x15a   : > { %423 = vst.msk [vmem:[%s247_s16 + $0x28] sm:$0xff] %vm271_vm0, %v415_v33 }
 0x15b   : > { %424 = vst.msk [vmem:[%s247_s16 + $0x30] sm:$0xff] %vm271_vm0, %v416_v34 }
 0x15c   : > { %425 = vst.msk [vmem:[%s247_s16 + $0x38] sm:$0xff] %vm271_vm0, %v417_v35 }
 0x15d   : > { %626 = shalt.err (!%p623_p3)
}
 0x15e   : > { %s664_s10 = smov 128   ;;  %s665_s11 = smov 8  }
 0x15f   : > { %551 = dma.vmem_to_hbm [thread:$0]  (%p734_p5), %s440_s17, 1024, %s442_s22, %s427_s23, %s664_s10, %s664_s10, %s665_s11  }
 0x160 PF: > { %p557_p4 = scmp.ge.s32.totalorder %s661_s21, 2  ;;  %s456_s12 = sand.u32 1, %s649_s18  }
 0x161   : > { %s457_s13 = scalar_lea.sflag [#allocation3], %s456_s12 }
 0x162   : > { %p554_p7 = pnand %p557_p4, %p738_p6 }
 0x164   : > { %p555_p8 = pneg %p554_p7 }
 0x166   : > { %644 = dma.done.wait (%p555_p8), %s457_s13, 1024  }
 0x167   : > { %646 = vsyncadd (%p555_p8), %s457_s13, 4294966272  ;;  %p15_p9 = scmp.ge.s32.totalorder %s721_s24, 4   ;;  %s850_s18 = smov %s653_s19 }
 0x168   : > { %s851_s19 = smov %s657_s20  ;;  %s852_s20 = smov %s732_s27 }
 0x169   : > { %s853_s21 = smov %s721_s24  ;;  %17 = sbr.rel (!%p15_p9) target bundleno = 3 (0x3), region = 81 }
 0x16e   :  { %463 = vsyncpa [#allocation3], 1 }
 0x16f   :  { %465 = vsyncpa [#allocation3 + $0x1], 1 }

</bundles_post_ra>
